<compile_context>
chip_gen: v6e
topology: v6e:2x2x1
jax: 0.10.0
libtpu: 0.0.40
codegen_flags: <defaults>
</compile_context>

<pallas_src>
import jax
import jax.numpy as jnp
from jax import lax
from jax.experimental import pallas as pl
from jax.experimental.pallas import tpu as pltpu


# ----------------------------------------------------------------------------
# Fused forward kernel (one image per grid step)
# ----------------------------------------------------------------------------

def _cnn_kernel(alpha_ref,                       # SMEM [5]  (c1, c2, f1, f2, f3)
                x_ref,                           # [1, 32, 32]  zero-padded image
                m1_ref, b1_ref,                  # [5, 32, 168], [1, 168]
                e1r_ref, o1r_ref,                # [14, 28] x2   (row selection)
                c1e_ref, c1o_ref,                # [168, 84] x2  (col selection)
                m2_ref, b2_ref,                  # [5, 84, 160], [1, 160]
                e2r_ref, o2r_ref,                # [5, 10] x2
                c2e_ref, c2o_ref,                # [160, 80] x2
                wf1_ref, bf1_ref,                # [400, 512] (perm folded), [1, 512]
                wf2_ref, bf2_ref,                # [512, 256], [1, 256]
                wf3_ref, bf3_ref,                # [256, 64],  [1, 64]
                wf4_ref, bf4_ref,                # [64, 3],    [1, 3]
                wf5_ref, bf5_ref,                # [3, 10],    [1, 10]
                feat_ref, logp_ref,              # outputs [1,1,3], [1,1,10]
                p1_sc, p2_sc):                   # VMEM scratch [14,84], [5,80]
    f32 = jnp.float32

    def dot(a, b):
        return jnp.dot(a, b, preferred_element_type=f32)

    def prelu(v, a):
        return jnp.where(v >= 0, v, a * v)

    # ---- conv1: 5x5, pad=2, 1->6 channels; layout [28 (oh), 28*6 (ow,c)] ----
    y1 = dot(x_ref[0, 0:28, :], m1_ref[0])
    for kh in range(1, 5):
        y1 += dot(x_ref[0, kh:kh + 28, :], m1_ref[kh])
    y1 = prelu(y1 + b1_ref[...], alpha_ref[0])                       # [28, 168]

    # ---- maxpool 2x2 (fused, via 0/1 selection matmuls + max) -> [14, 84] ---
    rmax = jnp.maximum(dot(e1r_ref[...], y1), dot(o1r_ref[...], y1))  # [14, 168]
    p1_sc[...] = jnp.maximum(dot(rmax, c1e_ref[...]),
                             dot(rmax, c1o_ref[...]))                 # [14, 84]

    # ---- conv2: 5x5, valid, 6->16 channels -> [10 (oh), 10*16 (ow,c)] -------
    y2 = dot(p1_sc[0:10, :], m2_ref[0])
    for kh in range(1, 5):
        y2 += dot(p1_sc[kh:kh + 10, :], m2_ref[kh])
    y2 = prelu(y2 + b2_ref[...], alpha_ref[1])                       # [10, 160]

    # ---- maxpool 2x2 -> [5, 80] ---------------------------------------------
    rmax2 = jnp.maximum(dot(e2r_ref[...], y2), dot(o2r_ref[...], y2))  # [5, 160]
    p2_sc[...] = jnp.maximum(dot(rmax2, c2e_ref[...]),
                             dot(rmax2, c2o_ref[...]))                 # [5, 80]

    # ---- FC head: flatten permutation is folded into wf1 --------------------
    h = dot(p2_sc[0:1, :], wf1_ref[0:80, :])
    for hh in range(1, 5):
        h += dot(p2_sc[hh:hh + 1, :], wf1_ref[hh * 80:(hh + 1) * 80, :])
    h = prelu(h + bf1_ref[...], alpha_ref[2])                        # [1, 512]
    h = prelu(dot(h, wf2_ref[...]) + bf2_ref[...], alpha_ref[3])     # [1, 256]
    h = prelu(dot(h, wf3_ref[...]) + bf3_ref[...], alpha_ref[4])     # [1, 64]
    feat = dot(h, wf4_ref[...]) + bf4_ref[...]                       # [1, 3]
    feat_ref[0] = feat

    logits = dot(feat, wf5_ref[...]) + bf5_ref[...]                  # [1, 10]
    m = jnp.max(logits, axis=1, keepdims=True)
    z = logits - m
    lse = jnp.log(jnp.sum(jnp.exp(z), axis=1, keepdims=True))
    logp_ref[0] = z - lse


# ----------------------------------------------------------------------------
# One-time parameter preparation (outside the jitted forward)
# ----------------------------------------------------------------------------

def prepare_params(p):
    """Fold torch-layout weights into the matrices consumed by the kernel."""
    f32 = jnp.float32

    def fold_conv(w, w_in, w_out):
        # w: [Cout, Cin, K, K]; returns [K, w_in*Cin, w_out*Cout] with
        # M[kh, wi*Cin+ci, ow*Cout+co] = w[co, ci, kh, wi-ow] (0 <= wi-ow < K).
        cout, cin, K, _ = w.shape
        rows, cols = w_in * cin, w_out * cout
        r = jnp.arange(rows)
        c = jnp.arange(cols)
        wi, ci = r // cin, r % cin
        ow, co = c // cout, c % cout
        kw = wi[:, None] - ow[None, :]
        valid = (kw >= 0) & (kw < K)
        kw_c = jnp.clip(kw, 0, K - 1)
        mats = []
        for kh in range(K):
            vals = w[co[None, :], ci[:, None], kh, kw_c]
            mats.append(jnp.where(valid, vals, 0.0).astype(f32))
        return jnp.stack(mats, axis=0)

    def row_sel(n_out, parity):
        # [n_out, 2*n_out]; sel[i, 2*i + parity] = 1
        r = jnp.arange(n_out)[:, None]
        c = jnp.arange(2 * n_out)[None, :]
        return (c == 2 * r + parity).astype(f32)

    def col_sel(w_out, C, parity):
        # [2*w_out*C, w_out*C]; sel[(2*s+parity)*C + ch, s*C + ch] = 1
        r = jnp.arange(2 * w_out * C)[:, None]
        c = jnp.arange(w_out * C)[None, :]
        return (((r // C) == 2 * (c // C) + parity)
                & ((r % C) == (c % C))).astype(f32)

    m1 = fold_conv(p["c1_w"], 32, 28)                     # [5, 32, 168]
    m2 = fold_conv(p["c2_w"], 14, 10)                     # [5, 84, 160]
    b1r = jnp.tile(p["c1_b"], 28)[None, :].astype(f32)    # [1, 168]
    b2r = jnp.tile(p["c2_b"], 10)[None, :].astype(f32)    # [1, 160]

    # Fold the NCHW flatten permutation (c*25 + h*5 + w) into fc1's weight.
    i = jnp.arange(400)
    perm = (i % 16) * 25 + (i // 80) * 5 + ((i % 80) // 16)
    wf1 = p["f1_w"].T[perm, :].astype(f32)                # [400, 512]

    alphas = jnp.stack([p["c1_a"], p["c2_a"],
                        p["f1_a"], p["f2_a"], p["f3_a"]]).astype(f32)   # [5]

    return (alphas, m1, b1r,
            row_sel(14, 0), row_sel(14, 1), col_sel(14, 6, 0), col_sel(14, 6, 1),
            m2, b2r,
            row_sel(5, 0), row_sel(5, 1), col_sel(5, 16, 0), col_sel(5, 16, 1),
            wf1, p["f1_b"][None, :].astype(f32),
            p["f2_w"].T.astype(f32), p["f2_b"][None, :].astype(f32),
            p["f3_w"].T.astype(f32), p["f3_b"][None, :].astype(f32),
            p["f4_w"].T.astype(f32), p["f4_b"][None, :].astype(f32),
            p["f5_w"].T.astype(f32), p["f5_b"][None, :].astype(f32))


# ----------------------------------------------------------------------------
# Forward pass: one fused pallas_call, grid over batch
# ----------------------------------------------------------------------------

def cnnnet_forward(x_nchw, packed):
    B = x_nchw.shape[0]
    x = x_nchw[:, 0].astype(jnp.float32)                      # [B, 28, 28]
    xp = jnp.pad(x, ((0, 0), (2, 2), (2, 2)))                 # [B, 32, 32]

    alphas = packed[0]
    consts = packed[1:]                                       # 22 constant arrays

    def const_spec(a):
        return pl.BlockSpec(a.shape, lambda b, n=a.ndim: (0,) * n)

    in_specs = ([pl.BlockSpec(memory_space=pltpu.MemorySpace.SMEM),
                 pl.BlockSpec((1, 32, 32), lambda b: (b, 0, 0))]
                + [const_spec(a) for a in consts])

    out_specs = (pl.BlockSpec((1, 1, 3), lambda b: (b, 0, 0)),
                 pl.BlockSpec((1, 1, 10), lambda b: (b, 0, 0)))

    feat, logp = pl.pallas_call(
        _cnn_kernel,
        grid=(B,),
        in_specs=in_specs,
        out_specs=out_specs,
        out_shape=(jax.ShapeDtypeStruct((B, 1, 3), jnp.float32),
                   jax.ShapeDtypeStruct((B, 1, 10), jnp.float32)),
        scratch_shapes=[pltpu.VMEM((14, 84), jnp.float32),
                        pltpu.VMEM((5, 80), jnp.float32)],
        compiler_params=pltpu.CompilerParams(
            dimension_semantics=("parallel",),
            vmem_limit_bytes=32 * 1024 * 1024),
    )(alphas, xp, *consts)

    return feat.reshape(B, 3), logp.reshape(B, 10)


# ----------------------------------------------------------------------------
# Plain-XLA reference (used only for a numerical self-check in __main__)
# ----------------------------------------------------------------------------

def reference_forward(x_nchw, p):
    def prelu(v, a):
        return jnp.where(v >= 0, v, a * v)

    dn = ("NCHW", "OIHW", "NCHW")
    y = lax.conv_general_dilated(x_nchw.astype(jnp.float32), p["c1_w"], (1, 1),
                                 ((2, 2), (2, 2)), dimension_numbers=dn)
    y = prelu(y + p["c1_b"][None, :, None, None], p["c1_a"])
    y = lax.reduce_window(y, -jnp.inf, lax.max, (1, 1, 2, 2), (1, 1, 2, 2), "VALID")
    y = lax.conv_general_dilated(y, p["c2_w"], (1, 1), "VALID",
                                 dimension_numbers=dn)
    y = prelu(y + p["c2_b"][None, :, None, None], p["c2_a"])
    y = lax.reduce_window(y, -jnp.inf, lax.max, (1, 1, 2, 2), (1, 1, 2, 2), "VALID")
    y = y.reshape(y.shape[0], -1)                              # NCHW flatten -> 400
    h = prelu(y @ p["f1_w"].T + p["f1_b"], p["f1_a"])
    h = prelu(h @ p["f2_w"].T + p["f2_b"], p["f2_a"])
    h = prelu(h @ p["f3_w"].T + p["f3_b"], p["f3_a"])
    feat = h @ p["f4_w"].T + p["f4_b"]
    logits = feat @ p["f5_w"].T + p["f5_b"]
    return feat, jax.nn.log_softmax(logits, axis=1)


# ----------------------------------------------------------------------------
# Parameter construction (deterministic, PyTorch shape conventions)
# ----------------------------------------------------------------------------

def init_params(key):
    ks = jax.random.split(key, 16)

    def w(k, shape, scale=0.05):
        return (scale * jax.random.normal(k, shape)).astype(jnp.float32)

    params = {}
    params["c1_w"] = w(ks[0], (6, 1, 5, 5));   params["c1_b"] = w(ks[1], (6,))
    params["c1_a"] = jnp.array(0.25, jnp.float32)
    params["c2_w"] = w(ks[2], (16, 6, 5, 5));  params["c2_b"] = w(ks[3], (16,))
    params["c2_a"] = jnp.array(0.25, jnp.float32)
    params["f1_w"] = w(ks[4], (512, 400));     params["f1_b"] = w(ks[5], (512,))
    params["f1_a"] = jnp.array(0.25, jnp.float32)
    params["f2_w"] = w(ks[6], (256, 512));     params["f2_b"] = w(ks[7], (256,))
    params["f2_a"] = jnp.array(0.25, jnp.float32)
    params["f3_w"] = w(ks[8], (64, 256));      params["f3_b"] = w(ks[9], (64,))
    params["f3_a"] = jnp.array(0.25, jnp.float32)
    params["f4_w"] = w(ks[10], (3, 64));       params["f4_b"] = w(ks[11], (3,))
    params["f5_w"] = w(ks[12], (10, 3));       params["f5_b"] = w(ks[13], (10,))
    return params


# ----------------------------------------------------------------------------

if __name__ == "__main__":
    key = jax.random.PRNGKey(0)
    k_param, k_in = jax.random.split(key)
    params = init_params(k_param)
    packed = prepare_params(params)       # one-time weight folding (outside jit)

    # MNIST-like input the module implies: [B, 1, 28, 28]
    x = jax.random.normal(k_in, (2, 1, 28, 28), dtype=jnp.float32)

    fwd = jax.jit(cnnnet_forward)
    feat, logp = fwd(x, packed)
    jax.block_until_ready(feat)
    jax.block_until_ready(logp)

    assert feat.shape == (2, 3) and logp.shape == (2, 10)
    # log_softmax rows must exponentiate-sum to ~1
    assert bool(jnp.all(jnp.abs(jnp.sum(jnp.exp(logp), axis=1) - 1.0) < 1e-4))

    # Numerical self-check against a plain-XLA reference of the torch module.
    with jax.default_matmul_precision("highest"):
        feat_r, logp_r = jax.jit(reference_forward)(x, params)
    assert bool(jnp.allclose(feat, feat_r, atol=5e-3, rtol=5e-2)), "feat mismatch"
    assert bool(jnp.allclose(logp, logp_r, atol=5e-3, rtol=5e-2)), "logp mismatch"

    print("KERNEL_OK")
</pallas_src>

<mosaic_0001>
module attributes {stable_mosaic.version = 11 : i64} {
  func.func @_cnn_kernel(%arg0: i32, %arg1: memref<5xf32, #tpu.memory_space<smem>>, %arg2: memref<1x32x32xf32, #tpu.memory_space<vmem>>, %arg3: memref<5x32x168xf32, #tpu.memory_space<vmem>>, %arg4: memref<1x168xf32, #tpu.memory_space<vmem>>, %arg5: memref<14x28xf32, #tpu.memory_space<vmem>>, %arg6: memref<14x28xf32, #tpu.memory_space<vmem>>, %arg7: memref<168x84xf32, #tpu.memory_space<vmem>>, %arg8: memref<168x84xf32, #tpu.memory_space<vmem>>, %arg9: memref<5x84x160xf32, #tpu.memory_space<vmem>>, %arg10: memref<1x160xf32, #tpu.memory_space<vmem>>, %arg11: memref<5x10xf32, #tpu.memory_space<vmem>>, %arg12: memref<5x10xf32, #tpu.memory_space<vmem>>, %arg13: memref<160x80xf32, #tpu.memory_space<vmem>>, %arg14: memref<160x80xf32, #tpu.memory_space<vmem>>, %arg15: memref<400x512xf32, #tpu.memory_space<vmem>>, %arg16: memref<1x512xf32, #tpu.memory_space<vmem>>, %arg17: memref<512x256xf32, #tpu.memory_space<vmem>>, %arg18: memref<1x256xf32, #tpu.memory_space<vmem>>, %arg19: memref<256x64xf32, #tpu.memory_space<vmem>>, %arg20: memref<1x64xf32, #tpu.memory_space<vmem>>, %arg21: memref<64x3xf32, #tpu.memory_space<vmem>>, %arg22: memref<1x3xf32, #tpu.memory_space<vmem>>, %arg23: memref<3x10xf32, #tpu.memory_space<vmem>>, %arg24: memref<1x10xf32, #tpu.memory_space<vmem>>, %arg25: memref<1x1x3xf32, #tpu.memory_space<vmem>>, %arg26: memref<1x1x10xf32, #tpu.memory_space<vmem>>, %arg27: memref<14x84xf32, #tpu.memory_space<vmem>>, %arg28: memref<5x80xf32, #tpu.memory_space<vmem>>) attributes {dimension_semantics = [#tpu.dimension_semantics<parallel>], iteration_bounds = array<i64: 2>, scalar_prefetch = 0 : i64, scratch_operands = 2 : i64, tpu.core_type = #tpu.core_type<tc>, window_params = [{transform_indices = @transform_0, window_bounds = array<i64: 5>}, {transform_indices = @transform_1, window_bounds = array<i64: 1, 32, 32>}, {pipeline_mode = #tpu.pipeline_mode<synchronous>, transform_indices = @transform_2, window_bounds = array<i64: 5, 32, 168>}, {pipeline_mode = #tpu.pipeline_mode<synchronous>, transform_indices = @transform_3, window_bounds = array<i64: 1, 168>}, {pipeline_mode = #tpu.pipeline_mode<synchronous>, transform_indices = @transform_4, window_bounds = array<i64: 14, 28>}, {pipeline_mode = #tpu.pipeline_mode<synchronous>, transform_indices = @transform_5, window_bounds = array<i64: 14, 28>}, {pipeline_mode = #tpu.pipeline_mode<synchronous>, transform_indices = @transform_6, window_bounds = array<i64: 168, 84>}, {pipeline_mode = #tpu.pipeline_mode<synchronous>, transform_indices = @transform_7, window_bounds = array<i64: 168, 84>}, {pipeline_mode = #tpu.pipeline_mode<synchronous>, transform_indices = @transform_8, window_bounds = array<i64: 5, 84, 160>}, {pipeline_mode = #tpu.pipeline_mode<synchronous>, transform_indices = @transform_9, window_bounds = array<i64: 1, 160>}, {pipeline_mode = #tpu.pipeline_mode<synchronous>, transform_indices = @transform_10, window_bounds = array<i64: 5, 10>}, {pipeline_mode = #tpu.pipeline_mode<synchronous>, transform_indices = @transform_11, window_bounds = array<i64: 5, 10>}, {pipeline_mode = #tpu.pipeline_mode<synchronous>, transform_indices = @transform_12, window_bounds = array<i64: 160, 80>}, {pipeline_mode = #tpu.pipeline_mode<synchronous>, transform_indices = @transform_13, window_bounds = array<i64: 160, 80>}, {pipeline_mode = #tpu.pipeline_mode<synchronous>, transform_indices = @transform_14, window_bounds = array<i64: 400, 512>}, {pipeline_mode = #tpu.pipeline_mode<synchronous>, transform_indices = @transform_15, window_bounds = array<i64: 1, 512>}, {pipeline_mode = #tpu.pipeline_mode<synchronous>, transform_indices = @transform_16, window_bounds = array<i64: 512, 256>}, {pipeline_mode = #tpu.pipeline_mode<synchronous>, transform_indices = @transform_17, window_bounds = array<i64: 1, 256>}, {pipeline_mode = #tpu.pipeline_mode<synchronous>, transform_indices = @transform_18, window_bounds = array<i64: 256, 64>}, {pipeline_mode = #tpu.pipeline_mode<synchronous>, transform_indices = @transform_19, window_bounds = array<i64: 1, 64>}, {pipeline_mode = #tpu.pipeline_mode<synchronous>, transform_indices = @transform_20, window_bounds = array<i64: 64, 3>}, {pipeline_mode = #tpu.pipeline_mode<synchronous>, transform_indices = @transform_21, window_bounds = array<i64: 1, 3>}, {pipeline_mode = #tpu.pipeline_mode<synchronous>, transform_indices = @transform_22, window_bounds = array<i64: 3, 10>}, {pipeline_mode = #tpu.pipeline_mode<synchronous>, transform_indices = @transform_23, window_bounds = array<i64: 1, 10>}, {transform_indices = @transform_24, window_bounds = array<i64: 1, 1, 3>}, {transform_indices = @transform_25, window_bounds = array<i64: 1, 1, 10>}]} {
    %c0 = arith.constant 0 : index
    %c0_0 = arith.constant 0 : index
    %c0_1 = arith.constant 0 : index
    %0 = vector.load %arg2[%c0, %c0_0, %c0_1] : memref<1x32x32xf32, #tpu.memory_space<vmem>>, vector<1x28x32xf32>
    %1 = vector.shape_cast %0 : vector<1x28x32xf32> to vector<28x32xf32>
    %c0_2 = arith.constant 0 : index
    %c0_3 = arith.constant 0 : index
    %c0_4 = arith.constant 0 : index
    %2 = vector.load %arg3[%c0_2, %c0_3, %c0_4] : memref<5x32x168xf32, #tpu.memory_space<vmem>>, vector<1x32x168xf32>
    %3 = vector.shape_cast %2 : vector<1x32x168xf32> to vector<32x168xf32>
    %cst = arith.constant dense<0.000000e+00> : vector<28x168xf32>
    %4 = tpu.matmul %1, %3, %cst {dimension_numbers = #tpu.dot_dimension_numbers<[1], [0], [0], [1], [0, 0, 1, 1], [], []>} : vector<28x32xf32>, vector<32x168xf32>, vector<28x168xf32> -> vector<28x168xf32>
    %c0_5 = arith.constant 0 : index
    %c1 = arith.constant 1 : index
    %c0_6 = arith.constant 0 : index
    %5 = vector.load %arg2[%c0_5, %c1, %c0_6] : memref<1x32x32xf32, #tpu.memory_space<vmem>>, vector<1x28x32xf32>
    %6 = vector.shape_cast %5 : vector<1x28x32xf32> to vector<28x32xf32>
    %c1_7 = arith.constant 1 : index
    %c0_8 = arith.constant 0 : index
    %c0_9 = arith.constant 0 : index
    %7 = vector.load %arg3[%c1_7, %c0_8, %c0_9] : memref<5x32x168xf32, #tpu.memory_space<vmem>>, vector<1x32x168xf32>
    %8 = vector.shape_cast %7 : vector<1x32x168xf32> to vector<32x168xf32>
    %cst_10 = arith.constant dense<0.000000e+00> : vector<28x168xf32>
    %9 = tpu.matmul %6, %8, %cst_10 {dimension_numbers = #tpu.dot_dimension_numbers<[1], [0], [0], [1], [0, 0, 1, 1], [], []>} : vector<28x32xf32>, vector<32x168xf32>, vector<28x168xf32> -> vector<28x168xf32>
    %10 = arith.addf %4, %9 : vector<28x168xf32>
    %c0_11 = arith.constant 0 : index
    %c2 = arith.constant 2 : index
    %c0_12 = arith.constant 0 : index
    %11 = vector.load %arg2[%c0_11, %c2, %c0_12] : memref<1x32x32xf32, #tpu.memory_space<vmem>>, vector<1x28x32xf32>
    %12 = vector.shape_cast %11 : vector<1x28x32xf32> to vector<28x32xf32>
    %c2_13 = arith.constant 2 : index
    %c0_14 = arith.constant 0 : index
    %c0_15 = arith.constant 0 : index
    %13 = vector.load %arg3[%c2_13, %c0_14, %c0_15] : memref<5x32x168xf32, #tpu.memory_space<vmem>>, vector<1x32x168xf32>
    %14 = vector.shape_cast %13 : vector<1x32x168xf32> to vector<32x168xf32>
    %cst_16 = arith.constant dense<0.000000e+00> : vector<28x168xf32>
    %15 = tpu.matmul %12, %14, %cst_16 {dimension_numbers = #tpu.dot_dimension_numbers<[1], [0], [0], [1], [0, 0, 1, 1], [], []>} : vector<28x32xf32>, vector<32x168xf32>, vector<28x168xf32> -> vector<28x168xf32>
    %16 = arith.addf %10, %15 : vector<28x168xf32>
    %c0_17 = arith.constant 0 : index
    %c3 = arith.constant 3 : index
    %c0_18 = arith.constant 0 : index
    %17 = vector.load %arg2[%c0_17, %c3, %c0_18] : memref<1x32x32xf32, #tpu.memory_space<vmem>>, vector<1x28x32xf32>
    %18 = vector.shape_cast %17 : vector<1x28x32xf32> to vector<28x32xf32>
    %c3_19 = arith.constant 3 : index
    %c0_20 = arith.constant 0 : index
    %c0_21 = arith.constant 0 : index
    %19 = vector.load %arg3[%c3_19, %c0_20, %c0_21] : memref<5x32x168xf32, #tpu.memory_space<vmem>>, vector<1x32x168xf32>
    %20 = vector.shape_cast %19 : vector<1x32x168xf32> to vector<32x168xf32>
    %cst_22 = arith.constant dense<0.000000e+00> : vector<28x168xf32>
    %21 = tpu.matmul %18, %20, %cst_22 {dimension_numbers = #tpu.dot_dimension_numbers<[1], [0], [0], [1], [0, 0, 1, 1], [], []>} : vector<28x32xf32>, vector<32x168xf32>, vector<28x168xf32> -> vector<28x168xf32>
    %22 = arith.addf %16, %21 : vector<28x168xf32>
    %c0_23 = arith.constant 0 : index
    %c4 = arith.constant 4 : index
    %c0_24 = arith.constant 0 : index
    %23 = vector.load %arg2[%c0_23, %c4, %c0_24] : memref<1x32x32xf32, #tpu.memory_space<vmem>>, vector<1x28x32xf32>
    %24 = vector.shape_cast %23 : vector<1x28x32xf32> to vector<28x32xf32>
    %c4_25 = arith.constant 4 : index
    %c0_26 = arith.constant 0 : index
    %c0_27 = arith.constant 0 : index
    %25 = vector.load %arg3[%c4_25, %c0_26, %c0_27] : memref<5x32x168xf32, #tpu.memory_space<vmem>>, vector<1x32x168xf32>
    %26 = vector.shape_cast %25 : vector<1x32x168xf32> to vector<32x168xf32>
    %cst_28 = arith.constant dense<0.000000e+00> : vector<28x168xf32>
    %27 = tpu.matmul %24, %26, %cst_28 {dimension_numbers = #tpu.dot_dimension_numbers<[1], [0], [0], [1], [0, 0, 1, 1], [], []>} : vector<28x32xf32>, vector<32x168xf32>, vector<28x168xf32> -> vector<28x168xf32>
    %28 = arith.addf %22, %27 : vector<28x168xf32>
    %c0_29 = arith.constant 0 : index
    %c0_30 = arith.constant 0 : index
    %29 = vector.load %arg4[%c0_29, %c0_30] : memref<1x168xf32, #tpu.memory_space<vmem>>, vector<1x168xf32>
    %30 = vector.broadcast %29 : vector<1x168xf32> to vector<28x168xf32>
    %31 = arith.addf %28, %30 : vector<28x168xf32>
    %c0_31 = arith.constant 0 : index
    %32 = memref.load %arg1[%c0_31] : memref<5xf32, #tpu.memory_space<smem>>
    %cst_32 = arith.constant 0.000000e+00 : f32
    %33 = vector.broadcast %cst_32 : f32 to vector<28x168xf32>
    %34 = arith.cmpf oge, %31, %33 : vector<28x168xf32>
    %35 = vector.broadcast %32 : f32 to vector<28x168xf32>
    %36 = arith.mulf %35, %31 : vector<28x168xf32>
    %37 = arith.select %34, %31, %36 : vector<28x168xi1>, vector<28x168xf32>
    %c0_33 = arith.constant 0 : index
    %c0_34 = arith.constant 0 : index
    %38 = vector.load %arg5[%c0_33, %c0_34] : memref<14x28xf32, #tpu.memory_space<vmem>>, vector<14x28xf32>
    %cst_35 = arith.constant dense<0.000000e+00> : vector<14x168xf32>
    %39 = tpu.matmul %38, %37, %cst_35 {dimension_numbers = #tpu.dot_dimension_numbers<[1], [0], [0], [1], [0, 0, 1, 1], [], []>} : vector<14x28xf32>, vector<28x168xf32>, vector<14x168xf32> -> vector<14x168xf32>
    %c0_36 = arith.constant 0 : index
    %c0_37 = arith.constant 0 : index
    %40 = vector.load %arg6[%c0_36, %c0_37] : memref<14x28xf32, #tpu.memory_space<vmem>>, vector<14x28xf32>
    %cst_38 = arith.constant dense<0.000000e+00> : vector<14x168xf32>
    %41 = tpu.matmul %40, %37, %cst_38 {dimension_numbers = #tpu.dot_dimension_numbers<[1], [0], [0], [1], [0, 0, 1, 1], [], []>} : vector<14x28xf32>, vector<28x168xf32>, vector<14x168xf32> -> vector<14x168xf32>
    %42 = arith.maximumf %39, %41 : vector<14x168xf32>
    %c0_39 = arith.constant 0 : index
    %c0_40 = arith.constant 0 : index
    %43 = vector.load %arg7[%c0_39, %c0_40] : memref<168x84xf32, #tpu.memory_space<vmem>>, vector<168x84xf32>
    %cst_41 = arith.constant dense<0.000000e+00> : vector<14x84xf32>
    %44 = tpu.matmul %42, %43, %cst_41 {dimension_numbers = #tpu.dot_dimension_numbers<[1], [0], [0], [1], [0, 0, 1, 1], [], []>} : vector<14x168xf32>, vector<168x84xf32>, vector<14x84xf32> -> vector<14x84xf32>
    %c0_42 = arith.constant 0 : index
    %c0_43 = arith.constant 0 : index
    %45 = vector.load %arg8[%c0_42, %c0_43] : memref<168x84xf32, #tpu.memory_space<vmem>>, vector<168x84xf32>
    %cst_44 = arith.constant dense<0.000000e+00> : vector<14x84xf32>
    %46 = tpu.matmul %42, %45, %cst_44 {dimension_numbers = #tpu.dot_dimension_numbers<[1], [0], [0], [1], [0, 0, 1, 1], [], []>} : vector<14x168xf32>, vector<168x84xf32>, vector<14x84xf32> -> vector<14x84xf32>
    %47 = arith.maximumf %44, %46 : vector<14x84xf32>
    %c0_45 = arith.constant 0 : index
    %c0_46 = arith.constant 0 : index
    %48 = vector.load %arg27[%c0_45, %c0_46] : memref<14x84xf32, #tpu.memory_space<vmem>>, vector<14x84xf32>
    tpu.vector_store %arg27[%c0_45, %c0_46], %47 {strides = array<i32>} : memref<14x84xf32, #tpu.memory_space<vmem>>, vector<14x84xf32>,
    %c0_47 = arith.constant 0 : index
    %c0_48 = arith.constant 0 : index
    %49 = vector.load %arg27[%c0_47, %c0_48] : memref<14x84xf32, #tpu.memory_space<vmem>>, vector<10x84xf32>
    %c0_49 = arith.constant 0 : index
    %c0_50 = arith.constant 0 : index
    %c0_51 = arith.constant 0 : index
    %50 = vector.load %arg9[%c0_49, %c0_50, %c0_51] : memref<5x84x160xf32, #tpu.memory_space<vmem>>, vector<1x84x160xf32>
    %51 = vector.shape_cast %50 : vector<1x84x160xf32> to vector<84x160xf32>
    %cst_52 = arith.constant dense<0.000000e+00> : vector<10x160xf32>
    %52 = tpu.matmul %49, %51, %cst_52 {dimension_numbers = #tpu.dot_dimension_numbers<[1], [0], [0], [1], [0, 0, 1, 1], [], []>} : vector<10x84xf32>, vector<84x160xf32>, vector<10x160xf32> -> vector<10x160xf32>
    %c1_53 = arith.constant 1 : index
    %c0_54 = arith.constant 0 : index
    %53 = vector.load %arg27[%c1_53, %c0_54] : memref<14x84xf32, #tpu.memory_space<vmem>>, vector<10x84xf32>
    %c1_55 = arith.constant 1 : index
    %c0_56 = arith.constant 0 : index
    %c0_57 = arith.constant 0 : index
    %54 = vector.load %arg9[%c1_55, %c0_56, %c0_57] : memref<5x84x160xf32, #tpu.memory_space<vmem>>, vector<1x84x160xf32>
    %55 = vector.shape_cast %54 : vector<1x84x160xf32> to vector<84x160xf32>
    %cst_58 = arith.constant dense<0.000000e+00> : vector<10x160xf32>
    %56 = tpu.matmul %53, %55, %cst_58 {dimension_numbers = #tpu.dot_dimension_numbers<[1], [0], [0], [1], [0, 0, 1, 1], [], []>} : vector<10x84xf32>, vector<84x160xf32>, vector<10x160xf32> -> vector<10x160xf32>
    %57 = arith.addf %52, %56 : vector<10x160xf32>
    %c2_59 = arith.constant 2 : index
    %c0_60 = arith.constant 0 : index
    %58 = vector.load %arg27[%c2_59, %c0_60] : memref<14x84xf32, #tpu.memory_space<vmem>>, vector<10x84xf32>
    %c2_61 = arith.constant 2 : index
    %c0_62 = arith.constant 0 : index
    %c0_63 = arith.constant 0 : index
    %59 = vector.load %arg9[%c2_61, %c0_62, %c0_63] : memref<5x84x160xf32, #tpu.memory_space<vmem>>, vector<1x84x160xf32>
    %60 = vector.shape_cast %59 : vector<1x84x160xf32> to vector<84x160xf32>
    %cst_64 = arith.constant dense<0.000000e+00> : vector<10x160xf32>
    %61 = tpu.matmul %58, %60, %cst_64 {dimension_numbers = #tpu.dot_dimension_numbers<[1], [0], [0], [1], [0, 0, 1, 1], [], []>} : vector<10x84xf32>, vector<84x160xf32>, vector<10x160xf32> -> vector<10x160xf32>
    %62 = arith.addf %57, %61 : vector<10x160xf32>
    %c3_65 = arith.constant 3 : index
    %c0_66 = arith.constant 0 : index
    %63 = vector.load %arg27[%c3_65, %c0_66] : memref<14x84xf32, #tpu.memory_space<vmem>>, vector<10x84xf32>
    %c3_67 = arith.constant 3 : index
    %c0_68 = arith.constant 0 : index
    %c0_69 = arith.constant 0 : index
    %64 = vector.load %arg9[%c3_67, %c0_68, %c0_69] : memref<5x84x160xf32, #tpu.memory_space<vmem>>, vector<1x84x160xf32>
    %65 = vector.shape_cast %64 : vector<1x84x160xf32> to vector<84x160xf32>
    %cst_70 = arith.constant dense<0.000000e+00> : vector<10x160xf32>
    %66 = tpu.matmul %63, %65, %cst_70 {dimension_numbers = #tpu.dot_dimension_numbers<[1], [0], [0], [1], [0, 0, 1, 1], [], []>} : vector<10x84xf32>, vector<84x160xf32>, vector<10x160xf32> -> vector<10x160xf32>
    %67 = arith.addf %62, %66 : vector<10x160xf32>
    %c4_71 = arith.constant 4 : index
    %c0_72 = arith.constant 0 : index
    %68 = vector.load %arg27[%c4_71, %c0_72] : memref<14x84xf32, #tpu.memory_space<vmem>>, vector<10x84xf32>
    %c4_73 = arith.constant 4 : index
    %c0_74 = arith.constant 0 : index
    %c0_75 = arith.constant 0 : index
    %69 = vector.load %arg9[%c4_73, %c0_74, %c0_75] : memref<5x84x160xf32, #tpu.memory_space<vmem>>, vector<1x84x160xf32>
    %70 = vector.shape_cast %69 : vector<1x84x160xf32> to vector<84x160xf32>
    %cst_76 = arith.constant dense<0.000000e+00> : vector<10x160xf32>
    %71 = tpu.matmul %68, %70, %cst_76 {dimension_numbers = #tpu.dot_dimension_numbers<[1], [0], [0], [1], [0, 0, 1, 1], [], []>} : vector<10x84xf32>, vector<84x160xf32>, vector<10x160xf32> -> vector<10x160xf32>
    %72 = arith.addf %67, %71 : vector<10x160xf32>
    %c0_77 = arith.constant 0 : index
    %c0_78 = arith.constant 0 : index
    %73 = vector.load %arg10[%c0_77, %c0_78] : memref<1x160xf32, #tpu.memory_space<vmem>>, vector<1x160xf32>
    %74 = vector.broadcast %73 : vector<1x160xf32> to vector<10x160xf32>
    %75 = arith.addf %72, %74 : vector<10x160xf32>
    %c1_79 = arith.constant 1 : index
    %76 = memref.load %arg1[%c1_79] : memref<5xf32, #tpu.memory_space<smem>>
    %cst_80 = arith.constant 0.000000e+00 : f32
    %77 = vector.broadcast %cst_80 : f32 to vector<10x160xf32>
    %78 = arith.cmpf oge, %75, %77 : vector<10x160xf32>
    %79 = vector.broadcast %76 : f32 to vector<10x160xf32>
    %80 = arith.mulf %79, %75 : vector<10x160xf32>
    %81 = arith.select %78, %75, %80 : vector<10x160xi1>, vector<10x160xf32>
    %c0_81 = arith.constant 0 : index
    %c0_82 = arith.constant 0 : index
    %82 = vector.load %arg11[%c0_81, %c0_82] : memref<5x10xf32, #tpu.memory_space<vmem>>, vector<5x10xf32>
    %cst_83 = arith.constant dense<0.000000e+00> : vector<5x160xf32>
    %83 = tpu.matmul %82, %81, %cst_83 {dimension_numbers = #tpu.dot_dimension_numbers<[1], [0], [0], [1], [0, 0, 1, 1], [], []>} : vector<5x10xf32>, vector<10x160xf32>, vector<5x160xf32> -> vector<5x160xf32>
    %c0_84 = arith.constant 0 : index
    %c0_85 = arith.constant 0 : index
    %84 = vector.load %arg12[%c0_84, %c0_85] : memref<5x10xf32, #tpu.memory_space<vmem>>, vector<5x10xf32>
    %cst_86 = arith.constant dense<0.000000e+00> : vector<5x160xf32>
    %85 = tpu.matmul %84, %81, %cst_86 {dimension_numbers = #tpu.dot_dimension_numbers<[1], [0], [0], [1], [0, 0, 1, 1], [], []>} : vector<5x10xf32>, vector<10x160xf32>, vector<5x160xf32> -> vector<5x160xf32>
    %86 = arith.maximumf %83, %85 : vector<5x160xf32>
    %c0_87 = arith.constant 0 : index
    %c0_88 = arith.constant 0 : index
    %87 = vector.load %arg13[%c0_87, %c0_88] : memref<160x80xf32, #tpu.memory_space<vmem>>, vector<160x80xf32>
    %cst_89 = arith.constant dense<0.000000e+00> : vector<5x80xf32>
    %88 = tpu.matmul %86, %87, %cst_89 {dimension_numbers = #tpu.dot_dimension_numbers<[1], [0], [0], [1], [0, 0, 1, 1], [], []>} : vector<5x160xf32>, vector<160x80xf32>, vector<5x80xf32> -> vector<5x80xf32>
    %c0_90 = arith.constant 0 : index
    %c0_91 = arith.constant 0 : index
    %89 = vector.load %arg14[%c0_90, %c0_91] : memref<160x80xf32, #tpu.memory_space<vmem>>, vector<160x80xf32>
    %cst_92 = arith.constant dense<0.000000e+00> : vector<5x80xf32>
    %90 = tpu.matmul %86, %89, %cst_92 {dimension_numbers = #tpu.dot_dimension_numbers<[1], [0], [0], [1], [0, 0, 1, 1], [], []>} : vector<5x160xf32>, vector<160x80xf32>, vector<5x80xf32> -> vector<5x80xf32>
    %91 = arith.maximumf %88, %90 : vector<5x80xf32>
    %c0_93 = arith.constant 0 : index
    %c0_94 = arith.constant 0 : index
    %92 = vector.load %arg28[%c0_93, %c0_94] : memref<5x80xf32, #tpu.memory_space<vmem>>, vector<5x80xf32>
    tpu.vector_store %arg28[%c0_93, %c0_94], %91 {strides = array<i32>} : memref<5x80xf32, #tpu.memory_space<vmem>>, vector<5x80xf32>,
    %c0_95 = arith.constant 0 : index
    %c0_96 = arith.constant 0 : index
    %93 = vector.load %arg28[%c0_95, %c0_96] : memref<5x80xf32, #tpu.memory_space<vmem>>, vector<1x80xf32>
    %c0_97 = arith.constant 0 : index
    %c0_98 = arith.constant 0 : index
    %94 = vector.load %arg15[%c0_97, %c0_98] : memref<400x512xf32, #tpu.memory_space<vmem>>, vector<80x512xf32>
    %cst_99 = arith.constant dense<0.000000e+00> : vector<1x512xf32>
    %95 = tpu.matmul %93, %94, %cst_99 {dimension_numbers = #tpu.dot_dimension_numbers<[1], [0], [0], [1], [0, 0, 1, 1], [], []>} : vector<1x80xf32>, vector<80x512xf32>, vector<1x512xf32> -> vector<1x512xf32>
    %c1_100 = arith.constant 1 : index
    %c0_101 = arith.constant 0 : index
    %96 = vector.load %arg28[%c1_100, %c0_101] : memref<5x80xf32, #tpu.memory_space<vmem>>, vector<1x80xf32>
    %c80 = arith.constant 80 : index
    %c0_102 = arith.constant 0 : index
    %97 = vector.load %arg15[%c80, %c0_102] : memref<400x512xf32, #tpu.memory_space<vmem>>, vector<80x512xf32>
    %cst_103 = arith.constant dense<0.000000e+00> : vector<1x512xf32>
    %98 = tpu.matmul %96, %97, %cst_103 {dimension_numbers = #tpu.dot_dimension_numbers<[1], [0], [0], [1], [0, 0, 1, 1], [], []>} : vector<1x80xf32>, vector<80x512xf32>, vector<1x512xf32> -> vector<1x512xf32>
    %99 = arith.addf %95, %98 : vector<1x512xf32>
    %c2_104 = arith.constant 2 : index
    %c0_105 = arith.constant 0 : index
    %100 = vector.load %arg28[%c2_104, %c0_105] : memref<5x80xf32, #tpu.memory_space<vmem>>, vector<1x80xf32>
    %c160 = arith.constant 160 : index
    %c0_106 = arith.constant 0 : index
    %101 = vector.load %arg15[%c160, %c0_106] : memref<400x512xf32, #tpu.memory_space<vmem>>, vector<80x512xf32>
    %cst_107 = arith.constant dense<0.000000e+00> : vector<1x512xf32>
    %102 = tpu.matmul %100, %101, %cst_107 {dimension_numbers = #tpu.dot_dimension_numbers<[1], [0], [0], [1], [0, 0, 1, 1], [], []>} : vector<1x80xf32>, vector<80x512xf32>, vector<1x512xf32> -> vector<1x512xf32>
    %103 = arith.addf %99, %102 : vector<1x512xf32>
    %c3_108 = arith.constant 3 : index
    %c0_109 = arith.constant 0 : index
    %104 = vector.load %arg28[%c3_108, %c0_109] : memref<5x80xf32, #tpu.memory_space<vmem>>, vector<1x80xf32>
    %c240 = arith.constant 240 : index
    %c0_110 = arith.constant 0 : index
    %105 = vector.load %arg15[%c240, %c0_110] : memref<400x512xf32, #tpu.memory_space<vmem>>, vector<80x512xf32>
    %cst_111 = arith.constant dense<0.000000e+00> : vector<1x512xf32>
    %106 = tpu.matmul %104, %105, %cst_111 {dimension_numbers = #tpu.dot_dimension_numbers<[1], [0], [0], [1], [0, 0, 1, 1], [], []>} : vector<1x80xf32>, vector<80x512xf32>, vector<1x512xf32> -> vector<1x512xf32>
    %107 = arith.addf %103, %106 : vector<1x512xf32>
    %c4_112 = arith.constant 4 : index
    %c0_113 = arith.constant 0 : index
    %108 = vector.load %arg28[%c4_112, %c0_113] : memref<5x80xf32, #tpu.memory_space<vmem>>, vector<1x80xf32>
    %c320 = arith.constant 320 : index
    %c0_114 = arith.constant 0 : index
    %109 = vector.load %arg15[%c320, %c0_114] : memref<400x512xf32, #tpu.memory_space<vmem>>, vector<80x512xf32>
    %cst_115 = arith.constant dense<0.000000e+00> : vector<1x512xf32>
    %110 = tpu.matmul %108, %109, %cst_115 {dimension_numbers = #tpu.dot_dimension_numbers<[1], [0], [0], [1], [0, 0, 1, 1], [], []>} : vector<1x80xf32>, vector<80x512xf32>, vector<1x512xf32> -> vector<1x512xf32>
    %111 = arith.addf %107, %110 : vector<1x512xf32>
    %c0_116 = arith.constant 0 : index
    %c0_117 = arith.constant 0 : index
    %112 = vector.load %arg16[%c0_116, %c0_117] : memref<1x512xf32, #tpu.memory_space<vmem>>, vector<1x512xf32>
    %113 = arith.addf %111, %112 : vector<1x512xf32>
    %c2_118 = arith.constant 2 : index
    %114 = memref.load %arg1[%c2_118] : memref<5xf32, #tpu.memory_space<smem>>
    %cst_119 = arith.constant 0.000000e+00 : f32
    %115 = vector.broadcast %cst_119 : f32 to vector<1x512xf32>
    %116 = arith.cmpf oge, %113, %115 : vector<1x512xf32>
    %117 = vector.broadcast %114 : f32 to vector<1x512xf32>
    %118 = arith.mulf %117, %113 : vector<1x512xf32>
    %119 = arith.select %116, %113, %118 : vector<1x512xi1>, vector<1x512xf32>
    %c0_120 = arith.constant 0 : index
    %c0_121 = arith.constant 0 : index
    %120 = vector.load %arg17[%c0_120, %c0_121] : memref<512x256xf32, #tpu.memory_space<vmem>>, vector<512x256xf32>
    %cst_122 = arith.constant dense<0.000000e+00> : vector<1x256xf32>
    %121 = tpu.matmul %119, %120, %cst_122 {dimension_numbers = #tpu.dot_dimension_numbers<[1], [0], [0], [1], [0, 0, 1, 1], [], []>} : vector<1x512xf32>, vector<512x256xf32>, vector<1x256xf32> -> vector<1x256xf32>
    %c0_123 = arith.constant 0 : index
    %c0_124 = arith.constant 0 : index
    %122 = vector.load %arg18[%c0_123, %c0_124] : memref<1x256xf32, #tpu.memory_space<vmem>>, vector<1x256xf32>
    %123 = arith.addf %121, %122 : vector<1x256xf32>
    %c3_125 = arith.constant 3 : index
    %124 = memref.load %arg1[%c3_125] : memref<5xf32, #tpu.memory_space<smem>>
    %cst_126 = arith.constant 0.000000e+00 : f32
    %125 = vector.broadcast %cst_126 : f32 to vector<1x256xf32>
    %126 = arith.cmpf oge, %123, %125 : vector<1x256xf32>
    %127 = vector.broadcast %124 : f32 to vector<1x256xf32>
    %128 = arith.mulf %127, %123 : vector<1x256xf32>
    %129 = arith.select %126, %123, %128 : vector<1x256xi1>, vector<1x256xf32>
    %c0_127 = arith.constant 0 : index
    %c0_128 = arith.constant 0 : index
    %130 = vector.load %arg19[%c0_127, %c0_128] : memref<256x64xf32, #tpu.memory_space<vmem>>, vector<256x64xf32>
    %cst_129 = arith.constant dense<0.000000e+00> : vector<1x64xf32>
    %131 = tpu.matmul %129, %130, %cst_129 {dimension_numbers = #tpu.dot_dimension_numbers<[1], [0], [0], [1], [0, 0, 1, 1], [], []>} : vector<1x256xf32>, vector<256x64xf32>, vector<1x64xf32> -> vector<1x64xf32>
    %c0_130 = arith.constant 0 : index
    %c0_131 = arith.constant 0 : index
    %132 = vector.load %arg20[%c0_130, %c0_131] : memref<1x64xf32, #tpu.memory_space<vmem>>, vector<1x64xf32>
    %133 = arith.addf %131, %132 : vector<1x64xf32>
    %c4_132 = arith.constant 4 : index
    %134 = memref.load %arg1[%c4_132] : memref<5xf32, #tpu.memory_space<smem>>
    %cst_133 = arith.constant 0.000000e+00 : f32
    %135 = vector.broadcast %cst_133 : f32 to vector<1x64xf32>
    %136 = arith.cmpf oge, %133, %135 : vector<1x64xf32>
    %137 = vector.broadcast %134 : f32 to vector<1x64xf32>
    %138 = arith.mulf %137, %133 : vector<1x64xf32>
    %139 = arith.select %136, %133, %138 : vector<1x64xi1>, vector<1x64xf32>
    %c0_134 = arith.constant 0 : index
    %c0_135 = arith.constant 0 : index
    %140 = vector.load %arg21[%c0_134, %c0_135] : memref<64x3xf32, #tpu.memory_space<vmem>>, vector<64x3xf32>
    %cst_136 = arith.constant dense<0.000000e+00> : vector<1x3xf32>
    %141 = tpu.matmul %139, %140, %cst_136 {dimension_numbers = #tpu.dot_dimension_numbers<[1], [0], [0], [1], [0, 0, 1, 1], [], []>} : vector<1x64xf32>, vector<64x3xf32>, vector<1x3xf32> -> vector<1x3xf32>
    %c0_137 = arith.constant 0 : index
    %c0_138 = arith.constant 0 : index
    %142 = vector.load %arg22[%c0_137, %c0_138] : memref<1x3xf32, #tpu.memory_space<vmem>>, vector<1x3xf32>
    %143 = arith.addf %141, %142 : vector<1x3xf32>
    %c0_139 = arith.constant 0 : index
    %c0_140 = arith.constant 0 : index
    %c0_141 = arith.constant 0 : index
    %144 = vector.load %arg25[%c0_139, %c0_140, %c0_141] : memref<1x1x3xf32, #tpu.memory_space<vmem>>, vector<1x1x3xf32>
    %145 = vector.shape_cast %144 : vector<1x1x3xf32> to vector<1x3xf32>
    %146 = vector.shape_cast %143 : vector<1x3xf32> to vector<1x1x3xf32>
    tpu.vector_store %arg25[%c0_139, %c0_140, %c0_141], %146 {strides = array<i32>} : memref<1x1x3xf32, #tpu.memory_space<vmem>>, vector<1x1x3xf32>,
    %c0_142 = arith.constant 0 : index
    %c0_143 = arith.constant 0 : index
    %147 = vector.load %arg23[%c0_142, %c0_143] : memref<3x10xf32, #tpu.memory_space<vmem>>, vector<3x10xf32>
    %cst_144 = arith.constant dense<0.000000e+00> : vector<1x10xf32>
    %148 = tpu.matmul %143, %147, %cst_144 {dimension_numbers = #tpu.dot_dimension_numbers<[1], [0], [0], [1], [0, 0, 1, 1], [], []>} : vector<1x3xf32>, vector<3x10xf32>, vector<1x10xf32> -> vector<1x10xf32>
    %c0_145 = arith.constant 0 : index
    %c0_146 = arith.constant 0 : index
    %149 = vector.load %arg24[%c0_145, %c0_146] : memref<1x10xf32, #tpu.memory_space<vmem>>, vector<1x10xf32>
    %150 = arith.addf %148, %149 : vector<1x10xf32>
    %cst_147 = arith.constant dense<0xFF800000> : vector<1xf32>
    %151 = vector.multi_reduction <maximumf>, %150, %cst_147 [1] : vector<1x10xf32> to vector<1xf32>
    %152 = vector.shape_cast %151 : vector<1xf32> to vector<1x1xf32>
    %153 = vector.broadcast %152 : vector<1x1xf32> to vector<1x10xf32>
    %154 = arith.subf %150, %153 : vector<1x10xf32>
    %155 = math.exp %154 : vector<1x10xf32>
    %cst_148 = arith.constant dense<0.000000e+00> : vector<1xf32>
    %156 = vector.multi_reduction <add>, %155, %cst_148 [1] : vector<1x10xf32> to vector<1xf32>
    %157 = vector.shape_cast %156 : vector<1xf32> to vector<1x1xf32>
    %158 = math.log %157 : vector<1x1xf32>
    %159 = vector.broadcast %158 : vector<1x1xf32> to vector<1x10xf32>
    %160 = arith.subf %154, %159 : vector<1x10xf32>
    %c0_149 = arith.constant 0 : index
    %c0_150 = arith.constant 0 : index
    %c0_151 = arith.constant 0 : index
    %161 = vector.load %arg26[%c0_149, %c0_150, %c0_151] : memref<1x1x10xf32, #tpu.memory_space<vmem>>, vector<1x1x10xf32>
    %162 = vector.shape_cast %161 : vector<1x1x10xf32> to vector<1x10xf32>
    %163 = vector.shape_cast %160 : vector<1x10xf32> to vector<1x1x10xf32>
    tpu.vector_store %arg26[%c0_149, %c0_150, %c0_151], %163 {strides = array<i32>} : memref<1x1x10xf32, #tpu.memory_space<vmem>>, vector<1x1x10xf32>,
    return
  }
  func.func @transform_0(%arg0: i32) -> i32 {
    %c0_i32 = arith.constant 0 : i32
    %c0_i32_0 = arith.constant 0 : i32
    return %c0_i32 : i32
  }
  func.func @transform_1(%arg0: i32) -> (i32, i32, i32) {
    %c0_i32 = arith.constant 0 : i32
    %c0_i32_0 = arith.constant 0 : i32
    %c0_i32_1 = arith.constant 0 : i32
    return %arg0, %c0_i32, %c0_i32_0 : i32, i32, i32
  }
  func.func @transform_2(%arg0: i32) -> (i32, i32, i32) {
    %c0_i32 = arith.constant 0 : i32
    %c0_i32_0 = arith.constant 0 : i32
    %c0_i32_1 = arith.constant 0 : i32
    %c0_i32_2 = arith.constant 0 : i32
    return %c0_i32, %c0_i32_0, %c0_i32_1 : i32, i32, i32
  }
  func.func @transform_3(%arg0: i32) -> (i32, i32) {
    %c0_i32 = arith.constant 0 : i32
    %c0_i32_0 = arith.constant 0 : i32
    %c0_i32_1 = arith.constant 0 : i32
    return %c0_i32, %c0_i32_0 : i32, i32
  }
  func.func @transform_4(%arg0: i32) -> (i32, i32) {
    %c0_i32 = arith.constant 0 : i32
    %c0_i32_0 = arith.constant 0 : i32
    %c0_i32_1 = arith.constant 0 : i32
    return %c0_i32, %c0_i32_0 : i32, i32
  }
  func.func @transform_5(%arg0: i32) -> (i32, i32) {
    %c0_i32 = arith.constant 0 : i32
    %c0_i32_0 = arith.constant 0 : i32
    %c0_i32_1 = arith.constant 0 : i32
    return %c0_i32, %c0_i32_0 : i32, i32
  }
  func.func @transform_6(%arg0: i32) -> (i32, i32) {
    %c0_i32 = arith.constant 0 : i32
    %c0_i32_0 = arith.constant 0 : i32
    %c0_i32_1 = arith.constant 0 : i32
    return %c0_i32, %c0_i32_0 : i32, i32
  }
  func.func @transform_7(%arg0: i32) -> (i32, i32) {
    %c0_i32 = arith.constant 0 : i32
    %c0_i32_0 = arith.constant 0 : i32
    %c0_i32_1 = arith.constant 0 : i32
    return %c0_i32, %c0_i32_0 : i32, i32
  }
  func.func @transform_8(%arg0: i32) -> (i32, i32, i32) {
    %c0_i32 = arith.constant 0 : i32
    %c0_i32_0 = arith.constant 0 : i32
    %c0_i32_1 = arith.constant 0 : i32
    %c0_i32_2 = arith.constant 0 : i32
    return %c0_i32, %c0_i32_0, %c0_i32_1 : i32, i32, i32
  }
  func.func @transform_9(%arg0: i32) -> (i32, i32) {
    %c0_i32 = arith.constant 0 : i32
    %c0_i32_0 = arith.constant 0 : i32
    %c0_i32_1 = arith.constant 0 : i32
    return %c0_i32, %c0_i32_0 : i32, i32
  }
  func.func @transform_10(%arg0: i32) -> (i32, i32) {
    %c0_i32 = arith.constant 0 : i32
    %c0_i32_0 = arith.constant 0 : i32
    %c0_i32_1 = arith.constant 0 : i32
    return %c0_i32, %c0_i32_0 : i32, i32
  }
  func.func @transform_11(%arg0: i32) -> (i32, i32) {
    %c0_i32 = arith.constant 0 : i32
    %c0_i32_0 = arith.constant 0 : i32
    %c0_i32_1 = arith.constant 0 : i32
    return %c0_i32, %c0_i32_0 : i32, i32
  }
  func.func @transform_12(%arg0: i32) -> (i32, i32) {
    %c0_i32 = arith.constant 0 : i32
    %c0_i32_0 = arith.constant 0 : i32
    %c0_i32_1 = arith.constant 0 : i32
    return %c0_i32, %c0_i32_0 : i32, i32
  }
  func.func @transform_13(%arg0: i32) -> (i32, i32) {
    %c0_i32 = arith.constant 0 : i32
    %c0_i32_0 = arith.constant 0 : i32
    %c0_i32_1 = arith.constant 0 : i32
    return %c0_i32, %c0_i32_0 : i32, i32
  }
  func.func @transform_14(%arg0: i32) -> (i32, i32) {
    %c0_i32 = arith.constant 0 : i32
    %c0_i32_0 = arith.constant 0 : i32
    %c0_i32_1 = arith.constant 0 : i32
    return %c0_i32, %c0_i32_0 : i32, i32
  }
  func.func @transform_15(%arg0: i32) -> (i32, i32) {
    %c0_i32 = arith.constant 0 : i32
    %c0_i32_0 = arith.constant 0 : i32
    %c0_i32_1 = arith.constant 0 : i32
    return %c0_i32, %c0_i32_0 : i32, i32
  }
  func.func @transform_16(%arg0: i32) -> (i32, i32) {
    %c0_i32 = arith.constant 0 : i32
    %c0_i32_0 = arith.constant 0 : i32
    %c0_i32_1 = arith.constant 0 : i32
    return %c0_i32, %c0_i32_0 : i32, i32
  }
  func.func @transform_17(%arg0: i32) -> (i32, i32) {
    %c0_i32 = arith.constant 0 : i32
    %c0_i32_0 = arith.constant 0 : i32
    %c0_i32_1 = arith.constant 0 : i32
    return %c0_i32, %c0_i32_0 : i32, i32
  }
  func.func @transform_18(%arg0: i32) -> (i32, i32) {
    %c0_i32 = arith.constant 0 : i32
    %c0_i32_0 = arith.constant 0 : i32
    %c0_i32_1 = arith.constant 0 : i32
    return %c0_i32, %c0_i32_0 : i32, i32
  }
  func.func @transform_19(%arg0: i32) -> (i32, i32) {
    %c0_i32 = arith.constant 0 : i32
    %c0_i32_0 = arith.constant 0 : i32
    %c0_i32_1 = arith.constant 0 : i32
    return %c0_i32, %c0_i32_0 : i32, i32
  }
  func.func @transform_20(%arg0: i32) -> (i32, i32) {
    %c0_i32 = arith.constant 0 : i32
    %c0_i32_0 = arith.constant 0 : i32
    %c0_i32_1 = arith.constant 0 : i32
    return %c0_i32, %c0_i32_0 : i32, i32
  }
  func.func @transform_21(%arg0: i32) -> (i32, i32) {
    %c0_i32 = arith.constant 0 : i32
    %c0_i32_0 = arith.constant 0 : i32
    %c0_i32_1 = arith.constant 0 : i32
    return %c0_i32, %c0_i32_0 : i32, i32
  }
  func.func @transform_22(%arg0: i32) -> (i32, i32) {
    %c0_i32 = arith.constant 0 : i32
    %c0_i32_0 = arith.constant 0 : i32
    %c0_i32_1 = arith.constant 0 : i32
    return %c0_i32, %c0_i32_0 : i32, i32
  }
  func.func @transform_23(%arg0: i32) -> (i32, i32) {
    %c0_i32 = arith.constant 0 : i32
    %c0_i32_0 = arith.constant 0 : i32
    %c0_i32_1 = arith.constant 0 : i32
    return %c0_i32, %c0_i32_0 : i32, i32
  }
  func.func @transform_24(%arg0: i32) -> (i32, i32, i32) {
    %c0_i32 = arith.constant 0 : i32
    %c0_i32_0 = arith.constant 0 : i32
    %c0_i32_1 = arith.constant 0 : i32
    return %arg0, %c0_i32, %c0_i32_0 : i32, i32, i32
  }
  func.func @transform_25(%arg0: i32) -> (i32, i32, i32) {
    %c0_i32 = arith.constant 0 : i32
    %c0_i32_0 = arith.constant 0 : i32
    %c0_i32_1 = arith.constant 0 : i32
    return %arg0, %c0_i32, %c0_i32_0 : i32, i32, i32
  }
}

</mosaic_0001>

<bundles_post_ra>
// kernel: cnnnet_forward.1
= control target key start
LH: loop header
LB: loop body
LE: loop exit
PB: predicated region body
PF: predicated region fallthrough
CT: control target
= control target key end

     0   :  { %s7017_s0 = inlined_call_operand.vmem [shape: f32[5], index: 0, kind: input, shape index: {}]   ;;  %s7018_s1 = inlined_call_operand.vmem [shape: f32[2,32,32], index: 1, kind: input, shape index: {}]   ;;  %s7019_s2 = inlined_call_operand.vmem [shape: f32[5,32,168], index: 2, kind: input, shape index: {}]   ;;  %s7020_s3 = inlined_call_operand.vmem [shape: f32[1,168], index: 3, kind: input, shape index: {}]   ;;  %s7021_s4 = inlined_call_operand.vmem [shape: f32[14,28], index: 4, kind: input, shape index: {}]   ;;  %s7022_s5 = inlined_call_operand.vmem [shape: f32[14,28], index: 5, kind: input, shape index: {}]   ;;  %s7023_s6 = inlined_call_operand.vmem [shape: f32[168,84], index: 6, kind: input, shape index: {}]   ;;  %s7024_s7 = inlined_call_operand.vmem [shape: f32[168,84], index: 7, kind: input, shape index: {}]   ;;  %s7025_s8 = inlined_call_operand.vmem [shape: f32[5,84,160], index: 8, kind: input, shape index: {}]   ;;  %s7026_s9 = inlined_call_operand.vmem [shape: f32[1,160], index: 9, kind: input, shape index: {}]   ;;  %s7027_s10 = inlined_call_operand.vmem [shape: f32[5,10], index: 10, kind: input, shape index: {}]   ;;  %s7028_s11 = inlined_call_operand.vmem [shape: f32[5,10], index: 11, kind: input, shape index: {}]   ;;  %s7029_s12 = inlined_call_operand.vmem [shape: f32[160,80], index: 12, kind: input, shape index: {}]   ;;  %s7030_s13 = inlined_call_operand.hbm [shape: f32[160,80], index: 13, kind: input, shape index: {}]   ;;  %s7031_s14 = inlined_call_operand.vmem [shape: f32[400,512], index: 14, kind: input, shape index: {}]   ;;  %s7032_s15 = inlined_call_operand.vmem [shape: f32[1,512], index: 15, kind: input, shape index: {}]   ;;  %s7033_s16 = inlined_call_operand.hbm [shape: f32[512,256], index: 16, kind: input, shape index: {}]   ;;  %s7034_s17 = inlined_call_operand.vmem [shape: f32[1,256], index: 17, kind: input, shape index: {}]   ;;  %s7035_s18 = inlined_call_operand.vmem [shape: f32[256,64], index: 18, kind: input, shape index: {}]   ;;  %s7036_s19 = inlined_call_operand.vmem [shape: f32[1,64], index: 19, kind: input, shape index: {}]   ;;  %s7037_s20 = inlined_call_operand.vmem [shape: f32[64,3], index: 20, kind: input, shape index: {}]   ;;  %s7038_s21 = inlined_call_operand.vmem [shape: f32[1,3], index: 21, kind: input, shape index: {}]   ;;  %s7039_s22 = inlined_call_operand.vmem [shape: f32[3,10], index: 22, kind: input, shape index: {}]   ;;  %s7040_s23 = inlined_call_operand.vmem [shape: f32[1,10], index: 23, kind: input, shape index: {}]   ;;  %s7041_s24 = inlined_call_operand.hbm [shape: f32[2,1,3], index: 24, kind: output, shape index: {0}]   ;;  %s7042_s25 = inlined_call_operand.hbm [shape: f32[2,1,10], index: 25, kind: output, shape index: {1}]  }
   0x1   :  { %7061 = sst [smem:[#allocation25_spill]] %s7017_s0 }
   0x2   :  { %7062 = sst [smem:[#allocation26_spill]] %s7018_s1 }
   0x3   :  { %7063 = sst [smem:[#allocation27_spill]] %s7019_s2 }
   0x4   :  { %7064 = sst [smem:[#allocation28_spill]] %s7020_s3 }
   0x5   :  { %7065 = sst [smem:[#allocation29_spill]] %s7021_s4 }
   0x6   :  { %7066 = sst [smem:[#allocation30_spill]] %s7022_s5 }
   0x7   :  { %7067 = sst [smem:[#allocation31_spill]] %s7023_s6 }
   0x8   :  { %7068 = sst [smem:[#allocation32_spill]] %s7024_s7 }
   0x9   :  { %7069 = sst [smem:[#allocation33_spill]] %s7025_s8 }
   0xa   :  { %7070 = sst [smem:[#allocation34_spill]] %s7026_s9 }
   0xb   :  { %7071 = sst [smem:[#allocation35_spill]] %s7027_s10 }
   0xc   :  { %7072 = sst [smem:[#allocation36_spill]] %s7028_s11 }
   0xd   :  { %7073 = sst [smem:[#allocation37_spill]] %s7029_s12 }
   0xe   :  { %7074 = sst [smem:[#allocation38_spill]] %s7030_s13 }
   0xf   :  { %7075 = sst [smem:[#allocation39_spill]] %s7042_s25 }
  0x10   :  { %31 = vsyncpa [#allocation7], 0 }
  0x11   :  { %32 = vsyncpa [#allocation5], 0 }
  0x12   :  { %33 = vsyncpa [#allocation10], 0 }
  0x13   :  { %34 = vsyncpa [#allocation6], 0 }
  0x14   :  { %36 = vsyncpa [#allocation6 + $0x1], 0 }
  0x15   :  { %37 = vsyncpa [#allocation13], 0 }
  0x16   :  { %39 = vsyncpa [#allocation13 + $0x1], 0  ;;  %s5196_s29 = smov 0   ;;  %s5198_s2 = smov 0  }
  0x17   :  { %s5200_s6 = smov 0   ;;  %s5202_s30 = smov 0  }
  0x18 LB: > { %7076 = sst [smem:[#allocation19_spill]] %s5041_s29  ;;  %s5217_s7 = sadd.s32 4294967295, %s5053_s30   ;;  %s5053_s30 = sphi %s5202_s30, %s7117_s30   ;;  %s5049_s6 = sphi %s5200_s6, %s7119_s6   ;;  %s5045_s2 = sphi %s5198_s2, %s7121_s2   ;;  %s5041_s29 = sphi %s5196_s29, %s7120_s29  }
  0x19   : > { %7077 = sst [smem:[#allocation20_spill]] %s5049_s6  ;;  %s4507_s3 = sadd.s32 4294967294, %s5053_s30  }
  0x1a   : > { %7078 = sst [smem:[#allocation21_spill]] %s5053_s30  ;;  %s5221_s26 = sadd.s32 1, %s5053_s30  }
  0x1b   : > { %7079 = sst [smem:[#allocation22_spill]] %s5221_s26  ;;  %s561_s1 = sadd.s32 1, %s5049_s6 }
  0x1c   : > { %s558_s8 = ssub.s32 %s5053_s30, %s5221_s26  ;;  %p571_p0 = scmp.ne.s32.totalorder %s5049_s6, %s5045_s2 }
  0x1d   : > { %p559_p1 = scmp.eq.s32.totalorder %s558_s8, 0  ;;  %p572_p2 = scmp.eq.s32.totalorder %s5217_s7, 1 }
  0x1e   : > { %p577_p3 = scmp.ne.s32.totalorder %s5045_s2, %s5041_s29  ;;  %p578_p4 = scmp.eq.s32.totalorder %s4507_s3, 1 }
  0x1f   : > { %s5232_s27 = scalar_select %p559_p1, %s5049_s6, %s561_s1  }
  0x20   : > { %p5234_p5 = por %p572_p2, %p571_p0  ;;  %p5238_p6 = por %p578_p4, %p577_p3 }
  0x21   : > { %7080 = sst [smem:[#allocation23_spill]] %s5232_s27  ;;  %p4508_p7 = scmp.ge.s32.totalorder %s5053_s30, 1 }
  0x22   : > { %s7082_s28 = scalar_select %p5238_p6, 1, 0 }
  0x23   : > { %p611_p8 = scmp.lt.s32.totalorder %s5053_s30, 3  ;;  %p7054_p9 = scmp.eq.s32.totalorder %s5217_s7, 0 }
  0x24   : > { %7083 = sst [smem:[#allocation24_spill]] %s7082_s28  ;;  %s5055_s8 = smov [#allocation8]  }
  0x25   : > { %p5245_p10 = pnand %p4508_p7, %p611_p8  ;;  %s7085_s3 = sld [smem:[#allocation25_spill]] }
  0x26   : > { %s667_s27 = sshll.u32 %s5055_s8, 4  ;;  %s5056_s26 = smov [#allocation9]   ;;  %s5260_s27 = int_to_ptr.vmem [resolvable:$true] %s667_s27 }
  0x27   : > { %p4815_p11 = pneg %p5245_p10  ;;  %s686_s28 = sshll.u32 %s5056_s26, 4  ;;  %s687_s28 = int_to_ptr.vmem [resolvable:$true] %s686_s28 }
  0x29   : > { %p5256_p12 = pnand %p7054_p9, %p4815_p11 }
  0x2b   : > { %s624_s1 = sshll.u32 %s7085_s3, 4  ;;  %p4886_p0 = pneg %p5256_p12  ;;  %s625_s1 = int_to_ptr.vmem [resolvable:$true] %s624_s1 }
  0x2c   : > { %s4884_s29 = scalar_lea.vmem %s625_s1, 16  ;;  %p4892_p3 = scmp.lt.s32.totalorder %s625_s1, %s625_s1 }
  0x2d   : > { %p4885_p13 = scmp.ne.s32.totalorder %s625_s1, %s4884_s29  ;;  %p4893_p4 = scmp.lt.s32.totalorder %s4884_s29, %s4884_s29 }
  0x2f   : > { %p4887_p1 = pnand %p4886_p0, %p4885_p13  ;;  %p4894_p7 = por %p4893_p4, %p4892_p3 }
  0x31   : > { %p4888_p2 = pneg %p4887_p1 }
  0x33   : > { %p4895_p8 = pnand %p4894_p7, %p4888_p2 }
  0x35   : > { %4898 = shalt.err (!%p4895_p8)
}
  0x36   : > { %s5057_s5 = smov [#allocation4]   ;;  %s4910_s26 = scalar_lea.vmem %s5260_s27, 2560 }
  0x37   : > { %4818 = dma.vmem_to_smem (!%p5256_p12), %s625_s1, 16, %s5057_s5, [#allocation7]  }
  0x38   : > { %p4911_p11 = scmp.ne.s32.totalorder %s5260_s27, %s4910_s26  ;;  %p4918_p1 = scmp.lt.s32.totalorder %s5260_s27, %s5260_s27 }
  0x39   : > { %p4919_p6 = scmp.lt.s32.totalorder %s4910_s26, %s4910_s26 }
  0x3a   : > { %p4913_p9 = pnand %p4911_p11, %p4886_p0 }
  0x3b   : > { %p4920_p3 = por %p4919_p6, %p4918_p1 }
  0x3c   : > { %p4914_p13 = pneg %p4913_p9 }
  0x3e   : > { %p4921_p2 = pnand %p4920_p3, %p4914_p13 }
  0x40   : > { %4924 = shalt.err (!%p4921_p2)
}
  0x41   : > { %s5058_s29 = smov 128   ;;  %s5059_s0 = smov 8  }
  0x42   : > { %s7087_s13 = sld [smem:[#allocation38_spill]]  ;;  %s4936_s8 = scalar_lea.vmem %s687_s28, 16384 }
  0x43   : > { %p4937_p4 = scmp.ne.s32.totalorder %s687_s28, %s4936_s8  ;;  %p4944_p6 = scmp.lt.s32.totalorder %s687_s28, %s687_s28 }
  0x44   : > { %p4945_p8 = scmp.lt.s32.totalorder %s4936_s8, %s4936_s8 }
  0x45   : > { %p4939_p9 = pnand %p4937_p4, %p4886_p0 }
  0x46   : > { %p4946_p11 = por %p4945_p8, %p4944_p6 }
  0x47   : > { %p4940_p7 = pneg %p4939_p9 }
  0x48   : > { %4821 = dma.hbm_to_vmem [thread:$0]  (!%p5256_p12), %s7087_s13, 2560, %s5260_s27, [#allocation5], %s5058_s29, %s5058_s29, %s5059_s0  }
  0x49   : > { %p4947_p13 = pnand %p4946_p11, %p4940_p7 }
  0x4b   : > { %4950 = shalt.err (!%p4947_p13)
}
  0x4c   : > { %s5060_s5 = smov 256   ;;  %s5061_s26 = smov 16  }
  0x4d   : > { %4824 = dma.hbm_to_vmem [thread:$0]  (!%p5256_p12), %s7033_s16, 16384, %s687_s28, [#allocation10], %s5060_s5, %s5060_s5, %s5061_s26  }
  0x4e   : > { %731 = sbr.rel (%p5245_p10) target bundleno = 2858 (0xb2a), region = 116  ;;  %p7088_p1 = scmp.eq.s32.totalorder (!%p5245_p10), %s5217_s7, 0 }
  0x53   : > { %5020 = dma.done.wait (%p7088_p1), [#allocation7], 16   ;;  %p7089_p0 = pmov %p7088_p1 }
  0x55   : > { %5022 = vsyncadd (%p7089_p0), [#allocation7], 4294967280  ;;  %p7090_p3 = pmov %p7089_p0 }
  0x56   : > { %p7091_p2 = pmov %p7089_p0 }
  0x57   : > { %5024 = dma.done.wait (%p7090_p3), [#allocation5], 2560  }
  0x58   : > { %5026 = vsyncadd (%p7091_p2), [#allocation5], 4294964736  ;;  %p7092_p4 = pmov %p7089_p0 }
  0x59   : > { %p7093_p12 = pmov %p7089_p0 }
  0x5a   : > { %5028 = dma.done.wait (%p7092_p4), [#allocation10], 16384  }
  0x5b   : > { %5030 = vsyncadd (%p7093_p12), [#allocation10], 4294950912 }
  0x5c   : > { %745 = sfence }
  0x5d   : > { %s7094_s30 = sld [smem:[#allocation27_spill]]  ;;  %p811_p10 = scmp.lt.s32.totalorder %s5217_s7, 1  ;;  %v5062_v4 = vmov 0.0   ;;  %vm841_vm0 = vcmask 261120   ;;  %vm1465_vm1 = vcmask 1043456   ;;  %vm1458_vm10 = vcmask 228352  }
  0x5e   : > { %918 = vmatprep.mubr.f32.mxu0 %v5062_v4  ;;  %1031 = vmatprep.mubr.f32.mxu1 %v5062_v4  ;;  %s7096_s1 = sld [smem:[#allocation26_spill]]  ;;  %vm1659_vm11 = vcmask 326656   ;;  %vm1839_vm12 = vcmask 687104   ;;  %vm1841_vm13 = vcmask 685056   ;;  %vm2459_vm14 = vcmask 1041408  }
  0x5f   : > { %s812_s6 = scalar_select %p811_p10, %s5217_s7, 1 }
  0x60   : > { %s7099_s0 = sld [smem:[#allocation28_spill]] }
  0x61   : > { %s4720_s25 = sshll.u32 %s812_s6, 5  ;;  %s7097_s6 = sld [smem:[#allocation31_spill]] }
  0x62   : > { %s1430_s3 = sld [smem:[#allocation4]] }
  0x63   : > { %s7095_s27 = smov %s7094_s30  ;;  %v4526_v0 = vld [vmem:[%s7094_s30 + $0x78] sm:$0xff]  ;;  %s7102_s29 = sld [smem:[#allocation30_spill]] }
  0x64   : > { %v4525_v1 = vld [vmem:[%s7095_s27 + $0x70] sm:$0xff]  ;;  %v4524_v2 = vld [vmem:[%s7095_s27 + $0x68] sm:$0xff]  ;;  %878 = vmatprep.subr.mxu0 %v4526_v0  ;;  %v4523_v3 = vld [vmem:[%s7095_s27 + $0x60] sm:$0xff]  ;;  %s5350_s8 = scalar_lea.vmem %s7096_s1, %s4720_s25  ;;  %s7104_s5 = sld [smem:[#allocation32_spill]] }
  0x65   : > { %879 = vmatpush1.msra.mxu0 %v4525_v1  ;;  %v4522_v5 = vld [vmem:[%s7095_s27 + $0x58] sm:$0xff]  ;;  %v4521_v6 = vld [vmem:[%s7095_s27 + $0x50] sm:$0xff]  ;;  %v825_v9 = vld [vmem:[%s7095_s27 + $0x28] sm:$0xff]  ;;  %s7105_s9 = sld [smem:[#allocation33_spill]] }
  0x66   : > { %v827_v7 = vld [vmem:[%s7095_s27 + $0x38] sm:$0xff]  ;;  %880 = vmatprep.subr.mxu0 %v4524_v2  ;;  %v826_v8 = vld [vmem:[%s7095_s27 + $0x30] sm:$0xff]  ;;  %v824_v10 = vld [vmem:[%s7095_s27 + $0x20] sm:$0xff]  ;;  %s7106_s1 = sld [smem:[#allocation34_spill]] }
  0x67   : > { %4791 = vmatprep.subr.mxu1 %v827_v7  ;;  %881 = vmatpush1.msra.mxu0 %v4523_v3  ;;  %v4520_v11 = vld [vmem:[%s7095_s27 + $0x48] sm:$0xff]  ;;  %v823_v12 = vld [vmem:[%s7095_s27 + $0x18] sm:$0xff]  ;;  %v4519_v13 = vld [vmem:[%s7095_s27 + $0x40] sm:$0xff]  ;;  %s7098_s26 = smov %s7097_s6  ;;  %s7107_s10 = sld [smem:[#allocation35_spill]] }
  0x68   : > { %4795 = vmatpush1.msra.mxu1 %v826_v8  ;;  %882 = vmatprep.subr.mxu0 %v4522_v5  ;;  %v822_v14 = vld [vmem:[%s7095_s27 + $0x10] sm:$0xff]  ;;  %v828_v15 = vld [vmem:[%s5350_s8 + $0x1] sm:$0xff]  ;;  %v819_v20 = vld [vmem:[%s5350_s8 + $0x18] sm:$0xf]  ;;  %s7108_s11 = sld [smem:[#allocation36_spill]] }
  0x69   : > { %4792 = vmatprep.subr.mxu1 %v825_v9  ;;  %883 = vmatpush1.msra.mxu0 %v4521_v6  ;;  %v821_v16 = vld [vmem:[%s7095_s27 + $0x8] sm:$0xff]  ;;  %v820_v17 = vld [vmem:[%s7095_s27] sm:$0xff]  ;;  %v818_v18 = vld [vmem:[%s5350_s8 + $0x10] sm:$0xff]  ;;  %s7109_s12 = sld [smem:[#allocation37_spill]] }
  0x6a   : > { %4796 = vmatpush1.msra.mxu1 %v824_v10  ;;  %884 = vmatprep.subr.mxu0 %v4520_v11  ;;  %v829_v19 = vld [vmem:[%s5350_s8 + $0x9] sm:$0xff]  ;;  %v4554_v21 = vld [vmem:[%s7095_s27 + $0xf8] sm:$0xff]  ;;  %v4551_v27 = vld [vmem:[%s7095_s27 + $0xe0] sm:$0xff] }
  0x6b   : > { %4793 = vmatprep.subr.mxu1 %v823_v12  ;;  %885 = vmatpush1.msra.mxu0 %v4519_v13  ;;  %v830_v22 = vld [vmem:[%s5350_s8 + $0x11] sm:$0xff]  ;;  %v4552_v25 = vld [vmem:[%s7095_s27 + $0xe8] sm:$0xff]  ;;  %v831_v26 = vld [vmem:[%s5350_s8 + $0x19] sm:$0xf] }
  0x6c   : > { %4797 = vmatpush1.msra.mxu1 %v822_v14  ;;  %4527 = vmatmul.mubr.msk.f32.vlgmr.msra.gmra.mxu0 %vm841_vm0, %v828_v15  ;;  %v4542_v23 = vld [vmem:[%s7095_s27 + $0xb8] sm:$0xff]  ;;  %v4553_v24 = vld [vmem:[%s7095_s27 + $0xf0] sm:$0xff]  ;;  %v4548_v30 = vld [vmem:[%s7095_s27 + $0xc8] sm:$0xff] }
  0x6d   : > { %4794 = vmatprep.subr.mxu1 %v821_v16  ;;  %924 = vmatprep.mubr.f32.mxu0 %v5062_v4  ;;  %v4550_v28 = vld [vmem:[%s7095_s27 + $0xd8] sm:$0xff]  ;;  %v4549_v29 = vld [vmem:[%s7095_s27 + $0xd0] sm:$0xff]  ;;  %v816_v31 = vld [vmem:[%s5350_s8] sm:$0xff] }
  0x6e   : > { %4798 = vmatpush1.msra.mxu1 %v820_v17  ;;  %979 = vmatprep.subr.mxu0 %v827_v7  ;;  %v4547_v32 = vld [vmem:[%s7095_s27 + $0xc0] sm:$0xff]  ;;  %v4541_v33 = vld [vmem:[%s7095_s27 + $0xb0] sm:$0xff]  ;;  %v4540_v34 = vld [vmem:[%s7095_s27 + $0xa8] sm:$0xff] }
  0x6f   : > { %4533 = vmatmul.mubr.msk.f32.vlgmr.msra.gmra.mxu1 %vm841_vm0, %v818_v18  ;;  %980 = vmatpush1.msra.mxu0 %v826_v8  ;;  %v1166_v35 = vld [vmem:[%s5350_s8 + $0x3] sm:$0xff]  ;;  %v4538_v38 = vld [vmem:[%s7095_s27 + $0x98] sm:$0xff]  ;;  %v4537_v39 = vld [vmem:[%s7095_s27 + $0x90] sm:$0xff] }
  0x70   : > { %1037 = vmatprep.mubr.f32.mxu1 %v5062_v4  ;;  %4528 = vmatmul.mubr.msk.f32.gmra.mxu0 %vm841_vm0, %v829_v19  ;;  %v4539_v36 = vld [vmem:[%s7095_s27 + $0xa0] sm:$0xff]  ;;  %v817_v37 = vld [vmem:[%s5350_s8 + $0x8] sm:$0xff]  ;;  %v4566_v44 = vld [vmem:[%s7095_s27 + $0x138] sm:$0xff] }
  0x71   : > { %981 = vmatprep.subr.mxu0 %v825_v9  ;;  %930 = vmatprep.mubr.f32.mxu0 %v5062_v4  ;;  %v4536_v40 = vld [vmem:[%s7095_s27 + $0x88] sm:$0xff]  ;;  %v4535_v42 = vld [vmem:[%s7095_s27 + $0x80] sm:$0xff]  ;;  %v4565_v45 = vld [vmem:[%s7095_s27 + $0x130] sm:$0xff] }
  0x72   : > { %982 = vmatpush1.msra.mxu0 %v824_v10  ;;  %1215 = vmatprep.subr.mxu1 %v4554_v21  ;;  %v1167_v41 = vld [vmem:[%s5350_s8 + $0xb] sm:$0xff]  ;;  %v1044_v43 = vld [vmem:[%s5350_s8 + $0x2] sm:$0xff]  ;;  %v1168_v46 = vld [vmem:[%s5350_s8 + $0x13] sm:$0xff] }
  0x73   : > { %983 = vmatprep.subr.mxu0 %v823_v12  ;;  %4534 = vmatmul.mubr.msk.f32.gmra.mxu1 %vm841_vm0, %v819_v20  ;;  %v4564_v47 = vld [vmem:[%s7095_s27 + $0x128] sm:$0xff]  ;;  %v4563_v48 = vld [vmem:[%s7095_s27 + $0x120] sm:$0xff]  ;;  %v4562_v50 = vld [vmem:[%s7095_s27 + $0x118] sm:$0xff] }
  0x74   : > { %984 = vmatpush1.msra.mxu0 %v822_v14  ;;  %1216 = vmatpush1.msra.mxu1 %v4553_v24  ;;  %v1045_v49 = vld [vmem:[%s5350_s8 + $0xa] sm:$0xff]  ;;  %v1169_v52 = vld [vmem:[%s5350_s8 + $0x1b] sm:$0xf]  ;;  %v4559_v54 = vld [vmem:[%s7095_s27 + $0x100] sm:$0xff] }
  0x75   : > { %4529 = vmatmul.mubr.msk.f32.gmra.mxu0 %vm841_vm0, %v830_v22  ;;  %985 = vmatprep.subr.mxu0 %v821_v16  ;;  %v4561_v51 = vld [vmem:[%s7095_s27 + $0x110] sm:$0xff]  ;;  %v4560_v53 = vld [vmem:[%s7095_s27 + $0x108] sm:$0xff]  ;;  %v1047_v56 = vld [vmem:[%s5350_s8 + $0x1a] sm:$0xf] }
  0x76   : > { %936 = vmatprep.mubr.f32.mxu0 %v5062_v4  ;;  %986 = vmatpush1.msra.mxu0 %v820_v17  ;;  %v1046_v55 = vld [vmem:[%s5350_s8 + $0x12] sm:$0xff]  ;;  %v1288_v57 = vld [vmem:[%s5350_s8 + $0x4] sm:$0xff]  ;;  %v1291_v60 = vld [vmem:[%s5350_s8 + $0x1c] sm:$0xf] }
  0x77   : > { %1093 = vmatprep.subr.mxu0 %v4542_v23  ;;  %1217 = vmatprep.subr.mxu1 %v4552_v25  ;;  %v1289_v58 = vld [vmem:[%s5350_s8 + $0xc] sm:$0xff]  ;;  %v1290_v59 = vld [vmem:[%s5350_s8 + $0x14] sm:$0xff]  ;;  %v1650_v0 = vld [vmem:[%s7098_s26 + $0x60] sm:$0xff] }
  0x78   : > { %1255 = vmatprep.mubr.f32.mxu1 %v5062_v4  ;;  %1218 = vmatpush1.msra.mxu1 %v4551_v27  ;;  %v1653_v61 = vld [vmem:[%s7097_s6 + $0x78] sm:$0xff]  ;;  %v1652_v62 = vld [vmem:[%s7098_s26 + $0x70] sm:$0xff]  ;;  %v1651_v63 = vld [vmem:[%s7098_s26 + $0x68] sm:$0xff]  ;;  %s7100_s6 = sld [smem:[#allocation29_spill]] }
  0x79   : > { %4530 = vmatmul.mubr.msk.f32.gmra.mxu0 %vm841_vm0, %v831_v26  ;;  %1219 = vmatprep.subr.mxu1 %v4550_v28  ;;  %v1649_v1 = vld [vmem:[%s7098_s26 + $0x58] sm:$0xff]  ;;  %v1648_v2 = vld [vmem:[%s7098_s26 + $0x50] sm:$0xff]  ;;  %v1647_v3 = vld [vmem:[%s7098_s26 + $0x48] sm:$0xff] }
  0x7a   : > { %1019 = vmatprep.mubr.f32.mxu0 %v5062_v4  ;;  %1220 = vmatpush1.msra.mxu1 %v4549_v29  ;;  %v1646_v5 = vld [vmem:[%s7098_s26 + $0x40] sm:$0xff]  ;;  %v1645_v6 = vld [vmem:[%s7098_s26 + $0x38] sm:$0xff]  ;;  %v1644_v7 = vld [vmem:[%s7098_s26 + $0x30] sm:$0xff] }
  0x7b   : > { %1221 = vmatprep.subr.mxu1 %v4548_v30  ;;  %v1643_v8 = vld [vmem:[%s7098_s26 + $0x28] sm:$0xff]  ;;  %v1642_v9 = vld [vmem:[%s7098_s26 + $0x20] sm:$0xff]  ;;  %v1641_v10 = vld [vmem:[%s7098_s26 + $0x18] sm:$0xff] }
  0x7c   : > { %1222 = vmatpush1.msra.mxu1 %v4547_v32  ;;  %v1640_v11 = vld [vmem:[%s7098_s26 + $0x10] sm:$0xff] }
  0x7d   : > { %4531 = vmatmul.mubr.msk.f32.vlgmr.msra.gmra.mxu0 %vm841_vm0, %v816_v31  ;;  %4555 = vmatmul.mubr.msk.f32.vlgmr.msra.gmra.mxu1 %vm841_vm0, %v1166_v35 }
  0x7e   : > { %1094 = vmatpush1.msra.mxu0 %v4541_v33  ;;  %1025 = vmatprep.mubr.f32.mxu0 %v5062_v4  ;;  %s7101_s25 = smov %s7100_s6 }
  0x7f   : > { %1095 = vmatprep.subr.mxu0 %v4540_v34  ;;  %1261 = vmatprep.mubr.f32.mxu1 %v5062_v4 }
  0x80   : > { %1096 = vmatpush1.msra.mxu0 %v4539_v36 }
  0x81   : > { %4532 = vmatmul.mubr.msk.f32.gmra.mxu0 %vm841_vm0, %v817_v37  ;;  %1097 = vmatprep.subr.mxu0 %v4538_v38 }
  0x82   : > { %1098 = vmatpush1.msra.mxu0 %v4537_v39  ;;  %1133 = vmatprep.mubr.f32.mxu0 %v5062_v4 }
  0x83   : > { %1099 = vmatprep.subr.mxu0 %v4536_v40  ;;  %4556 = vmatmul.mubr.msk.f32.gmra.mxu1 %vm841_vm0, %v1167_v41 }
  0x84   : > { %1100 = vmatpush1.msra.mxu0 %v4535_v42  ;;  %1267 = vmatprep.mubr.f32.mxu1 %v5062_v4  ;;  %v1412_v42 = vlaneseq }
  0x85   : > { %4543 = vmatmul.mubr.msk.f32.vlgmr.msra.gmra.mxu0 %vm841_vm0, %v1044_v43  ;;  %1337 = vmatprep.subr.mxu0 %v4566_v44 }
  0x86   : > { %1139 = vmatprep.mubr.f32.mxu0 %v5062_v4  ;;  %1338 = vmatpush1.msra.mxu0 %v4565_v45 }
  0x87   : > { %4557 = vmatmul.mubr.msk.f32.gmra.mxu1 %vm841_vm0, %v1168_v46  ;;  %1339 = vmatprep.subr.mxu0 %v4564_v47  ;;  %v5549_v47 = vshrl.u32 %v1412_v42, 7 }
  0x88   : > { %1340 = vmatpush1.msra.mxu0 %v4563_v48  ;;  %1273 = vmatprep.mubr.f32.mxu1 %v5062_v4 }
  0x89   : > { %4544 = vmatmul.mubr.msk.f32.gmra.mxu0 %vm841_vm0, %v1045_v49  ;;  %1341 = vmatprep.subr.mxu0 %v4562_v50 }
  0x8a   : > { %1145 = vmatprep.mubr.f32.mxu0 %v5062_v4  ;;  %1342 = vmatpush1.msra.mxu0 %v4561_v51 }
  0x8b   : > { %4558 = vmatmul.mubr.msk.f32.gmra.mxu1 %vm841_vm0, %v1169_v52  ;;  %1343 = vmatprep.subr.mxu0 %v4560_v53 }
  0x8c   : > { %1344 = vmatpush1.msra.mxu0 %v4559_v54  ;;  %1536 = vmatprep.mubr.f32.mxu1 %v5062_v4 }
  0x8d   : > { %4545 = vmatmul.mubr.msk.f32.gmra.mxu0 %vm841_vm0, %v1046_v55  ;;  %1666 = vmatprep.subr.mxu0 %v5062_v4 }
  0x8e   : > { %1151 = vmatprep.mubr.f32.mxu0 %v5062_v4 }
  0x91   : > { %4546 = vmatmul.mubr.msk.f32.gmra.mxu0 %vm841_vm0, %v1047_v56 }
  0x92   : > { %1377 = vmatprep.mubr.f32.mxu0 %v5062_v4 }
  0x95   : > { %4567 = vmatmul.mubr.msk.f32.vlgmr.msra.gmra.mxu0 %vm841_vm0, %v1288_v57 }
  0x96   : > { %1383 = vmatprep.mubr.f32.mxu0 %v5062_v4  ;;  %1667 = vmatpush1.msra.mxu0 %v1653_v61 }
  0x97   : > { %1668 = vmatprep.subr.mxu0 %v5062_v4 }
  0x98   : > { %1669 = vmatpush1.msra.mxu0 %v1652_v62 }
  0x99   : > { %4568 = vmatmul.mubr.msk.f32.gmra.mxu0 %vm841_vm0, %v1289_v58  ;;  %1670 = vmatprep.subr.mxu0 %v5062_v4 }
  0x9a   : > { %1389 = vmatprep.mubr.f32.mxu0 %v5062_v4  ;;  %1671 = vmatpush1.msra.mxu0 %v1651_v63  ;;  %v5552_v63 = vsub.s32 0, %v5549_v47 }
  0x9b   : > { %1672 = vmatprep.subr.mxu0 %v5062_v4 }
  0x9c   : > { %1673 = vmatpush1.msra.mxu0 %v1650_v0 }
  0x9d   : > { %4569 = vmatmul.mubr.msk.f32.gmra.mxu0 %vm841_vm0, %v1290_v59  ;;  %1674 = vmatprep.subr.mxu0 %v5062_v4 }
  0x9e   : > { %1395 = vmatprep.mubr.f32.mxu0 %v5062_v4  ;;  %1675 = vmatpush1.msra.mxu0 %v1649_v1 }
  0x9f   : > { %1676 = vmatprep.subr.mxu0 %v5062_v4 }
  0xa0   : > { %1677 = vmatpush1.msra.mxu0 %v1648_v2 }
  0xa1   : > { %4570 = vmatmul.mubr.msk.f32.gmra.mxu0 %vm841_vm0, %v1291_v60  ;;  %1678 = vmatprep.subr.mxu0 %v5062_v4 }
  0xa2   : > { %1679 = vmatpush1.msra.mxu0 %v1647_v3  ;;  %v1410_v3 = vld [vmem:[%s7099_s0] sm:$0x3]  ;;  %s7103_s0 = smov %s7102_s29 }
  0xa3   : > { %1680 = vmatprep.subr.mxu0 %v5062_v4 }
  0xa4   : > { %1681 = vmatpush1.msra.mxu0 %v1646_v5  ;;  %v5558_v5 = vsub.s32 1, %v5549_v47 }
  0xa5   : > { %1682 = vmatprep.subr.mxu0 %v5062_v4 }
  0xa6   : > { %1683 = vmatpush1.msra.mxu0 %v1645_v6 }
  0xa7   : > { %1684 = vmatprep.subr.mxu0 %v5062_v4 }
  0xa8   : > { %1685 = vmatpush1.msra.mxu0 %v1644_v7 }
  0xa9   : > { %1686 = vmatprep.subr.mxu0 %v5062_v4 }
  0xaa   : > { %1687 = vmatpush1.msra.mxu0 %v1643_v8 }
  0xab   : > { %1688 = vmatprep.subr.mxu0 %v5062_v4 }
  0xac   : > { %1689 = vmatpush1.msra.mxu0 %v1642_v9 }
  0xad   : > { %1690 = vmatprep.subr.mxu0 %v5062_v4 }
  0xae   : > { %1691 = vmatpush1.msra.mxu0 %v1641_v10 }
  0xaf   : > { %1692 = vmatprep.subr.mxu0 %v5062_v4 }
  0xb0   : > { %1693 = vmatpush1.msra.mxu0 %v1640_v11 }
  0xb1   : > { %1694 = vmatprep.subr.mxu0 %v5062_v4 }
 0x12c   : > { %v920_v12 = vpop.f32.mrf.mxu0 }
 0x12e   : > { %v922_v13 = vpop.f32.mrf.mxu0 }
 0x12f   : > { %v1033_v17 = vpop.f32.mrf.mxu1 }
 0x130   : > { %v926_v14 = vpop.f32.mrf.mxu0 }
 0x131   : > { %v1035_v19 = vpop.f32.mrf.mxu1 }
 0x132   : > { %v928_v15 = vpop.f32.mrf.mxu0 }
 0x133   : > { %v1039_v22 = vpop.f32.mrf.mxu1 }
 0x135   : > { %v932_v16 = vpop.f32.mrf.mxu0  ;;  %v1041_v25 = vpop.f32.mrf.mxu1 }
 0x136   : > { %v1034_v46 = vadd.f32 %v1033_v17, %v932_v16 }
 0x137   : > { %v934_v18 = vpop.f32.mrf.mxu0 }
 0x138   : > { %v1036_v45 = vadd.f32 %v1035_v19, %v934_v18  ;;  %v1419_v19 = vrot.slane %v1410_v3, %v5558_v5 }
 0x139   : > { %v938_v20 = vpop.f32.mrf.mxu0 }
 0x13a   : > { %v1040_v49 = vadd.f32 %v1039_v22, %v938_v20 }
 0x13b   : > { %v940_v21 = vpop.f32.mrf.mxu0 }
 0x13c   : > { %v1042_v57 = vadd.f32 %v1041_v25, %v940_v21 }
 0x13d   : > { %v1021_v23 = vpop.f32.mrf.mxu0  ;;  %v1257_v28 = vpop.f32.mrf.mxu1 }
 0x13e   : > { %v1022_v60 = vadd.f32 %v1021_v23, %v920_v12 }
 0x13f   : > { %v1023_v24 = vpop.f32.mrf.mxu0  ;;  %v1259_v31 = vpop.f32.mrf.mxu1 }
 0x140   : > { %v1024_v52 = vadd.f32 %v1023_v24, %v922_v13 }
 0x141   : > { %v1027_v26 = vpop.f32.mrf.mxu0 }
 0x142   : > { %v1028_v53 = vadd.f32 %v1027_v26, %v926_v14 }
 0x143   : > { %v1029_v27 = vpop.f32.mrf.mxu0  ;;  %v1263_v34 = vpop.f32.mrf.mxu1 }
 0x144   : > { %v1030_v50 = vadd.f32 %v1029_v27, %v928_v15  ;;  %v1415_v15 = vrot.slane %v1410_v3, %v5552_v63  ;;  %v1748_v3 = vld [vmem:[%s7104_s5 + $0x38] sm:$0xff] }
 0x145   : > { %v1135_v29 = vpop.f32.mrf.mxu0  ;;  %v1265_v36 = vpop.f32.mrf.mxu1 }
 0x146   : > { %v1158_v6 = vadd.f32 %v1135_v29, %v1022_v60  ;;  %v1754_v60 = vld [vmem:[%s7104_s5 + $0x68] sm:$0xff] }
 0x147   : > { %v1137_v30 = vpop.f32.mrf.mxu0  ;;  %v1269_v39 = vpop.f32.mrf.mxu1 }
 0x148   : > { %v1159_v61 = vadd.f32 %v1137_v30, %v1024_v52  ;;  %v1280_v22 = vadd.f32 %v1257_v28, %v1158_v6  ;;  %v1747_v6 = vld [vmem:[%s7104_s5 + $0x30] sm:$0xff] }
 0x149   : > { %v1141_v32 = vpop.f32.mrf.mxu0  ;;  %v1271_v43 = vpop.f32.mrf.mxu1 }
 0x14a   : > { %v1160_v62 = vadd.f32 %v1141_v32, %v1028_v53  ;;  %v1281_v13 = vadd.f32 %v1259_v31, %v1159_v61  ;;  %v1439_v31 = vstv %s1430_s3  ;;  %v1456_v53 = vld [vmem:[%s7100_s6] sm:$0xff]  ;;  %s4691_s6 = sld [smem:[#allocation4 + $0x1]] }
 0x14b   : > { %v1143_v33 = vpop.f32.mrf.mxu0  ;;  %v1275_v55 = vpop.f32.mrf.mxu1  ;;  %v1753_v61 = vld [vmem:[%s7104_s5 + $0x60] sm:$0xff]  ;;  %s4710_s3 = sld [smem:[#allocation4 + $0x2]] }
 0x14c   : > { %v1161_v58 = vadd.f32 %v1143_v33, %v1030_v50  ;;  %v1282_v14 = vadd.f32 %v1263_v34, %v1160_v62  ;;  %v1752_v62 = vld [vmem:[%s7104_s5 + $0x58] sm:$0xff] }
 0x14d   : > { %v1147_v35 = vpop.f32.mrf.mxu0  ;;  %v1277_v8 = vpop.f32.mrf.mxu1 }
 0x14e   : > { %v1162_v54 = vadd.f32 %v1147_v35, %v1034_v46  ;;  %v1283_v10 = vadd.f32 %v1265_v36, %v1161_v58  ;;  %v1755_v58 = vld [vmem:[%s7104_s5 + $0x70] sm:$0xff] }
 0x14f   : > { %v1149_v37 = vpop.f32.mrf.mxu0 }
 0x150   : > { %v1163_v51 = vadd.f32 %v1149_v37, %v1036_v45  ;;  %v1284_v7 = vadd.f32 %v1269_v39, %v1162_v54 }
 0x151   : > { %v1153_v38 = vpop.f32.mrf.mxu0 }
 0x152   : > { %v1164_v59 = vadd.f32 %v1153_v38, %v1040_v49  ;;  %v1285_v1 = vadd.f32 %v1271_v43, %v1163_v51 }
 0x153   : > { %v1155_v40 = vpop.f32.mrf.mxu0 }
 0x154   : > { %v1165_v2 = vadd.f32 %v1155_v40, %v1042_v57  ;;  %v1286_v11 = vadd.f32 %v1275_v55, %v1164_v59  ;;  %v1457_v55 = vld [vmem:[%s7101_s25 + $0x8] sm:$0x3f]  ;;  %v1756_v57 = vld [vmem:[%s7104_s5 + $0x78] sm:$0xff] }
 0x155   : > { %v1379_v41 = vpop.f32.mrf.mxu0  ;;  %v1550_v59 = vld [vmem:[%s7103_s0 + $0x8] sm:$0x3f]  ;;  %s4712_s0 = sld [smem:[#allocation4 + $0x4]] }
 0x156   : > { %v1287_v18 = vadd.f32 %v1277_v8, %v1165_v2  ;;  %v1402_v30 = vadd.f32 %v1379_v41, %v1280_v22  ;;  %v1749_v2 = vld [vmem:[%s7104_s5 + $0x40] sm:$0xff]  ;;  %v1758_v22 = vld [vmem:[%s7104_s5 + $0x88] sm:$0xff] }
 0x157   : > { %v1381_v44 = vpop.f32.mrf.mxu0  ;;  %v1745_v8 = vld [vmem:[%s7104_s5 + $0x20] sm:$0xff] }
 0x158   : > { %v1403_v23 = vadd.f32 %v1381_v44, %v1281_v13  ;;  %v1422_v28 = vadd.f32 %v1415_v15, %v1402_v30  ;;  %v1638_v13 = vld [vmem:[%s7098_s26] sm:$0xff] }
 0x159   : > { %v1385_v48 = vpop.f32.mrf.mxu0 }
 0x15a   : > { %v1404_v24 = vadd.f32 %v1385_v48, %v1282_v14  ;;  %v1423_v35 = vadd.f32 %v1419_v19, %v1403_v23  ;;  %v1440_v48 = vmul.f32 %v1439_v31, %v1422_v28  ;;  %vm1431_vm9 = vcmp.ge.f32.partialorder %v1422_v28, 0.0  ;;  %v1741_v14 = vld [vmem:[%s7104_s5] sm:$0xff] }
 0x15b   : > { %v1387_v56 = vpop.f32.mrf.mxu0  ;;  %v1654_v23 = vld [vmem:[%s7098_s26 + $0x80] sm:$0xff] }
 0x15c   : > { %v1405_v20 = vadd.f32 %v1387_v56, %v1283_v10  ;;  %v1424_v36 = vadd.f32 %v1415_v15, %v1404_v24  ;;  %v1441_v46 = vmul.f32 %v1439_v31, %v1423_v35  ;;  %vm1432_vm8 = vcmp.ge.f32.partialorder %v1423_v35, 0.0  ;;  %v1549_v56 = vld [vmem:[%s7102_s29] sm:$0xff]  ;;  %v1743_v10 = vld [vmem:[%s7104_s5 + $0x10] sm:$0xff]  ;;  %s6950_s29 = sand.u32 1, %s5045_s2  }
 0x15d   : > { %v1391_v0 = vpop.f32.mrf.mxu0  ;;  %v1448_v54 = vsel %vm1431_vm9, %v1422_v28, %v1440_v48  ;;  %v1757_v24 = vld [vmem:[%s7104_s5 + $0x80] sm:$0xff]  ;;  %v4602_v28 = vld [vmem:[%s7105_s9 + $0x148] sm:$0xff]  ;;  %s4361_s13 = scalar_lea.sflag [#allocation6], %s6950_s29 }
 0x15e   : > { %v1406_v16 = vadd.f32 %v1391_v0, %v1284_v7  ;;  %v1425_v33 = vadd.f32 %v1419_v19, %v1405_v20  ;;  %v1442_v44 = vmul.f32 %v1439_v31, %v1424_v36  ;;  %vm1433_vm7 = vcmp.ge.f32.partialorder %v1424_v36, 0.0  ;;  %v1751_v0 = vld [vmem:[%s7104_s5 + $0x50] sm:$0xff]  ;;  %v1746_v7 = vld [vmem:[%s7104_s5 + $0x28] sm:$0xff]  ;;  %v1861_v48 = vld [vmem:[%s7105_s9 + $0x80] sm:$0xff] }
 0x15f   : > { %v1393_v9 = vpop.f32.mrf.mxu0  ;;  %v1449_v52 = vsel %vm1432_vm8, %v1423_v35, %v1441_v46  ;;  %v1759_v20 = vld [vmem:[%s7104_s5 + $0x90] sm:$0xff]  ;;  %v4600_v46 = vld [vmem:[%s7105_s9 + $0x138] sm:$0xff] }
 0x160   : > { %v1407_v12 = vadd.f32 %v1393_v9, %v1285_v1  ;;  %v1426_v32 = vadd.f32 %v1415_v15, %v1406_v16  ;;  %v1443_v43 = vmul.f32 %v1439_v31, %v1425_v33  ;;  %vm1434_vm6 = vcmp.ge.f32.partialorder %v1425_v33, 0.0  ;;  %v1750_v1 = vld [vmem:[%s7104_s5 + $0x48] sm:$0xff]  ;;  %v1744_v9 = vld [vmem:[%s7104_s5 + $0x18] sm:$0xff]  ;;  %v1761_v16 = vld [vmem:[%s7104_s5 + $0xa0] sm:$0xff] }
 0x161   : > { %v1397_v17 = vpop.f32.mrf.mxu0  ;;  %v1450_v51 = vsel %vm1433_vm7, %v1424_v36, %v1442_v44  ;;  %v1863_v44 = vld [vmem:[%s7105_s9 + $0x90] sm:$0xff] }
 0x162   : > { %v1408_v21 = vadd.f32 %v1397_v17, %v1286_v11  ;;  %v1427_v26 = vadd.f32 %v1419_v19, %v1407_v12  ;;  %v1444_v40 = vmul.f32 %v1439_v31, %v1426_v32  ;;  %vm1435_vm5 = vcmp.ge.f32.partialorder %v1426_v32, 0.0  ;;  %v1639_v11 = vld [vmem:[%s7098_s26 + $0x8] sm:$0xff]  ;;  %v1657_v17 = vld [vmem:[%s7098_s26 + $0x98] sm:$0xff] }
 0x163   : > { %v1399_v25 = vpop.f32.mrf.mxu0  ;;  %v1451_v50 = vsel %vm1434_vm6, %v1425_v33, %v1443_v43  ;;  %v1742_v12 = vld [vmem:[%s7104_s5 + $0x8] sm:$0xff]  ;;  %1695 = vmatpush1.msra.mxu0 %v1639_v11  ;;  %v4589_v11 = vld [vmem:[%s7105_s9 + $0xe0] sm:$0xff] }
 0x164   : > { %v1428_v27 = vadd.f32 %v1415_v15, %v1408_v21  ;;  %v1409_v29 = vadd.f32 %v1399_v25, %v1287_v18  ;;  %v1445_v39 = vmul.f32 %v1439_v31, %v1427_v26  ;;  %vm1436_vm4 = vcmp.ge.f32.partialorder %v1427_v26, 0.0  ;;  %1696 = vmatprep.subr.mxu0 %v5062_v4  ;;  %v1658_v15 = vld [vmem:[%s7098_s26 + $0xa0] sm:$0xff]  ;;  %v1760_v18 = vld [vmem:[%s7104_s5 + $0x98] sm:$0xff]  ;;  %v1655_v21 = vld [vmem:[%s7098_s26 + $0x88] sm:$0xff]  ;;  %s7060_s5 = sshll.u32 %s5217_s7, 4 }
 0x165   : > { %v1452_v49 = vsel %vm1435_vm5, %v1426_v32, %v1444_v40  ;;  %1697 = vmatpush1.msra.mxu0 %v1638_v13  ;;  %v1866_v25 = vld [vmem:[%s7105_s9 + $0xa8] sm:$0xf]  ;;  %v4588_v13 = vld [vmem:[%s7105_s9 + $0xd8] sm:$0xff]  ;;  %vm2882_vm5 = vcmask 654336   ;;  %s4375_s8 = scalar_lea.hbm %s7041_s24, %s7060_s5 }
 0x166   : > { %v1429_v34 = vadd.f32 %v1419_v19, %v1409_v29  ;;  %v1446_v37 = vmul.f32 %v1439_v31, %v1428_v27  ;;  %vm1437_vm2 = vcmp.ge.f32.partialorder %v1428_v27, 0.0  ;;  %v1453_v45 = vsel %vm1436_vm4, %v1427_v26, %v1445_v39  ;;  %1720 = vmatprep.subr.mxu0 %v5062_v4  ;;  %v1656_v19 = vld [vmem:[%s7098_s26 + $0x90] sm:$0xff]  ;;  %v4604_v26 = vld [vmem:[%s7105_s9 + $0x158] sm:$0xf] }
 0x167   : > { %1721 = vmatpush2.msra.mxu0 %v1658_v15  ;;  %v1864_v39 = vld [vmem:[%s7105_s9 + $0x98] sm:$0xff]  ;;  %v4587_v15 = vld [vmem:[%s7105_s9 + $0xd0] sm:$0xff]  ;;  %vm2455_vm4 = vcmask 80896  }
 0x168   : > { %v1447_v38 = vmul.f32 %v1439_v31, %v1429_v34  ;;  %vm1438_vm3 = vcmp.ge.f32.partialorder %v1429_v34, 0.0  ;;  %v1454_v41 = vsel %vm1437_vm2, %v1428_v27, %v1446_v37  ;;  %1722 = vmatprep.subr.mxu0 %v5062_v4  ;;  %v1865_v37 = vld [vmem:[%s7105_s9 + $0xa0] sm:$0xf] }
 0x169   : > { %1723 = vmatpush2.msra.mxu0 %v1657_v17  ;;  %v4586_v17 = vld [vmem:[%s7105_s9 + $0xc8] sm:$0xff] }
 0x16a   : > { %v1455_v42 = vsel %vm1438_vm3, %v1429_v34, %v1447_v38  ;;  %1724 = vmatprep.subr.mxu0 %v5062_v4  ;;  %v4603_v38 = vld [vmem:[%s7105_s9 + $0x150] sm:$0xf] }
 0x16b   : > { %4571 = vmatprep.subr.msk.mxu1 %vm1465_vm1, %v1455_v42  ;;  %1725 = vmatpush2.msra.mxu0 %v1656_v19  ;;  %v4585_v19 = vld [vmem:[%s7105_s9 + $0xc0] sm:$0xff] }
 0x16c   : > { %4572 = vmatpush1.msk.msra.mxu1 %vm1465_vm1, %v1454_v41  ;;  %1726 = vmatprep.subr.mxu0 %v5062_v4 }
 0x16d   : > { %1498 = vmatprep.subr.mxu1 %v1453_v45  ;;  %1727 = vmatpush2.msra.mxu0 %v1655_v21  ;;  %v4583_v21 = vld [vmem:[%s7105_s9 + $0xb0] sm:$0xff] }
 0x16e   : > { %1499 = vmatpush1.msra.mxu1 %v1452_v49  ;;  %1728 = vmatprep.subr.mxu0 %v5062_v4 }
 0x16f   : > { %1500 = vmatprep.subr.mxu1 %v1451_v50  ;;  %1729 = vmatpush2.msra.mxu0 %v1654_v23 }
 0x170   : > { %1501 = vmatpush1.msra.mxu1 %v1450_v51  ;;  %4605 = vmatprep.subr.msk.mxu0 %vm1465_vm1, %v4604_v26 }
 0x171   : > { %1502 = vmatprep.subr.mxu1 %v1449_v52 }
 0x172   : > { %1503 = vmatpush1.msra.mxu1 %v1448_v54 }
 0x173   : > { %4573 = vmatmul.mubr.msk.f32.vlgmr.msra.gmra.mxu1 %vm1458_vm10, %v1456_v53  ;;  %4575 = vmatprep.subr.msk.mxu1 %vm1465_vm1, %v1455_v42  ;;  %v4597_v53 = vld [vmem:[%s7105_s9 + $0x120] sm:$0xff] }
 0x174   : > { %4576 = vmatpush1.msk.msra.mxu1 %vm1465_vm1, %v1454_v41  ;;  %1542 = vmatprep.mubr.f32.mxu1 %v5062_v4  ;;  %v4601_v41 = vld [vmem:[%s7105_s9 + $0x140] sm:$0xff] }
 0x175   : > { %1583 = vmatprep.subr.mxu1 %v1453_v45  ;;  %v1862_v45 = vld [vmem:[%s7105_s9 + $0x88] sm:$0xff] }
 0x176   : > { %1584 = vmatpush1.msra.mxu1 %v1452_v49  ;;  %v4599_v49 = vld [vmem:[%s7105_s9 + $0x130] sm:$0xff] }
 0x177   : > { %4574 = vmatmul.mubr.msk.f32.gmra.mxu1 %vm1458_vm10, %v1457_v55  ;;  %1585 = vmatprep.subr.mxu1 %v1451_v50  ;;  %v1860_v50 = vld [vmem:[%s7105_s9 + $0x78] sm:$0xff]  ;;  %v1857_v55 = vld [vmem:[%s7105_s9 + $0x60] sm:$0xff] }
 0x178   : > { %1586 = vmatpush1.msra.mxu1 %v1450_v51  ;;  %1621 = vmatprep.mubr.f32.mxu1 %v5062_v4  ;;  %v4598_v51 = vld [vmem:[%s7105_s9 + $0x128] sm:$0xff] }
 0x179   : > { %1587 = vmatprep.subr.mxu1 %v1449_v52  ;;  %v1859_v52 = vld [vmem:[%s7105_s9 + $0x70] sm:$0xff] }
 0x17a   : > { %1588 = vmatpush1.msra.mxu1 %v1448_v54  ;;  %v1858_v54 = vld [vmem:[%s7105_s9 + $0x68] sm:$0xff] }
 0x17b   : > { %4577 = vmatmul.mubr.msk.f32.vlgmr.msra.gmra.mxu1 %vm1458_vm10, %v1549_v56  ;;  %1762 = vmatprep.subr.mxu1 %v5062_v4  ;;  %v1856_v56 = vld [vmem:[%s7105_s9 + $0x58] sm:$0xff] }
 0x17c   : > { %1627 = vmatprep.mubr.f32.mxu1 %v5062_v4  ;;  %1763 = vmatpush1.msra.mxu1 %v1756_v57  ;;  %v1855_v57 = vld [vmem:[%s7105_s9 + $0x50] sm:$0xff] }
 0x17d   : > { %1764 = vmatprep.subr.mxu1 %v5062_v4 }
 0x17e   : > { %1765 = vmatpush1.msra.mxu1 %v1755_v58  ;;  %v4596_v58 = vld [vmem:[%s7105_s9 + $0x118] sm:$0xff] }
 0x17f   : > { %4578 = vmatmul.mubr.msk.f32.gmra.mxu1 %vm1458_vm10, %v1550_v59  ;;  %1766 = vmatprep.subr.mxu1 %v5062_v4  ;;  %v1854_v59 = vld [vmem:[%s7105_s9 + $0x48] sm:$0xff] }
 0x180   : > { %1767 = vmatpush1.msra.mxu1 %v1754_v60  ;;  %v4595_v60 = vld [vmem:[%s7105_s9 + $0x110] sm:$0xff] }
 0x181   : > { %1768 = vmatprep.subr.mxu1 %v5062_v4 }
 0x182   : > { %1769 = vmatpush1.msra.mxu1 %v1753_v61  ;;  %v1853_v61 = vld [vmem:[%s7105_s9 + $0x40] sm:$0xff] }
 0x183   : > { %1770 = vmatprep.subr.mxu1 %v5062_v4 }
 0x184   : > { %1771 = vmatpush1.msra.mxu1 %v1752_v62  ;;  %v4594_v62 = vld [vmem:[%s7105_s9 + $0x108] sm:$0xff] }
 0x185   : > { %1772 = vmatprep.subr.mxu1 %v5062_v4 }
 0x186   : > { %1773 = vmatpush1.msra.mxu1 %v1751_v0  ;;  %v1852_v0 = vld [vmem:[%s7105_s9 + $0x38] sm:$0xff] }
 0x187   : > { %1774 = vmatprep.subr.mxu1 %v5062_v4 }
 0x188   : > { %1775 = vmatpush1.msra.mxu1 %v1750_v1  ;;  %v4593_v1 = vld [vmem:[%s7105_s9 + $0x100] sm:$0xff] }
 0x189   : > { %1776 = vmatprep.subr.mxu1 %v5062_v4 }
 0x18a   : > { %1777 = vmatpush1.msra.mxu1 %v1749_v2  ;;  %v1851_v2 = vld [vmem:[%s7105_s9 + $0x30] sm:$0xff] }
 0x18b   : > { %1778 = vmatprep.subr.mxu1 %v5062_v4 }
 0x18c   : > { %1779 = vmatpush1.msra.mxu1 %v1748_v3  ;;  %v4592_v3 = vld [vmem:[%s7105_s9 + $0xf8] sm:$0xff] }
 0x18d   : > { %1780 = vmatprep.subr.mxu1 %v5062_v4 }
 0x18e   : > { %1781 = vmatpush1.msra.mxu1 %v1747_v6  ;;  %v1850_v6 = vld [vmem:[%s7105_s9 + $0x28] sm:$0xff] }
 0x18f   : > { %1782 = vmatprep.subr.mxu1 %v5062_v4 }
 0x190   : > { %1783 = vmatpush1.msra.mxu1 %v1746_v7  ;;  %v4591_v7 = vld [vmem:[%s7105_s9 + $0xf0] sm:$0xff] }
 0x191   : > { %1784 = vmatprep.subr.mxu1 %v5062_v4 }
 0x192   : > { %1785 = vmatpush1.msra.mxu1 %v1745_v8  ;;  %v1849_v8 = vld [vmem:[%s7105_s9 + $0x20] sm:$0xff] }
 0x193   : > { %1786 = vmatprep.subr.mxu1 %v5062_v4 }
 0x194   : > { %1787 = vmatpush1.msra.mxu1 %v1744_v9  ;;  %v4590_v9 = vld [vmem:[%s7105_s9 + $0xe8] sm:$0xff] }
 0x195   : > { %1788 = vmatprep.subr.mxu1 %v5062_v4 }
 0x196   : > { %1789 = vmatpush1.msra.mxu1 %v1743_v10  ;;  %v1848_v10 = vld [vmem:[%s7105_s9 + $0x18] sm:$0xff] }
 0x197   : > { %1790 = vmatprep.subr.mxu1 %v5062_v4 }
 0x198   : > { %1791 = vmatpush1.msra.mxu1 %v1742_v12  ;;  %v1847_v12 = vld [vmem:[%s7105_s9 + $0x10] sm:$0xff] }
 0x199   : > { %1792 = vmatprep.subr.mxu1 %v5062_v4 }
 0x19a   : > { %1793 = vmatpush1.msra.mxu1 %v1741_v14  ;;  %v1846_v14 = vld [vmem:[%s7105_s9 + $0x8] sm:$0xff] }
 0x19b   : > { %1816 = vmatprep.subr.mxu1 %v5062_v4 }
 0x19c   : > { %1817 = vmatpush2.msra.mxu1 %v1761_v16  ;;  %v1845_v16 = vld [vmem:[%s7105_s9] sm:$0xff] }
 0x19d   : > { %1818 = vmatprep.subr.mxu1 %v5062_v4 }
 0x19e   : > { %1819 = vmatpush2.msra.mxu1 %v1760_v18  ;;  %v4660_v18 = vld [vmem:[%s7105_s9 + $0x2b8] sm:$0xf] }
 0x19f   : > { %1820 = vmatprep.subr.mxu1 %v5062_v4 }
 0x1a0   : > { %1821 = vmatpush2.msra.mxu1 %v1759_v20  ;;  %v4584_v20 = vld [vmem:[%s7105_s9 + $0xb8] sm:$0xff] }
 0x1a1   : > { %1822 = vmatprep.subr.mxu1 %v5062_v4 }
 0x1a2   : > { %1823 = vmatpush2.msra.mxu1 %v1758_v22  ;;  %v4634_v22 = vld [vmem:[%s7105_s9 + $0x208] sm:$0xf] }
 0x1a3   : > { %1824 = vmatprep.subr.mxu1 %v5062_v4 }
 0x1a4   : > { %1825 = vmatpush2.msra.mxu1 %v1757_v24 }
 0x1a5   : > { %4609 = vmatprep.subr.msk.mxu1 %vm1465_vm1, %v1866_v25 }
 0x233   : > { %v1538_v27 = vpop.f32.mrf.mxu1 }
 0x235   : > { %v1540_v29 = vpop.f32.mrf.mxu1 }
 0x237   : > { %v1544_v30 = vpop.f32.mrf.mxu1 }
 0x239   : > { %v1546_v32 = vpop.f32.mrf.mxu1 }
 0x23b   : > { %v1623_v31 = vpop.f32.mrf.mxu1 }
 0x23c   : > { %v1634_v35 = vmax.f32 %v1538_v27, %v1623_v31 }
 0x23d   : > { %v1625_v33 = vpop.f32.mrf.mxu1 }
 0x23e   : > { %v1635_v34 = vmax.f32 %v1540_v29, %v1625_v33 }
 0x23f   : > { %v1629_v36 = vpop.f32.mrf.mxu1 }
 0x240   : > { %4579 = vmatprep.mubr.msk.f32.mxu0 %vm1659_vm11, %v1635_v34  ;;  %4581 = vmatprep.mubr.msk.f32.mxu1 %vm1659_vm11, %v1635_v34  ;;  %v1636_v43 = vmax.f32 %v1544_v30, %v1629_v36  ;;  %v4659_v34 = vld [vmem:[%s7105_s9 + $0x2b0] sm:$0xf]  ;;  %v4658_v36 = vld [vmem:[%s7105_s9 + $0x2a8] sm:$0xff] }
 0x241   : > { %v1631_v40 = vpop.f32.mrf.mxu1  ;;  %1731 = vmatmul.mubr.f32.vlgmr.msra.gmra.mxu0 %v1634_v35  ;;  %1827 = vmatmul.mubr.f32.vlgmr.msra.gmra.mxu1 %v1634_v35 }
 0x242   : > { %v1637_v42 = vmax.f32 %v1546_v32, %v1631_v40  ;;  %4610 = vmatpush1.msk.msra.mxu1 %vm1465_vm1, %v1865_v37  ;;  %4606 = vmatpush1.msk.msra.mxu0 %vm1465_vm1, %v4603_v38  ;;  %v4657_v37 = vld [vmem:[%s7105_s9 + $0x2a0] sm:$0xff]  ;;  %v4656_v38 = vld [vmem:[%s7105_s9 + $0x298] sm:$0xff] }
 0x243   : > { %2005 = vmatprep.subr.mxu1 %v1864_v39  ;;  %1916 = vmatprep.subr.mxu0 %v4602_v28  ;;  %v4633_v39 = vld [vmem:[%s7105_s9 + $0x200] sm:$0xf]  ;;  %v4655_v28 = vld [vmem:[%s7105_s9 + $0x290] sm:$0xff] }
 0x244   : > { %4580 = vmatprep.mubr.msk.f32.mxu0 %vm1659_vm11, %v1637_v42  ;;  %4582 = vmatprep.mubr.msk.f32.mxu1 %vm1659_vm11, %v1637_v42 }
 0x245   : > { %1736 = vmatmul.mubr.f32.gmra.mxu0 %v1636_v43  ;;  %1832 = vmatmul.mubr.f32.gmra.mxu1 %v1636_v43  ;;  %v4632_v43 = vld [vmem:[%s7105_s9 + $0x1f8] sm:$0xff] }
 0x246   : > { %2006 = vmatpush1.msra.mxu1 %v1863_v44  ;;  %1917 = vmatpush1.msra.mxu0 %v4601_v41  ;;  %v4654_v44 = vld [vmem:[%s7105_s9 + $0x288] sm:$0xff]  ;;  %v4631_v41 = vld [vmem:[%s7105_s9 + $0x1f0] sm:$0xff] }
 0x247   : > { %2007 = vmatprep.subr.mxu1 %v1862_v45  ;;  %1918 = vmatprep.subr.mxu0 %v4600_v46  ;;  %v4653_v45 = vld [vmem:[%s7105_s9 + $0x280] sm:$0xff]  ;;  %v4630_v46 = vld [vmem:[%s7105_s9 + $0x1e8] sm:$0xff] }
 0x248   : > { %2008 = vmatpush1.msra.mxu1 %v1861_v48  ;;  %1919 = vmatpush1.msra.mxu0 %v4599_v49  ;;  %v4652_v48 = vld [vmem:[%s7105_s9 + $0x278] sm:$0xff]  ;;  %v4651_v49 = vld [vmem:[%s7105_s9 + $0x270] sm:$0xff] }
 0x249   : > { %2009 = vmatprep.subr.mxu1 %v1860_v50  ;;  %1920 = vmatprep.subr.mxu0 %v4598_v51  ;;  %v4629_v50 = vld [vmem:[%s7105_s9 + $0x1e0] sm:$0xff]  ;;  %v4650_v51 = vld [vmem:[%s7105_s9 + $0x268] sm:$0xff] }
 0x24a   : > { %2010 = vmatpush1.msra.mxu1 %v1859_v52  ;;  %1921 = vmatpush1.msra.mxu0 %v4597_v53  ;;  %v4628_v53 = vld [vmem:[%s7105_s9 + $0x1d8] sm:$0xff] }
 0x24b   : > { %2011 = vmatprep.subr.mxu1 %v1858_v54  ;;  %2057 = vmatprep.mubr.f32.mxu1 %v5062_v4  ;;  %v4649_v54 = vld [vmem:[%s7105_s9 + $0x260] sm:$0xff] }
 0x24c   : > { %2012 = vmatpush1.msra.mxu1 %v1857_v55  ;;  %1968 = vmatprep.mubr.f32.mxu0 %v5062_v4  ;;  %v4627_v55 = vld [vmem:[%s7105_s9 + $0x1d0] sm:$0xff] }
 0x24d   : > { %2013 = vmatprep.subr.mxu1 %v1856_v56  ;;  %1922 = vmatprep.subr.mxu0 %v4596_v58  ;;  %v4648_v56 = vld [vmem:[%s7105_s9 + $0x258] sm:$0xff]  ;;  %v4647_v58 = vld [vmem:[%s7105_s9 + $0x250] sm:$0xff] }
 0x24e   : > { %2014 = vmatpush1.msra.mxu1 %v1855_v57  ;;  %1923 = vmatpush1.msra.mxu0 %v4595_v60  ;;  %v4626_v57 = vld [vmem:[%s7105_s9 + $0x1c8] sm:$0xff] }
 0x24f   : > { %2015 = vmatprep.subr.mxu1 %v1854_v59  ;;  %1924 = vmatprep.subr.mxu0 %v4594_v62  ;;  %v4625_v59 = vld [vmem:[%s7105_s9 + $0x1c0] sm:$0xff]  ;;  %v4646_v60 = vld [vmem:[%s7105_s9 + $0x248] sm:$0xff] }
 0x250   : > { %2016 = vmatpush1.msra.mxu1 %v1853_v61  ;;  %1925 = vmatpush1.msra.mxu0 %v4593_v1  ;;  %v4624_v61 = vld [vmem:[%s7105_s9 + $0x1b8] sm:$0xff]  ;;  %v4645_v62 = vld [vmem:[%s7105_s9 + $0x240] sm:$0xff] }
 0x251   : > { %2017 = vmatprep.subr.mxu1 %v1852_v0  ;;  %1926 = vmatprep.subr.mxu0 %v4592_v3  ;;  %v4623_v0 = vld [vmem:[%s7105_s9 + $0x1b0] sm:$0xff]  ;;  %v4644_v1 = vld [vmem:[%s7105_s9 + $0x238] sm:$0xff] }
 0x252   : > { %2018 = vmatpush1.msra.mxu1 %v1851_v2  ;;  %1927 = vmatpush1.msra.mxu0 %v4591_v7  ;;  %v4622_v2 = vld [vmem:[%s7105_s9 + $0x1a8] sm:$0xff]  ;;  %v4643_v3 = vld [vmem:[%s7105_s9 + $0x230] sm:$0xff] }
 0x253   : > { %2019 = vmatprep.subr.mxu1 %v1850_v6  ;;  %1928 = vmatprep.subr.mxu0 %v4590_v9  ;;  %v4621_v6 = vld [vmem:[%s7105_s9 + $0x1a0] sm:$0xff]  ;;  %v4642_v7 = vld [vmem:[%s7105_s9 + $0x228] sm:$0xff] }
 0x254   : > { %2020 = vmatpush1.msra.mxu1 %v1849_v8  ;;  %1929 = vmatpush1.msra.mxu0 %v4589_v11  ;;  %v4620_v8 = vld [vmem:[%s7105_s9 + $0x198] sm:$0xff]  ;;  %v4641_v9 = vld [vmem:[%s7105_s9 + $0x220] sm:$0xff] }
 0x255   : > { %2021 = vmatprep.subr.mxu1 %v1848_v10  ;;  %1930 = vmatprep.subr.mxu0 %v4588_v13  ;;  %v4619_v10 = vld [vmem:[%s7105_s9 + $0x190] sm:$0xff]  ;;  %v4640_v11 = vld [vmem:[%s7105_s9 + $0x218] sm:$0xff] }
 0x256   : > { %2022 = vmatpush1.msra.mxu1 %v1847_v12  ;;  %1931 = vmatpush1.msra.mxu0 %v4587_v15  ;;  %v4618_v12 = vld [vmem:[%s7105_s9 + $0x188] sm:$0xff]  ;;  %v4639_v13 = vld [vmem:[%s7105_s9 + $0x210] sm:$0xff]  ;;  %v4616_v15 = vld [vmem:[%s7105_s9 + $0x178] sm:$0xff] }
 0x257   : > { %2023 = vmatprep.subr.mxu1 %v1846_v14  ;;  %1932 = vmatprep.subr.mxu0 %v4586_v17  ;;  %v4617_v14 = vld [vmem:[%s7105_s9 + $0x180] sm:$0xff] }
 0x258   : > { %2024 = vmatpush1.msra.mxu1 %v1845_v16  ;;  %1933 = vmatpush1.msra.mxu0 %v4585_v19  ;;  %v4615_v16 = vld [vmem:[%s7105_s9 + $0x170] sm:$0xff]  ;;  %v4613_v19 = vld [vmem:[%s7105_s9 + $0x160] sm:$0xff] }
 0x259   : > { %4661 = vmatprep.subr.msk.mxu1 %vm1465_vm1, %v4660_v18  ;;  %1934 = vmatprep.subr.mxu0 %v4584_v20  ;;  %v4614_v18 = vld [vmem:[%s7105_s9 + $0x168] sm:$0xff] }
 0x25a   : > { %1935 = vmatpush1.msra.mxu0 %v4583_v21  ;;  %v4686_v20 = vld [vmem:[%s7105_s9 + $0x368] sm:$0xf] }
 0x25b   : > { %4635 = vmatprep.subr.msk.mxu0 %vm1465_vm1, %v4634_v22 }
 0x301   : > { %v1732_v23 = vpop.f32.mrf.mxu0  ;;  %v1828_v24 = vpop.f32.mrf.mxu1 }
 0x302   : > { %v1837_v25 = vmax.f32 %v1732_v23, %v1828_v24  ;;  %v4685_v23 = vld [vmem:[%s7105_s9 + $0x360] sm:$0xf]  ;;  %v4684_v24 = vld [vmem:[%s7105_s9 + $0x358] sm:$0xff] }
 0x303   : > { %v1734_v26 = vpop.f32.mrf.mxu0  ;;  %v1830_v27 = vpop.f32.mrf.mxu1 }
 0x304   : > { %1840 = vst.msk [vmem:[#allocation2] sm:$0xff] %vm1839_vm12, %v1837_v25  ;;  %v4683_v25 = vld [vmem:[%s7105_s9 + $0x350] sm:$0xff]  ;;  %v4682_v26 = vld [vmem:[%s7105_s9 + $0x348] sm:$0xff]  ;;  %v4681_v27 = vld [vmem:[%s7105_s9 + $0x340] sm:$0xff] }
 0x305   : > { %v1737_v29 = vpop.f32.mrf.mxu0  ;;  %v1833_v30 = vpop.f32.mrf.mxu1 }
 0x306   : > { %v1838_v32 = vmax.f32 %v1737_v29, %v1833_v30  ;;  %v4680_v30 = vld [vmem:[%s7105_s9 + $0x338] sm:$0xff] }
 0x307   : > { %v1739_v31 = vpop.f32.mrf.mxu0  ;;  %v1835_v33 = vpop.f32.mrf.mxu1 }
 0x308   : > { %1842 = vst.msk [vmem:[#allocation2 + $0x8] sm:$0x3f] %vm1841_vm13, %v1838_v32  ;;  %v4679_v32 = vld [vmem:[%s7105_s9 + $0x330] sm:$0xff]  ;;  %v4678_v31 = vld [vmem:[%s7105_s9 + $0x328] sm:$0xff]  ;;  %v4677_v33 = vld [vmem:[%s7105_s9 + $0x320] sm:$0xff] }
 0x30b   : > { %v1843_v35 = vld [vmem:[#allocation2] sm:$0xff] }
 0x30c   : > { %4611 = vmatmul.mubr.msk.f32.vlgmr.msra.gmra.mxu1 %vm1839_vm12, %v1843_v35  ;;  %v4675_v35 = vld [vmem:[%s7105_s9 + $0x310] sm:$0xff] }
 0x30d   : > { %4662 = vmatpush1.msk.msra.mxu1 %vm1465_vm1, %v4659_v34  ;;  %2063 = vmatprep.mubr.f32.mxu1 %v5062_v4  ;;  %v4676_v34 = vld [vmem:[%s7105_s9 + $0x318] sm:$0xff] }
 0x30e   : > { %2237 = vmatprep.subr.mxu1 %v4658_v36  ;;  %v4674_v36 = vld [vmem:[%s7105_s9 + $0x308] sm:$0xff] }
 0x30f   : > { %2238 = vmatpush1.msra.mxu1 %v4657_v37  ;;  %v1867_v40 = vld [vmem:[#allocation2 + $0x1] sm:$0xff]  ;;  %v1868_v52 = vld [vmem:[#allocation2 + $0x9] sm:$0x3]  ;;  %v2189_v22 = vld [vmem:[#allocation2 + $0xb] sm:$0x3] }
 0x310   : > { %v1844_v42 = vld [vmem:[#allocation2 + $0x8] sm:$0x3]  ;;  %2239 = vmatprep.subr.mxu1 %v4656_v38  ;;  %4607 = vmatmul.mubr.msk.f32.vlgmr.msra.gmra.mxu0 %vm1839_vm12, %v1867_v40  ;;  %v2071_v29 = vld [vmem:[#allocation2 + $0xa] sm:$0x3]  ;;  %v4673_v37 = vld [vmem:[%s7105_s9 + $0x300] sm:$0xff] }
 0x311   : > { %4612 = vmatmul.mubr.msk.f32.gmra.mxu1 %vm1839_vm12, %v1844_v42  ;;  %4636 = vmatpush1.msk.msra.mxu0 %vm1465_vm1, %v4633_v39  ;;  %v2188_v17 = vld [vmem:[#allocation2 + $0x3] sm:$0xff]  ;;  %v4672_v38 = vld [vmem:[%s7105_s9 + $0x2f8] sm:$0xff]  ;;  %v4671_v39 = vld [vmem:[%s7105_s9 + $0x2f0] sm:$0xff] }
 0x312   : > { %2240 = vmatpush1.msra.mxu1 %v4655_v28  ;;  %2119 = vmatprep.subr.mxu0 %v4632_v43  ;;  %v2070_v21 = vld [vmem:[#allocation2 + $0x2] sm:$0xff]  ;;  %v4668_v42 = vld [vmem:[%s7105_s9 + $0x2d8] sm:$0xff]  ;;  %v4667_v43 = vld [vmem:[%s7105_s9 + $0x2d0] sm:$0xff] }
 0x313   : > { %2241 = vmatprep.subr.mxu1 %v4654_v44  ;;  %2120 = vmatpush1.msra.mxu0 %v4631_v41  ;;  %v4670_v28 = vld [vmem:[%s7105_s9 + $0x2e8] sm:$0xff]  ;;  %v4669_v40 = vld [vmem:[%s7105_s9 + $0x2e0] sm:$0xff] }
 0x314   : > { %2242 = vmatpush1.msra.mxu1 %v4653_v45  ;;  %1974 = vmatprep.mubr.f32.mxu0 %v5062_v4  ;;  %v4666_v44 = vld [vmem:[%s7105_s9 + $0x2c8] sm:$0xff]  ;;  %v4665_v41 = vld [vmem:[%s7105_s9 + $0x2c0] sm:$0xff] }
 0x315   : > { %2121 = vmatprep.subr.mxu0 %v4630_v46  ;;  %2243 = vmatprep.subr.mxu1 %v4652_v48  ;;  %v2306_v45 = vld [vmem:[#allocation2 + $0x4] sm:$0xff]  ;;  %v2307_v46 = vld [vmem:[#allocation2 + $0xc] sm:$0x3]  ;;  %v2722_v48 = vld [vmem:[#allocation8 + $0x78] sm:$0xff] }
 0x316   : > { %4608 = vmatmul.mubr.msk.f32.gmra.mxu0 %vm1839_vm12, %v1868_v52  ;;  %2244 = vmatpush1.msra.mxu1 %v4651_v49  ;;  %v2721_v49 = vld [vmem:[#allocation8 + $0x70] sm:$0xff]  ;;  %v2718_v52 = vld [vmem:[#allocation8 + $0x58] sm:$0xff] }
 0x317   : > { %2122 = vmatpush1.msra.mxu0 %v4629_v50  ;;  %2245 = vmatprep.subr.mxu1 %v4650_v51  ;;  %v2720_v50 = vld [vmem:[#allocation8 + $0x68] sm:$0xff]  ;;  %v2719_v51 = vld [vmem:[#allocation8 + $0x60] sm:$0xff] }
 0x318   : > { %2123 = vmatprep.subr.mxu0 %v4628_v53  ;;  %2246 = vmatpush1.msra.mxu1 %v4649_v54  ;;  %v2717_v53 = vld [vmem:[#allocation8 + $0x50] sm:$0xff]  ;;  %v2716_v54 = vld [vmem:[#allocation8 + $0x48] sm:$0xff] }
 0x319   : > { %2124 = vmatpush1.msra.mxu0 %v4627_v55  ;;  %2247 = vmatprep.subr.mxu1 %v4648_v56  ;;  %v2715_v55 = vld [vmem:[#allocation8 + $0x40] sm:$0xff]  ;;  %v2714_v56 = vld [vmem:[#allocation8 + $0x38] sm:$0xff] }
 0x31a   : > { %2125 = vmatprep.subr.mxu0 %v4626_v57  ;;  %2248 = vmatpush1.msra.mxu1 %v4647_v58  ;;  %v2713_v57 = vld [vmem:[#allocation8 + $0x30] sm:$0xff]  ;;  %v2712_v58 = vld [vmem:[#allocation8 + $0x28] sm:$0xff] }
 0x31b   : > { %2126 = vmatpush1.msra.mxu0 %v4625_v59  ;;  %2249 = vmatprep.subr.mxu1 %v4646_v60  ;;  %v2711_v59 = vld [vmem:[#allocation8 + $0x20] sm:$0xff]  ;;  %v2710_v60 = vld [vmem:[#allocation8 + $0x18] sm:$0xff] }
 0x31c   : > { %2127 = vmatprep.subr.mxu0 %v4624_v61  ;;  %2250 = vmatpush1.msra.mxu1 %v4645_v62  ;;  %v2709_v61 = vld [vmem:[#allocation8 + $0x10] sm:$0xff]  ;;  %v2708_v62 = vld [vmem:[#allocation8 + $0x8] sm:$0xff] }
 0x31d   : > { %2128 = vmatpush1.msra.mxu0 %v4623_v0  ;;  %2251 = vmatprep.subr.mxu1 %v4644_v1 }
 0x31e   : > { %2129 = vmatprep.subr.mxu0 %v4622_v2  ;;  %2252 = vmatpush1.msra.mxu1 %v4643_v3 }
 0x31f   : > { %2130 = vmatpush1.msra.mxu0 %v4621_v6  ;;  %2253 = vmatprep.subr.mxu1 %v4642_v7 }
 0x320   : > { %2131 = vmatprep.subr.mxu0 %v4620_v8  ;;  %2254 = vmatpush1.msra.mxu1 %v4641_v9 }
 0x321   : > { %2132 = vmatpush1.msra.mxu0 %v4619_v10  ;;  %2255 = vmatprep.subr.mxu1 %v4640_v11 }
 0x322   : > { %2133 = vmatprep.subr.mxu0 %v4618_v12  ;;  %2256 = vmatpush1.msra.mxu1 %v4639_v13 }
 0x323   : > { %2134 = vmatpush1.msra.mxu0 %v4617_v14  ;;  %2289 = vmatprep.mubr.f32.mxu1 %v5062_v4 }
 0x324   : > { %2135 = vmatprep.subr.mxu0 %v4616_v15  ;;  %4663 = vmatmul.mubr.msk.f32.vlgmr.msra.gmra.mxu1 %vm1839_vm12, %v2188_v17 }
 0x325   : > { %2136 = vmatpush1.msra.mxu0 %v4615_v16  ;;  %2171 = vmatprep.mubr.f32.mxu0 %v5062_v4 }
 0x326   : > { %2137 = vmatprep.subr.mxu0 %v4614_v18  ;;  %2295 = vmatprep.mubr.f32.mxu1 %v5062_v4 }
 0x327   : > { %2138 = vmatpush1.msra.mxu0 %v4613_v19 }
 0x328   : > { %4637 = vmatmul.mubr.msk.f32.vlgmr.msra.gmra.mxu0 %vm1839_vm12, %v2070_v21  ;;  %4664 = vmatmul.mubr.msk.f32.gmra.mxu1 %vm1839_vm12, %v2189_v22 }
 0x329   : > { %4687 = vmatprep.subr.msk.mxu0 %vm1465_vm1, %v4686_v20  ;;  %2177 = vmatprep.mubr.f32.mxu0 %v5062_v4 }
 0x32a   : > { %4688 = vmatpush1.msk.msra.mxu0 %vm1465_vm1, %v4685_v23  ;;  %2530 = vmatprep.mubr.f32.mxu1 %v5062_v4 }
 0x32b   : > { %2355 = vmatprep.subr.mxu0 %v4684_v24 }
 0x32c   : > { %2356 = vmatpush1.msra.mxu0 %v4683_v25 }
 0x32d   : > { %4638 = vmatmul.mubr.msk.f32.gmra.mxu0 %vm1839_vm12, %v2071_v29  ;;  %2357 = vmatprep.subr.mxu0 %v4682_v26  ;;  %v2424_v26 = vld [vmem:[%s7106_s1] sm:$0x3]  ;;  %s804_s1 = scalar_lea.vmem [#allocation11], %s6950_s29 }
 0x32e   : > { %2358 = vmatpush1.msra.mxu0 %v4681_v27  ;;  %2407 = vmatprep.mubr.f32.mxu0 %v5062_v4 }
 0x32f   : > { %2359 = vmatprep.subr.mxu0 %v4680_v30 }
 0x330   : > { %2360 = vmatpush1.msra.mxu0 %v4679_v32 }
 0x331   : > { %2361 = vmatprep.subr.mxu0 %v4678_v31  ;;  %v2433_v31 = vrot.slane %v2424_v26, %v5558_v5 }
 0x332   : > { %2362 = vmatpush1.msra.mxu0 %v4677_v33 }
 0x333   : > { %2363 = vmatprep.subr.mxu0 %v4676_v34 }
 0x334   : > { %2364 = vmatpush1.msra.mxu0 %v4675_v35 }
 0x335   : > { %2365 = vmatprep.subr.mxu0 %v4674_v36  ;;  %v2429_v36 = vrot.slane %v2424_v26, %v5552_v63 }
 0x336   : > { %2366 = vmatpush1.msra.mxu0 %v4673_v37 }
 0x337   : > { %2367 = vmatprep.subr.mxu0 %v4672_v38 }
 0x338   : > { %2368 = vmatpush1.msra.mxu0 %v4671_v39 }
 0x339   : > { %2369 = vmatprep.subr.mxu0 %v4670_v28 }
 0x33a   : > { %2370 = vmatpush1.msra.mxu0 %v4669_v40 }
 0x33b   : > { %2371 = vmatprep.subr.mxu0 %v4668_v42 }
 0x33c   : > { %2372 = vmatpush1.msra.mxu0 %v4667_v43 }
 0x33d   : > { %2373 = vmatprep.subr.mxu0 %v4666_v44 }
 0x33e   : > { %2374 = vmatpush1.msra.mxu0 %v4665_v41  ;;  %v2445_v41 = vstv %s4691_s6  ;;  %s4711_s6 = sld [smem:[#allocation4 + $0x3]] }
 0x33f   : > { %4689 = vmatmul.mubr.msk.f32.vlgmr.msra.gmra.mxu0 %vm1839_vm12, %v2306_v45  ;;  %2727 = vmatprep.subr.mxu0 %v5062_v4 }
 0x340   : > { %2413 = vmatprep.mubr.f32.mxu0 %v5062_v4  ;;  %2728 = vmatpush1.msra.mxu0 %v2722_v48 }
 0x341   : > { %2729 = vmatprep.subr.mxu0 %v5062_v4 }
 0x342   : > { %2730 = vmatpush1.msra.mxu0 %v2721_v49 }
 0x343   : > { %4690 = vmatmul.mubr.msk.f32.gmra.mxu0 %vm1839_vm12, %v2307_v46  ;;  %2731 = vmatprep.subr.mxu0 %v5062_v4  ;;  %vm5063_vm12 = vmmov 0  }
 0x344   : > { %2732 = vmatpush1.msra.mxu0 %v2720_v50 }
 0x345   : > { %2733 = vmatprep.subr.mxu0 %v5062_v4 }
 0x346   : > { %2734 = vmatpush1.msra.mxu0 %v2719_v51 }
 0x347   : > { %2735 = vmatprep.subr.mxu0 %v5062_v4 }
 0x348   : > { %2736 = vmatpush1.msra.mxu0 %v2718_v52 }
 0x349   : > { %2737 = vmatprep.subr.mxu0 %v5062_v4 }
 0x34a   : > { %2738 = vmatpush1.msra.mxu0 %v2717_v53 }
 0x34b   : > { %2739 = vmatprep.subr.mxu0 %v5062_v4 }
 0x34c   : > { %2740 = vmatpush1.msra.mxu0 %v2716_v54  ;;  %v2454_v54 = vld [vmem:[%s7107_s10] sm:$0x1f] }
 0x34d   : > { %2741 = vmatprep.subr.mxu0 %v5062_v4 }
 0x34e   : > { %2742 = vmatpush1.msra.mxu0 %v2715_v55 }
 0x34f   : > { %2743 = vmatprep.subr.mxu0 %v5062_v4 }
 0x350   : > { %2744 = vmatpush1.msra.mxu0 %v2714_v56  ;;  %v2537_v56 = vld [vmem:[%s7108_s11] sm:$0x1f] }
 0x351   : > { %2745 = vmatprep.subr.mxu0 %v5062_v4 }
 0x352   : > { %2746 = vmatpush1.msra.mxu0 %v2713_v57  ;;  %v2629_v57 = vld [vmem:[%s7109_s12 + $0x78] sm:$0xff] }
 0x353   : > { %2747 = vmatprep.subr.mxu0 %v5062_v4 }
 0x354   : > { %2748 = vmatpush1.msra.mxu0 %v2712_v58  ;;  %v2628_v58 = vld [vmem:[%s7109_s12 + $0x70] sm:$0xff] }
 0x355   : > { %2749 = vmatprep.subr.mxu0 %v5062_v4 }
 0x356   : > { %2750 = vmatpush1.msra.mxu0 %v2711_v59  ;;  %v2627_v59 = vld [vmem:[%s7109_s12 + $0x68] sm:$0xff] }
 0x357   : > { %2751 = vmatprep.subr.mxu0 %v5062_v4 }
 0x358   : > { %2752 = vmatpush1.msra.mxu0 %v2710_v60  ;;  %v2626_v60 = vld [vmem:[%s7109_s12 + $0x60] sm:$0xff] }
 0x359   : > { %2753 = vmatprep.subr.mxu0 %v5062_v4 }
 0x35a   : > { %2754 = vmatpush1.msra.mxu0 %v2709_v61  ;;  %v2625_v61 = vld [vmem:[%s7109_s12 + $0x58] sm:$0xff] }
 0x35b   : > { %2755 = vmatprep.subr.mxu0 %v5062_v4 }
 0x35c   : > { %2756 = vmatpush1.msra.mxu0 %v2708_v62  ;;  %v2624_v62 = vld [vmem:[%s7109_s12 + $0x50] sm:$0xff] }
 0x35d   : > { %2757 = vmatprep.subr.mxu0 %v5062_v4 }
 0x3cc   : > { %v2059_v2 = vpop.f32.mrf.mxu1 }
 0x3ce   : > { %v2061_v6 = vpop.f32.mrf.mxu1 }
 0x3d0   : > { %v1970_v0 = vpop.f32.mrf.mxu0 }
 0x3d1   : > { %v2065_v8 = vpop.f32.mrf.mxu1  ;;  %v2060_v15 = vadd.f32 %v2059_v2, %v1970_v0  ;;  %v2623_v0 = vld [vmem:[%s7109_s12 + $0x48] sm:$0xff]  ;;  %v2621_v2 = vld [vmem:[%s7109_s12 + $0x38] sm:$0xff] }
 0x3d2   : > { %v1972_v1 = vpop.f32.mrf.mxu0 }
 0x3d3   : > { %v2067_v10 = vpop.f32.mrf.mxu1  ;;  %v2062_v14 = vadd.f32 %v2061_v6, %v1972_v1  ;;  %v2622_v1 = vld [vmem:[%s7109_s12 + $0x40] sm:$0xff]  ;;  %v2619_v6 = vld [vmem:[%s7109_s12 + $0x28] sm:$0xff] }
 0x3d6   : > { %v1976_v3 = vpop.f32.mrf.mxu0 }
 0x3d7   : > { %v2066_v17 = vadd.f32 %v2065_v8, %v1976_v3  ;;  %v2620_v3 = vld [vmem:[%s7109_s12 + $0x30] sm:$0xff]  ;;  %v2617_v8 = vld [vmem:[%s7109_s12 + $0x18] sm:$0xff] }
 0x3d8   : > { %v1978_v7 = vpop.f32.mrf.mxu0 }
 0x3d9   : > { %v2068_v21 = vadd.f32 %v2067_v10, %v1978_v7  ;;  %v2618_v7 = vld [vmem:[%s7109_s12 + $0x20] sm:$0xff]  ;;  %v2615_v10 = vld [vmem:[%s7109_s12 + $0x8] sm:$0xff] }
 0x3e4   : > { %v2291_v12 = vpop.f32.mrf.mxu1 }
 0x3e6   : > { %v2293_v16 = vpop.f32.mrf.mxu1 }
 0x3e8   : > { %v2173_v9 = vpop.f32.mrf.mxu0  ;;  %v2297_v23 = vpop.f32.mrf.mxu1 }
 0x3e9   : > { %v2184_v19 = vadd.f32 %v2173_v9, %v2060_v15  ;;  %v2616_v9 = vld [vmem:[%s7109_s12 + $0x10] sm:$0xff] }
 0x3ea   : > { %v2175_v11 = vpop.f32.mrf.mxu0  ;;  %v2299_v34 = vpop.f32.mrf.mxu1  ;;  %v2632_v15 = vld [vmem:[%s7109_s12 + $0x90] sm:$0xff] }
 0x3eb   : > { %v2185_v18 = vadd.f32 %v2175_v11, %v2062_v14  ;;  %v2302_v29 = vadd.f32 %v2291_v12, %v2184_v19  ;;  %v2614_v11 = vld [vmem:[%s7109_s12] sm:$0xff]  ;;  %v2707_v12 = vld [vmem:[#allocation8] sm:$0xff]  ;;  %v2726_v14 = vld [vmem:[#allocation8 + $0x98] sm:$0xff] }
 0x3ec   : > { %2758 = vmatpush1.msra.mxu0 %v2707_v12  ;;  %v2630_v19 = vld [vmem:[%s7109_s12 + $0x80] sm:$0xff] }
 0x3ed   : > { %v2179_v13 = vpop.f32.mrf.mxu0  ;;  %v2303_v27 = vadd.f32 %v2293_v16, %v2185_v18  ;;  %2783 = vmatprep.subr.mxu0 %v5062_v4  ;;  %v2725_v16 = vld [vmem:[#allocation8 + $0x90] sm:$0xff]  ;;  %v2724_v18 = vld [vmem:[#allocation8 + $0x88] sm:$0xff] }
 0x3ee   : > { %v2186_v22 = vadd.f32 %v2179_v13, %v2066_v17  ;;  %v2633_v13 = vld [vmem:[%s7109_s12 + $0x98] sm:$0xff]  ;;  %2784 = vmatpush2.msra.mxu0 %v2726_v14  ;;  %v2631_v17 = vld [vmem:[%s7109_s12 + $0x88] sm:$0xff]  ;;  %v2837_v14 = vld [vmem:[%s7031_s14 + $0x120] sm:$0xff] }
 0x3ef   : > { %v2181_v20 = vpop.f32.mrf.mxu0  ;;  %2785 = vmatprep.subr.mxu0 %v5062_v4 }
 0x3f0   : > { %v2187_v25 = vadd.f32 %v2181_v20, %v2068_v21  ;;  %v2304_v33 = vadd.f32 %v2297_v23, %v2186_v22  ;;  %2786 = vmatpush2.msra.mxu0 %v2725_v16  ;;  %v2723_v20 = vld [vmem:[#allocation8 + $0x80] sm:$0xff]  ;;  %v2879_v21 = vld [vmem:[%s7031_s14 + $0x268] sm:$0xff] }
 0x3f1   : > { %2787 = vmatprep.subr.mxu0 %v5062_v4  ;;  %v2881_v22 = vld [vmem:[%s7031_s14 + $0x278] sm:$0xff] }
 0x3f2   : > { %v2305_v39 = vadd.f32 %v2299_v34, %v2187_v25  ;;  %2788 = vmatpush2.msra.mxu0 %v2724_v18  ;;  %v2874_v34 = vld [vmem:[%s7031_s14 + $0x240] sm:$0xff]  ;;  %v2836_v18 = vld [vmem:[%s7031_s14 + $0x118] sm:$0xff] }
 0x3f3   : > { %2789 = vmatprep.subr.mxu0 %v5062_v4 }
 0x3f4   : > { %2790 = vmatpush2.msra.mxu0 %v2723_v20  ;;  %v2835_v20 = vld [vmem:[%s7031_s14 + $0x110] sm:$0xff] }
 0x3f5   : > { %2969 = vmatprep.subr.mxu0 %v2881_v22  ;;  %v2832_v22 = vld [vmem:[%s7031_s14 + $0xf8] sm:$0xff] }
 0x3ff   : > { %v2409_v24 = vpop.f32.mrf.mxu0 }
 0x400   : > { %v2420_v35 = vadd.f32 %v2409_v24, %v2302_v29 }
 0x401   : > { %v2411_v30 = vpop.f32.mrf.mxu0 }
 0x402   : > { %v2421_v32 = vadd.f32 %v2411_v30, %v2303_v27  ;;  %v2436_v44 = vadd.f32 %v2429_v36, %v2420_v35  ;;  %v2878_v30 = vld [vmem:[%s7031_s14 + $0x260] sm:$0xff]  ;;  %v2876_v35 = vld [vmem:[%s7031_s14 + $0x250] sm:$0xff] }
 0x403   : > { %v2415_v37 = vpop.f32.mrf.mxu0 }
 0x404   : > { %v2422_v38 = vadd.f32 %v2415_v37, %v2304_v33  ;;  %v2437_v40 = vadd.f32 %v2433_v31, %v2421_v32  ;;  %v2446_v50 = vmul.f32 %v2445_v41, %v2436_v44  ;;  %vm2441_vm3 = vcmp.ge.f32.partialorder %v2436_v44, 0.0  ;;  %v2880_v32 = vld [vmem:[%s7031_s14 + $0x270] sm:$0xff]  ;;  %v2877_v33 = vld [vmem:[%s7031_s14 + $0x258] sm:$0xff] }
 0x405   : > { %v2417_v28 = vpop.f32.mrf.mxu0  ;;  %v2873_v37 = vld [vmem:[%s7031_s14 + $0x238] sm:$0xff] }
 0x406   : > { %v2438_v42 = vadd.f32 %v2429_v36, %v2422_v38  ;;  %v2423_v43 = vadd.f32 %v2417_v28, %v2305_v39  ;;  %v2447_v49 = vmul.f32 %v2445_v41, %v2437_v40  ;;  %vm2442_vm2 = vcmp.ge.f32.partialorder %v2437_v40, 0.0  ;;  %v2871_v36 = vld [vmem:[%s7031_s14 + $0x228] sm:$0xff]  ;;  %v2870_v38 = vld [vmem:[%s7031_s14 + $0x220] sm:$0xff]  ;;  %v2872_v39 = vld [vmem:[%s7031_s14 + $0x230] sm:$0xff] }
 0x407   : > { %v2450_v55 = vsel %vm2441_vm3, %v2436_v44, %v2446_v50  ;;  %v2867_v28 = vld [vmem:[%s7031_s14 + $0x208] sm:$0xff]  ;;  %v2858_v50 = vld [vmem:[%s7031_s14 + $0x1c0] sm:$0xff]  ;;  %vm4346_vm3 = vcmask 73728  }
 0x408   : > { %v2439_v45 = vadd.f32 %v2433_v31, %v2423_v43  ;;  %v2448_v46 = vmul.f32 %v2445_v41, %v2438_v42  ;;  %vm2443_vm15 = vcmp.ge.f32.partialorder %v2438_v42, 0.0  ;;  %v2451_v53 = vsel %vm2442_vm2, %v2437_v40, %v2447_v49  ;;  %v2875_v31 = vld [vmem:[%s7031_s14 + $0x248] sm:$0xff]  ;;  %v2869_v40 = vld [vmem:[%s7031_s14 + $0x218] sm:$0xff]  ;;  %v2868_v43 = vld [vmem:[%s7031_s14 + $0x210] sm:$0xff] }
 0x409   : > { %v2863_v44 = vld [vmem:[%s7031_s14 + $0x1e8] sm:$0xff]  ;;  %v2861_v49 = vld [vmem:[%s7031_s14 + $0x1d8] sm:$0xff]  ;;  %vm4264_vm2 = vcmask 16384  }
 0x40a   : > { %v2449_v48 = vmul.f32 %v2445_v41, %v2439_v45  ;;  %vm2444_vm1 = vcmp.ge.f32.partialorder %v2439_v45, 0.0  ;;  %v2452_v52 = vsel %vm2443_vm15, %v2438_v42, %v2448_v46  ;;  %v2866_v42 = vld [vmem:[%s7031_s14 + $0x200] sm:$0xff]  ;;  %v2865_v41 = vld [vmem:[%s7031_s14 + $0x1f8] sm:$0xff]  ;;  %v2864_v46 = vld [vmem:[%s7031_s14 + $0x1f0] sm:$0xff]  ;;  %vm4272_vm15 = vcmask 1042432  }
 0x40c   : > { %v2453_v51 = vsel %vm2444_vm1, %v2439_v45, %v2449_v48  ;;  %v2862_v45 = vld [vmem:[%s7031_s14 + $0x1e0] sm:$0xff]  ;;  %v2859_v48 = vld [vmem:[%s7031_s14 + $0x1c8] sm:$0xff]  ;;  %vm4268_vm1 = vcmask 23552  }
 0x40d   : > { %4692 = vmatprep.subr.msk.mxu1 %vm2459_vm14, %v2453_v51 }
 0x40e   : > { %4693 = vmatpush1.msk.msra.mxu1 %vm2459_vm14, %v2452_v52 }
 0x40f   : > { %2496 = vmatprep.subr.mxu1 %v2451_v53 }
 0x410   : > { %2497 = vmatpush1.msra.mxu1 %v2450_v55 }
 0x411   : > { %4694 = vmatmul.mubr.msk.f32.vlgmr.msra.gmra.mxu1 %vm2455_vm4, %v2454_v54  ;;  %4695 = vmatprep.subr.msk.mxu1 %vm2459_vm14, %v2453_v51  ;;  %v2860_v51 = vld [vmem:[%s7031_s14 + $0x1d0] sm:$0xff]  ;;  %v2854_v54 = vld [vmem:[%s7031_s14 + $0x1a0] sm:$0xff] }
 0x412   : > { %4696 = vmatpush1.msk.msra.mxu1 %vm2459_vm14, %v2452_v52  ;;  %2605 = vmatprep.mubr.f32.mxu1 %v5062_v4  ;;  %v2855_v52 = vld [vmem:[%s7031_s14 + $0x1a8] sm:$0xff]  ;;  %vm4190_vm14 = vcmask 523264  }
 0x413   : > { %2571 = vmatprep.subr.mxu1 %v2451_v53  ;;  %v2857_v53 = vld [vmem:[%s7031_s14 + $0x1b8] sm:$0xff] }
 0x414   : > { %2572 = vmatpush1.msra.mxu1 %v2450_v55  ;;  %v2856_v55 = vld [vmem:[%s7031_s14 + $0x1b0] sm:$0xff] }
 0x415   : > { %4697 = vmatmul.mubr.msk.f32.vlgmr.msra.gmra.mxu1 %vm2455_vm4, %v2537_v56  ;;  %2637 = vmatprep.subr.mxu1 %v5062_v4  ;;  %v2851_v56 = vld [vmem:[%s7031_s14 + $0x188] sm:$0xff] }
 0x416   : > { %2638 = vmatpush1.msra.mxu1 %v2629_v57  ;;  %v2853_v57 = vld [vmem:[%s7031_s14 + $0x198] sm:$0xff] }
 0x417   : > { %2639 = vmatprep.subr.mxu1 %v5062_v4 }
 0x418   : > { %2640 = vmatpush1.msra.mxu1 %v2628_v58  ;;  %v2850_v58 = vld [vmem:[%s7031_s14 + $0x180] sm:$0xff] }
 0x419   : > { %2641 = vmatprep.subr.mxu1 %v5062_v4 }
 0x41a   : > { %2642 = vmatpush1.msra.mxu1 %v2627_v59  ;;  %v2852_v59 = vld [vmem:[%s7031_s14 + $0x190] sm:$0xff] }
 0x41b   : > { %2643 = vmatprep.subr.mxu1 %v5062_v4 }
 0x41c   : > { %2644 = vmatpush1.msra.mxu1 %v2626_v60  ;;  %v2847_v60 = vld [vmem:[%s7031_s14 + $0x168] sm:$0xff] }
 0x41d   : > { %2645 = vmatprep.subr.mxu1 %v5062_v4 }
 0x41e   : > { %2646 = vmatpush1.msra.mxu1 %v2625_v61  ;;  %v2849_v61 = vld [vmem:[%s7031_s14 + $0x178] sm:$0xff] }
 0x41f   : > { %2647 = vmatprep.subr.mxu1 %v5062_v4 }
 0x420   : > { %2648 = vmatpush1.msra.mxu1 %v2624_v62  ;;  %v2846_v62 = vld [vmem:[%s7031_s14 + $0x160] sm:$0xff] }
 0x421   : > { %2649 = vmatprep.subr.mxu1 %v5062_v4 }
 0x422   : > { %2650 = vmatpush1.msra.mxu1 %v2623_v0  ;;  %v2848_v0 = vld [vmem:[%s7031_s14 + $0x170] sm:$0xff] }
 0x423   : > { %2651 = vmatprep.subr.mxu1 %v5062_v4 }
 0x424   : > { %2652 = vmatpush1.msra.mxu1 %v2622_v1  ;;  %v2843_v1 = vld [vmem:[%s7031_s14 + $0x148] sm:$0xff] }
 0x425   : > { %2653 = vmatprep.subr.mxu1 %v5062_v4 }
 0x426   : > { %2654 = vmatpush1.msra.mxu1 %v2621_v2  ;;  %v2845_v2 = vld [vmem:[%s7031_s14 + $0x158] sm:$0xff] }
 0x427   : > { %2655 = vmatprep.subr.mxu1 %v5062_v4 }
 0x428   : > { %2656 = vmatpush1.msra.mxu1 %v2620_v3  ;;  %v2842_v3 = vld [vmem:[%s7031_s14 + $0x140] sm:$0xff] }
 0x429   : > { %2657 = vmatprep.subr.mxu1 %v5062_v4 }
 0x42a   : > { %2658 = vmatpush1.msra.mxu1 %v2619_v6  ;;  %v2844_v6 = vld [vmem:[%s7031_s14 + $0x150] sm:$0xff] }
 0x42b   : > { %2659 = vmatprep.subr.mxu1 %v5062_v4 }
 0x42c   : > { %2660 = vmatpush1.msra.mxu1 %v2618_v7  ;;  %v2838_v7 = vld [vmem:[%s7031_s14 + $0x128] sm:$0xff] }
 0x42d   : > { %2661 = vmatprep.subr.mxu1 %v5062_v4 }
 0x42e   : > { %2662 = vmatpush1.msra.mxu1 %v2617_v8  ;;  %v2840_v8 = vld [vmem:[%s7031_s14 + $0x138] sm:$0xff] }
 0x42f   : > { %2663 = vmatprep.subr.mxu1 %v5062_v4 }
 0x430   : > { %2664 = vmatpush1.msra.mxu1 %v2616_v9 }
 0x431   : > { %2665 = vmatprep.subr.mxu1 %v5062_v4 }
 0x432   : > { %2666 = vmatpush1.msra.mxu1 %v2615_v10 }
 0x433   : > { %2667 = vmatprep.subr.mxu1 %v5062_v4 }
 0x434   : > { %2668 = vmatpush1.msra.mxu1 %v2614_v11 }
 0x435   : > { %2693 = vmatprep.subr.mxu1 %v5062_v4 }
 0x436   : > { %2694 = vmatpush2.msra.mxu1 %v2633_v13 }
 0x437   : > { %2695 = vmatprep.subr.mxu1 %v5062_v4 }
 0x438   : > { %2696 = vmatpush2.msra.mxu1 %v2632_v15  ;;  %v2839_v15 = vld [vmem:[%s7031_s14 + $0x130] sm:$0xff] }
 0x439   : > { %2697 = vmatprep.subr.mxu1 %v5062_v4 }
 0x43a   : > { %2698 = vmatpush2.msra.mxu1 %v2631_v17  ;;  %v2834_v17 = vld [vmem:[%s7031_s14 + $0x108] sm:$0xff] }
 0x43b   : > { %2699 = vmatprep.subr.mxu1 %v5062_v4 }
 0x43c   : > { %2700 = vmatpush2.msra.mxu1 %v2630_v19  ;;  %v2833_v19 = vld [vmem:[%s7031_s14 + $0x100] sm:$0xff] }
 0x43d   : > { %2898 = vmatprep.subr.mxu1 %v2879_v21  ;;  %v2830_v21 = vld [vmem:[%s7031_s14 + $0xe8] sm:$0xff] }
 0x4d1   : > { %v2532_v23 = vpop.f32.mrf.mxu1 }
 0x4d3   : > { %v2534_v24 = vpop.f32.mrf.mxu1 }
 0x4d5   : > { %v2607_v25 = vpop.f32.mrf.mxu1 }
 0x4d6   : > { %v2612_v29 = vmax.f32 %v2532_v23, %v2607_v25  ;;  %v2829_v23 = vld [vmem:[%s7031_s14 + $0xe0] sm:$0xff]  ;;  %v2826_v25 = vld [vmem:[%s7031_s14 + $0xc8] sm:$0xff] }
 0x4d7   : > { %v2609_v26 = vpop.f32.mrf.mxu1 }
 0x4d8   : > { %v2613_v27 = vmax.f32 %v2534_v24, %v2609_v26  ;;  %v2831_v24 = vld [vmem:[%s7031_s14 + $0xf0] sm:$0xff]  ;;  %v2828_v26 = vld [vmem:[%s7031_s14 + $0xd8] sm:$0xff] }
 0x4da   : > { %4698 = vmatprep.mubr.msk.f32.mxu1 %vm841_vm0, %v2613_v27  ;;  %4699 = vmatprep.mubr.msk.f32.mxu0 %vm841_vm0, %v2613_v27  ;;  %vm2798_vm0 = vcmask 651264   ;;  %v2825_v27 = vld [vmem:[%s7031_s14 + $0xc0] sm:$0xff] }
 0x4db   : > { %2702 = vmatmul.mubr.f32.vlgmr.msra.gmra.mxu1 %v2612_v29  ;;  %2792 = vmatmul.mubr.f32.vlgmr.msra.gmra.mxu0 %v2612_v29  ;;  %v2827_v29 = vld [vmem:[%s7031_s14 + $0xd0] sm:$0xff] }
 0x4dc   : > { %2899 = vmatpush1.msra.mxu1 %v2878_v30  ;;  %2970 = vmatpush1.msra.mxu0 %v2880_v32  ;;  %v2822_v30 = vld [vmem:[%s7031_s14 + $0xa8] sm:$0xff]  ;;  %v2824_v32 = vld [vmem:[%s7031_s14 + $0xb8] sm:$0xff] }
 0x4dd   : > { %2900 = vmatprep.subr.mxu1 %v2875_v31  ;;  %2971 = vmatprep.subr.mxu0 %v2877_v33  ;;  %v2821_v31 = vld [vmem:[%s7031_s14 + $0xa0] sm:$0xff]  ;;  %v2823_v33 = vld [vmem:[%s7031_s14 + $0xb0] sm:$0xff] }
 0x4de   : > { %2901 = vmatpush1.msra.mxu1 %v2874_v34  ;;  %2972 = vmatpush1.msra.mxu0 %v2876_v35  ;;  %v2818_v34 = vld [vmem:[%s7031_s14 + $0x88] sm:$0xff]  ;;  %v2820_v35 = vld [vmem:[%s7031_s14 + $0x98] sm:$0xff] }
 0x4df   : > { %2902 = vmatprep.subr.mxu1 %v2871_v36  ;;  %2973 = vmatprep.subr.mxu0 %v2873_v37  ;;  %v2817_v36 = vld [vmem:[%s7031_s14 + $0x80] sm:$0xff]  ;;  %v2819_v37 = vld [vmem:[%s7031_s14 + $0x90] sm:$0xff] }
 0x4e0   : > { %2903 = vmatpush1.msra.mxu1 %v2870_v38  ;;  %2974 = vmatpush1.msra.mxu0 %v2872_v39  ;;  %v2814_v38 = vld [vmem:[%s7031_s14 + $0x68] sm:$0xff]  ;;  %v2816_v39 = vld [vmem:[%s7031_s14 + $0x78] sm:$0xff] }
 0x4e1   : > { %2904 = vmatprep.subr.mxu1 %v2867_v28  ;;  %2975 = vmatprep.subr.mxu0 %v2869_v40  ;;  %v2813_v28 = vld [vmem:[%s7031_s14 + $0x60] sm:$0xff]  ;;  %v2815_v40 = vld [vmem:[%s7031_s14 + $0x70] sm:$0xff] }
 0x4e2   : > { %2905 = vmatpush1.msra.mxu1 %v2866_v42  ;;  %2976 = vmatpush1.msra.mxu0 %v2868_v43  ;;  %v2810_v42 = vld [vmem:[%s7031_s14 + $0x48] sm:$0xff]  ;;  %v2812_v43 = vld [vmem:[%s7031_s14 + $0x58] sm:$0xff] }
 0x4e3   : > { %2906 = vmatprep.subr.mxu1 %v2863_v44  ;;  %2977 = vmatprep.subr.mxu0 %v2865_v41  ;;  %v2809_v44 = vld [vmem:[%s7031_s14 + $0x40] sm:$0xff]  ;;  %v2811_v41 = vld [vmem:[%s7031_s14 + $0x50] sm:$0xff] }
 0x4e4   : > { %2907 = vmatpush1.msra.mxu1 %v2862_v45  ;;  %2978 = vmatpush1.msra.mxu0 %v2864_v46  ;;  %v2806_v45 = vld [vmem:[%s7031_s14 + $0x28] sm:$0xff]  ;;  %v2808_v46 = vld [vmem:[%s7031_s14 + $0x38] sm:$0xff] }
 0x4e5   : > { %2950 = vmatprep.mubr.f32.mxu1 %v5062_v4  ;;  %3021 = vmatprep.mubr.f32.mxu0 %v5062_v4 }
 0x4e6   : > { %2908 = vmatprep.subr.mxu1 %v2859_v48  ;;  %2979 = vmatprep.subr.mxu0 %v2861_v49  ;;  %v2805_v48 = vld [vmem:[%s7031_s14 + $0x20] sm:$0xff]  ;;  %v2807_v49 = vld [vmem:[%s7031_s14 + $0x30] sm:$0xff] }
 0x4e7   : > { %2909 = vmatpush1.msra.mxu1 %v2858_v50  ;;  %2980 = vmatpush1.msra.mxu0 %v2860_v51  ;;  %v2802_v50 = vld [vmem:[%s7031_s14 + $0x8] sm:$0xff]  ;;  %v2804_v51 = vld [vmem:[%s7031_s14 + $0x18] sm:$0xff] }
 0x4e8   : > { %2910 = vmatprep.subr.mxu1 %v2855_v52  ;;  %2981 = vmatprep.subr.mxu0 %v2857_v53  ;;  %v2801_v52 = vld [vmem:[%s7031_s14] sm:$0xff]  ;;  %v2803_v53 = vld [vmem:[%s7031_s14 + $0x10] sm:$0xff] }
 0x4e9   : > { %2911 = vmatpush1.msra.mxu1 %v2854_v54  ;;  %2982 = vmatpush1.msra.mxu0 %v2856_v55  ;;  %v3211_v54 = vld [vmem:[%s7031_s14 + $0x3a8] sm:$0xff]  ;;  %v3213_v55 = vld [vmem:[%s7031_s14 + $0x3b8] sm:$0xff] }
 0x4ea   : > { %2912 = vmatprep.subr.mxu1 %v2851_v56  ;;  %2983 = vmatprep.subr.mxu0 %v2853_v57  ;;  %v3210_v57 = vld [vmem:[%s7031_s14 + $0x3a0] sm:$0xff] }
 0x4eb   : > { %2913 = vmatpush1.msra.mxu1 %v2850_v58  ;;  %2984 = vmatpush1.msra.mxu0 %v2852_v59  ;;  %v3212_v58 = vld [vmem:[%s7031_s14 + $0x3b0] sm:$0xff]  ;;  %v3207_v59 = vld [vmem:[%s7031_s14 + $0x388] sm:$0xff] }
 0x4ec   : > { %2914 = vmatprep.subr.mxu1 %v2847_v60  ;;  %2985 = vmatprep.subr.mxu0 %v2849_v61  ;;  %v3209_v60 = vld [vmem:[%s7031_s14 + $0x398] sm:$0xff]  ;;  %v3206_v61 = vld [vmem:[%s7031_s14 + $0x380] sm:$0xff] }
 0x4ed   : > { %2915 = vmatpush1.msra.mxu1 %v2846_v62  ;;  %2986 = vmatpush1.msra.mxu0 %v2848_v0  ;;  %v3208_v62 = vld [vmem:[%s7031_s14 + $0x390] sm:$0xff]  ;;  %v3203_v0 = vld [vmem:[%s7031_s14 + $0x368] sm:$0xff] }
 0x4ee   : > { %2916 = vmatprep.subr.mxu1 %v2843_v1  ;;  %2987 = vmatprep.subr.mxu0 %v2845_v2  ;;  %v3205_v1 = vld [vmem:[%s7031_s14 + $0x378] sm:$0xff]  ;;  %v3202_v2 = vld [vmem:[%s7031_s14 + $0x360] sm:$0xff] }
 0x4ef   : > { %2917 = vmatpush1.msra.mxu1 %v2842_v3  ;;  %2988 = vmatpush1.msra.mxu0 %v2844_v6  ;;  %v3204_v3 = vld [vmem:[%s7031_s14 + $0x370] sm:$0xff]  ;;  %v3199_v6 = vld [vmem:[%s7031_s14 + $0x348] sm:$0xff] }
 0x4f0   : > { %3043 = vmatprep.subr.mxu1 %v2838_v7  ;;  %3114 = vmatprep.subr.mxu0 %v2840_v8  ;;  %v3201_v7 = vld [vmem:[%s7031_s14 + $0x358] sm:$0xff]  ;;  %v3198_v8 = vld [vmem:[%s7031_s14 + $0x340] sm:$0xff] }
 0x59b   : > { %v2703_v9 = vpop.f32.mrf.mxu1  ;;  %v2793_v10 = vpop.f32.mrf.mxu0 }
 0x59c   : > { %v2797_v11 = vmax.f32 %v2703_v9, %v2793_v10  ;;  %v3200_v9 = vld [vmem:[%s7031_s14 + $0x350] sm:$0xff]  ;;  %v3195_v10 = vld [vmem:[%s7031_s14 + $0x328] sm:$0xff] }
 0x59d   : > { %v2705_v12 = vpop.f32.mrf.mxu1  ;;  %v2795_v13 = vpop.f32.mrf.mxu0 }
 0x59e   : > { %2799 = vst.msk [vmem:[#allocation3] sm:$0x1f] %vm2798_vm0, %v2797_v11  ;;  %v3197_v11 = vld [vmem:[%s7031_s14 + $0x338] sm:$0xff]  ;;  %v3194_v12 = vld [vmem:[%s7031_s14 + $0x320] sm:$0xff]  ;;  %v3196_v13 = vld [vmem:[%s7031_s14 + $0x330] sm:$0xff] }
 0x5a5   : > { %v2841_v16 = vld [vmem:[#allocation3 + $0x1] sm:$0x1]  ;;  %v2800_v56 = vld [vmem:[#allocation3] sm:$0x1] }
 0x5a6   : > { %4700 = vmatmul.mubr.msk.f32.vlgmr.msra.gmra.mxu1 %vm2882_vm5, %v2841_v16  ;;  %4701 = vmatmul.mubr.msk.f32.vlgmr.msra.gmra.mxu0 %vm2882_vm5, %v2841_v16  ;;  %v3190_v16 = vld [vmem:[%s7031_s14 + $0x300] sm:$0xff] }
 0x5a7   : > { %3044 = vmatpush1.msra.mxu1 %v2837_v14  ;;  %3115 = vmatpush1.msra.mxu0 %v2839_v15  ;;  %v3191_v14 = vld [vmem:[%s7031_s14 + $0x308] sm:$0xff]  ;;  %v3193_v15 = vld [vmem:[%s7031_s14 + $0x318] sm:$0xff] }
 0x5a8   : > { %3045 = vmatprep.subr.mxu1 %v2834_v17  ;;  %3116 = vmatprep.subr.mxu0 %v2836_v18  ;;  %v3192_v17 = vld [vmem:[%s7031_s14 + $0x310] sm:$0xff]  ;;  %v3187_v18 = vld [vmem:[%s7031_s14 + $0x2e8] sm:$0xff] }
 0x5a9   : > { %3046 = vmatpush1.msra.mxu1 %v2833_v19  ;;  %3117 = vmatpush1.msra.mxu0 %v2835_v20  ;;  %v3189_v19 = vld [vmem:[%s7031_s14 + $0x2f8] sm:$0xff]  ;;  %v3186_v20 = vld [vmem:[%s7031_s14 + $0x2e0] sm:$0xff] }
 0x5aa   : > { %3047 = vmatprep.subr.mxu1 %v2830_v21  ;;  %3118 = vmatprep.subr.mxu0 %v2832_v22  ;;  %v3188_v21 = vld [vmem:[%s7031_s14 + $0x2f0] sm:$0xff]  ;;  %v3183_v22 = vld [vmem:[%s7031_s14 + $0x2c8] sm:$0xff] }
 0x5ab   : > { %3048 = vmatpush1.msra.mxu1 %v2829_v23  ;;  %3119 = vmatpush1.msra.mxu0 %v2831_v24  ;;  %v3185_v23 = vld [vmem:[%s7031_s14 + $0x2d8] sm:$0xff]  ;;  %v3182_v24 = vld [vmem:[%s7031_s14 + $0x2c0] sm:$0xff] }
 0x5ac   : > { %3049 = vmatprep.subr.mxu1 %v2826_v25  ;;  %3120 = vmatprep.subr.mxu0 %v2828_v26  ;;  %v3184_v25 = vld [vmem:[%s7031_s14 + $0x2d0] sm:$0xff]  ;;  %v3179_v26 = vld [vmem:[%s7031_s14 + $0x2a8] sm:$0xff] }
 0x5ad   : > { %3050 = vmatpush1.msra.mxu1 %v2825_v27  ;;  %3121 = vmatpush1.msra.mxu0 %v2827_v29  ;;  %v3181_v27 = vld [vmem:[%s7031_s14 + $0x2b8] sm:$0xff]  ;;  %v3178_v29 = vld [vmem:[%s7031_s14 + $0x2a0] sm:$0xff] }
 0x5ae   : > { %3051 = vmatprep.subr.mxu1 %v2822_v30  ;;  %3122 = vmatprep.subr.mxu0 %v2824_v32  ;;  %v3180_v30 = vld [vmem:[%s7031_s14 + $0x2b0] sm:$0xff]  ;;  %v3175_v32 = vld [vmem:[%s7031_s14 + $0x288] sm:$0xff] }
 0x5af   : > { %3052 = vmatpush1.msra.mxu1 %v2821_v31  ;;  %3123 = vmatpush1.msra.mxu0 %v2823_v33  ;;  %v3177_v31 = vld [vmem:[%s7031_s14 + $0x298] sm:$0xff]  ;;  %v3174_v33 = vld [vmem:[%s7031_s14 + $0x280] sm:$0xff] }
 0x5b0   : > { %3053 = vmatprep.subr.mxu1 %v2818_v34  ;;  %3124 = vmatprep.subr.mxu0 %v2820_v35  ;;  %v3176_v34 = vld [vmem:[%s7031_s14 + $0x290] sm:$0xff]  ;;  %v3401_v35 = vld [vmem:[%s7031_s14 + $0x4e8] sm:$0xff] }
 0x5b1   : > { %3054 = vmatpush1.msra.mxu1 %v2817_v36  ;;  %3125 = vmatpush1.msra.mxu0 %v2819_v37  ;;  %v3403_v36 = vld [vmem:[%s7031_s14 + $0x4f8] sm:$0xff]  ;;  %v3173_v37 = vld [vmem:[#allocation3 + $0x2] sm:$0x1] }
 0x5b2   : > { %3055 = vmatprep.subr.mxu1 %v2814_v38  ;;  %3126 = vmatprep.subr.mxu0 %v2816_v39  ;;  %v3400_v38 = vld [vmem:[%s7031_s14 + $0x4e0] sm:$0xff]  ;;  %v3402_v39 = vld [vmem:[%s7031_s14 + $0x4f0] sm:$0xff] }
 0x5b3   : > { %3056 = vmatpush1.msra.mxu1 %v2813_v28  ;;  %3127 = vmatpush1.msra.mxu0 %v2815_v40  ;;  %v3397_v28 = vld [vmem:[%s7031_s14 + $0x4c8] sm:$0xff]  ;;  %v3399_v40 = vld [vmem:[%s7031_s14 + $0x4d8] sm:$0xff] }
 0x5b4   : > { %3057 = vmatprep.subr.mxu1 %v2810_v42  ;;  %3128 = vmatprep.subr.mxu0 %v2812_v43  ;;  %v3396_v42 = vld [vmem:[%s7031_s14 + $0x4c0] sm:$0xff]  ;;  %v3398_v43 = vld [vmem:[%s7031_s14 + $0x4d0] sm:$0xff] }
 0x5b5   : > { %3058 = vmatpush1.msra.mxu1 %v2809_v44  ;;  %3129 = vmatpush1.msra.mxu0 %v2811_v41  ;;  %v3393_v44 = vld [vmem:[%s7031_s14 + $0x4a8] sm:$0xff]  ;;  %v3395_v41 = vld [vmem:[%s7031_s14 + $0x4b8] sm:$0xff] }
 0x5b6   : > { %3059 = vmatprep.subr.mxu1 %v2806_v45  ;;  %3130 = vmatprep.subr.mxu0 %v2808_v46  ;;  %v3392_v45 = vld [vmem:[%s7031_s14 + $0x4a0] sm:$0xff]  ;;  %v3394_v46 = vld [vmem:[%s7031_s14 + $0x4b0] sm:$0xff] }
 0x5b7   : > { %3060 = vmatpush1.msra.mxu1 %v2805_v48  ;;  %3131 = vmatpush1.msra.mxu0 %v2807_v49  ;;  %v3389_v48 = vld [vmem:[%s7031_s14 + $0x488] sm:$0xff]  ;;  %v3391_v49 = vld [vmem:[%s7031_s14 + $0x498] sm:$0xff] }
 0x5b8   : > { %3061 = vmatprep.subr.mxu1 %v2802_v50  ;;  %3132 = vmatprep.subr.mxu0 %v2804_v51  ;;  %v3388_v50 = vld [vmem:[%s7031_s14 + $0x480] sm:$0xff]  ;;  %v3390_v51 = vld [vmem:[%s7031_s14 + $0x490] sm:$0xff] }
 0x5b9   : > { %3062 = vmatpush1.msra.mxu1 %v2801_v52  ;;  %3095 = vmatprep.mubr.f32.mxu1 %v5062_v4  ;;  %v3385_v52 = vld [vmem:[%s7031_s14 + $0x468] sm:$0xff] }
 0x5ba   : > { %3133 = vmatpush1.msra.mxu0 %v2803_v53  ;;  %3166 = vmatprep.mubr.f32.mxu0 %v5062_v4  ;;  %v3387_v53 = vld [vmem:[%s7031_s14 + $0x478] sm:$0xff] }
 0x5bb   : > { %4702 = vmatmul.mubr.msk.f32.vlgmr.msra.gmra.mxu1 %vm2882_vm5, %v2800_v56  ;;  %4703 = vmatmul.mubr.msk.f32.vlgmr.msra.gmra.mxu0 %vm2882_vm5, %v2800_v56  ;;  %v3381_v56 = vld [vmem:[%s7031_s14 + $0x448] sm:$0xff] }
 0x5bc   : > { %3229 = vmatprep.subr.mxu1 %v3211_v54  ;;  %3300 = vmatprep.subr.mxu0 %v3213_v55  ;;  %v3384_v54 = vld [vmem:[%s7031_s14 + $0x460] sm:$0xff]  ;;  %v3386_v55 = vld [vmem:[%s7031_s14 + $0x470] sm:$0xff] }
 0x5bd   : > { %3230 = vmatpush1.msra.mxu1 %v3210_v57  ;;  %3301 = vmatpush1.msra.mxu0 %v3212_v58  ;;  %v3383_v57 = vld [vmem:[%s7031_s14 + $0x458] sm:$0xff]  ;;  %v3380_v58 = vld [vmem:[%s7031_s14 + $0x440] sm:$0xff] }
 0x5be   : > { %3231 = vmatprep.subr.mxu1 %v3207_v59  ;;  %3302 = vmatprep.subr.mxu0 %v3209_v60  ;;  %v3382_v59 = vld [vmem:[%s7031_s14 + $0x450] sm:$0xff]  ;;  %v3377_v60 = vld [vmem:[%s7031_s14 + $0x428] sm:$0xff] }
 0x5bf   : > { %3232 = vmatpush1.msra.mxu1 %v3206_v61  ;;  %3303 = vmatpush1.msra.mxu0 %v3208_v62  ;;  %v3379_v61 = vld [vmem:[%s7031_s14 + $0x438] sm:$0xff]  ;;  %v3376_v62 = vld [vmem:[%s7031_s14 + $0x420] sm:$0xff] }
 0x5c0   : > { %3233 = vmatprep.subr.mxu1 %v3203_v0  ;;  %3304 = vmatprep.subr.mxu0 %v3205_v1  ;;  %v3378_v0 = vld [vmem:[%s7031_s14 + $0x430] sm:$0xff]  ;;  %v3373_v1 = vld [vmem:[%s7031_s14 + $0x408] sm:$0xff] }
 0x5c1   : > { %3234 = vmatpush1.msra.mxu1 %v3202_v2  ;;  %3305 = vmatpush1.msra.mxu0 %v3204_v3  ;;  %v3375_v2 = vld [vmem:[%s7031_s14 + $0x418] sm:$0xff]  ;;  %v3372_v3 = vld [vmem:[%s7031_s14 + $0x400] sm:$0xff] }
 0x5c2   : > { %3235 = vmatprep.subr.mxu1 %v3199_v6  ;;  %3306 = vmatprep.subr.mxu0 %v3201_v7  ;;  %v3374_v6 = vld [vmem:[%s7031_s14 + $0x410] sm:$0xff]  ;;  %v3369_v7 = vld [vmem:[%s7031_s14 + $0x3e8] sm:$0xff] }
 0x5c3   : > { %3236 = vmatpush1.msra.mxu1 %v3198_v8  ;;  %3307 = vmatpush1.msra.mxu0 %v3200_v9  ;;  %v3371_v8 = vld [vmem:[%s7031_s14 + $0x3f8] sm:$0xff]  ;;  %v3368_v9 = vld [vmem:[%s7031_s14 + $0x3e0] sm:$0xff] }
 0x5c4   : > { %3237 = vmatprep.subr.mxu1 %v3195_v10  ;;  %3308 = vmatprep.subr.mxu0 %v3197_v11  ;;  %v3370_v10 = vld [vmem:[%s7031_s14 + $0x3f0] sm:$0xff]  ;;  %v3365_v11 = vld [vmem:[%s7031_s14 + $0x3c8] sm:$0xff] }
 0x5c5   : > { %3238 = vmatpush1.msra.mxu1 %v3194_v12  ;;  %3309 = vmatpush1.msra.mxu0 %v3196_v13  ;;  %v3367_v12 = vld [vmem:[%s7031_s14 + $0x3d8] sm:$0xff]  ;;  %v3364_v13 = vld [vmem:[%s7031_s14 + $0x3c0] sm:$0xff] }
 0x5c6   : > { %3239 = vmatprep.subr.mxu1 %v3191_v14  ;;  %3310 = vmatprep.subr.mxu0 %v3193_v15  ;;  %v3366_v14 = vld [vmem:[%s7031_s14 + $0x3d0] sm:$0xff]  ;;  %v3591_v15 = vld [vmem:[%s7031_s14 + $0x628] sm:$0xff] }
 0x5c7   : > { %3240 = vmatpush1.msra.mxu1 %v3190_v16  ;;  %3311 = vmatpush1.msra.mxu0 %v3192_v17  ;;  %v3593_v16 = vld [vmem:[%s7031_s14 + $0x638] sm:$0xff]  ;;  %v3363_v17 = vld [vmem:[#allocation3 + $0x3] sm:$0x1] }
 0x5c8   : > { %3241 = vmatprep.subr.mxu1 %v3187_v18  ;;  %3312 = vmatprep.subr.mxu0 %v3189_v19  ;;  %v3590_v18 = vld [vmem:[%s7031_s14 + $0x620] sm:$0xff]  ;;  %v3592_v19 = vld [vmem:[%s7031_s14 + $0x630] sm:$0xff] }
 0x5c9   : > { %3242 = vmatpush1.msra.mxu1 %v3186_v20  ;;  %3313 = vmatpush1.msra.mxu0 %v3188_v21  ;;  %v3587_v20 = vld [vmem:[%s7031_s14 + $0x608] sm:$0xff]  ;;  %v3589_v21 = vld [vmem:[%s7031_s14 + $0x618] sm:$0xff] }
 0x5ca   : > { %3243 = vmatprep.subr.mxu1 %v3183_v22  ;;  %3314 = vmatprep.subr.mxu0 %v3185_v23  ;;  %v3586_v22 = vld [vmem:[%s7031_s14 + $0x600] sm:$0xff]  ;;  %v3588_v23 = vld [vmem:[%s7031_s14 + $0x610] sm:$0xff] }
 0x5cb   : > { %3244 = vmatpush1.msra.mxu1 %v3182_v24  ;;  %3315 = vmatpush1.msra.mxu0 %v3184_v25  ;;  %v3583_v24 = vld [vmem:[%s7031_s14 + $0x5e8] sm:$0xff]  ;;  %v3585_v25 = vld [vmem:[%s7031_s14 + $0x5f8] sm:$0xff] }
 0x5cc   : > { %3245 = vmatprep.subr.mxu1 %v3179_v26  ;;  %3316 = vmatprep.subr.mxu0 %v3181_v27  ;;  %v3582_v26 = vld [vmem:[%s7031_s14 + $0x5e0] sm:$0xff]  ;;  %v3584_v27 = vld [vmem:[%s7031_s14 + $0x5f0] sm:$0xff] }
 0x5cd   : > { %3246 = vmatpush1.msra.mxu1 %v3178_v29  ;;  %3317 = vmatpush1.msra.mxu0 %v3180_v30  ;;  %v3579_v29 = vld [vmem:[%s7031_s14 + $0x5c8] sm:$0xff]  ;;  %v3581_v30 = vld [vmem:[%s7031_s14 + $0x5d8] sm:$0xff] }
 0x5ce   : > { %3247 = vmatprep.subr.mxu1 %v3175_v32  ;;  %3318 = vmatprep.subr.mxu0 %v3177_v31  ;;  %v3578_v32 = vld [vmem:[%s7031_s14 + $0x5c0] sm:$0xff]  ;;  %v3580_v31 = vld [vmem:[%s7031_s14 + $0x5d0] sm:$0xff] }
 0x5cf   : > { %3248 = vmatpush1.msra.mxu1 %v3174_v33  ;;  %3281 = vmatprep.mubr.f32.mxu1 %v5062_v4  ;;  %v3575_v33 = vld [vmem:[%s7031_s14 + $0x5a8] sm:$0xff] }
 0x5d0   : > { %3319 = vmatpush1.msra.mxu0 %v3176_v34  ;;  %3352 = vmatprep.mubr.f32.mxu0 %v5062_v4  ;;  %v3577_v34 = vld [vmem:[%s7031_s14 + $0x5b8] sm:$0xff] }
 0x5d1   : > { %4704 = vmatmul.mubr.msk.f32.vlgmr.msra.gmra.mxu1 %vm2882_vm5, %v3173_v37  ;;  %4705 = vmatmul.mubr.msk.f32.vlgmr.msra.gmra.mxu0 %vm2882_vm5, %v3173_v37  ;;  %v3571_v37 = vld [vmem:[%s7031_s14 + $0x588] sm:$0xff] }
 0x5d2   : > { %3419 = vmatprep.subr.mxu1 %v3401_v35  ;;  %3490 = vmatprep.subr.mxu0 %v3403_v36  ;;  %v3574_v35 = vld [vmem:[%s7031_s14 + $0x5a0] sm:$0xff]  ;;  %v3576_v36 = vld [vmem:[%s7031_s14 + $0x5b0] sm:$0xff] }
 0x5d3   : > { %3420 = vmatpush1.msra.mxu1 %v3400_v38  ;;  %3491 = vmatpush1.msra.mxu0 %v3402_v39  ;;  %v3573_v38 = vld [vmem:[%s7031_s14 + $0x598] sm:$0xff]  ;;  %v3570_v39 = vld [vmem:[%s7031_s14 + $0x580] sm:$0xff] }
 0x5d4   : > { %3421 = vmatprep.subr.mxu1 %v3397_v28  ;;  %3492 = vmatprep.subr.mxu0 %v3399_v40  ;;  %v3572_v28 = vld [vmem:[%s7031_s14 + $0x590] sm:$0xff]  ;;  %v3567_v40 = vld [vmem:[%s7031_s14 + $0x568] sm:$0xff] }
 0x5d5   : > { %3422 = vmatpush1.msra.mxu1 %v3396_v42  ;;  %3493 = vmatpush1.msra.mxu0 %v3398_v43  ;;  %v3569_v42 = vld [vmem:[%s7031_s14 + $0x578] sm:$0xff]  ;;  %v3566_v43 = vld [vmem:[%s7031_s14 + $0x560] sm:$0xff] }
 0x5d6   : > { %3423 = vmatprep.subr.mxu1 %v3393_v44  ;;  %3494 = vmatprep.subr.mxu0 %v3395_v41  ;;  %v3568_v44 = vld [vmem:[%s7031_s14 + $0x570] sm:$0xff]  ;;  %v3563_v41 = vld [vmem:[%s7031_s14 + $0x548] sm:$0xff] }
 0x5d7   : > { %3424 = vmatpush1.msra.mxu1 %v3392_v45  ;;  %3495 = vmatpush1.msra.mxu0 %v3394_v46  ;;  %v3565_v45 = vld [vmem:[%s7031_s14 + $0x558] sm:$0xff]  ;;  %v3562_v46 = vld [vmem:[%s7031_s14 + $0x540] sm:$0xff] }
 0x5d8   : > { %3425 = vmatprep.subr.mxu1 %v3389_v48  ;;  %3496 = vmatprep.subr.mxu0 %v3391_v49  ;;  %v3564_v48 = vld [vmem:[%s7031_s14 + $0x550] sm:$0xff]  ;;  %v3559_v49 = vld [vmem:[%s7031_s14 + $0x528] sm:$0xff] }
 0x5d9   : > { %3426 = vmatpush1.msra.mxu1 %v3388_v50  ;;  %3497 = vmatpush1.msra.mxu0 %v3390_v51  ;;  %v3561_v50 = vld [vmem:[%s7031_s14 + $0x538] sm:$0xff]  ;;  %v3558_v51 = vld [vmem:[%s7031_s14 + $0x520] sm:$0xff] }
 0x5da   : > { %3427 = vmatprep.subr.mxu1 %v3385_v52  ;;  %3498 = vmatprep.subr.mxu0 %v3387_v53  ;;  %v3560_v52 = vld [vmem:[%s7031_s14 + $0x530] sm:$0xff]  ;;  %v3555_v53 = vld [vmem:[%s7031_s14 + $0x508] sm:$0xff] }
 0x5db   : > { %3428 = vmatpush1.msra.mxu1 %v3384_v54  ;;  %3499 = vmatpush1.msra.mxu0 %v3386_v55  ;;  %v3557_v54 = vld [vmem:[%s7031_s14 + $0x518] sm:$0xff]  ;;  %v3554_v55 = vld [vmem:[%s7031_s14 + $0x500] sm:$0xff] }
 0x5dc   : > { %3429 = vmatprep.subr.mxu1 %v3381_v56  ;;  %3500 = vmatprep.subr.mxu0 %v3383_v57  ;;  %v3556_v56 = vld [vmem:[%s7031_s14 + $0x510] sm:$0xff] }
 0x5dd   : > { %3430 = vmatpush1.msra.mxu1 %v3380_v58  ;;  %3501 = vmatpush1.msra.mxu0 %v3382_v59  ;;  %v3553_v57 = vld [vmem:[#allocation3 + $0x4] sm:$0x1] }
 0x5de   : > { %3431 = vmatprep.subr.mxu1 %v3377_v60  ;;  %3502 = vmatprep.subr.mxu0 %v3379_v61  ;;  %v3814_v58 = vld [vmem:[#allocation9 + $0xf8] sm:$0xff]  ;;  %v3813_v60 = vld [vmem:[#allocation9 + $0xf0] sm:$0xff] }
 0x5df   : > { %3432 = vmatpush1.msra.mxu1 %v3376_v62  ;;  %3503 = vmatpush1.msra.mxu0 %v3378_v0  ;;  %v3878_v59 = vld [vmem:[#allocation9 + $0x2f8] sm:$0xff]  ;;  %v3877_v61 = vld [vmem:[#allocation9 + $0x2f0] sm:$0xff]  ;;  %v3812_v62 = vld [vmem:[#allocation9 + $0xe8] sm:$0xff] }
 0x5e0   : > { %3433 = vmatprep.subr.mxu1 %v3373_v1  ;;  %3504 = vmatprep.subr.mxu0 %v3375_v2  ;;  %v3876_v0 = vld [vmem:[#allocation9 + $0x2e8] sm:$0xff]  ;;  %v3811_v1 = vld [vmem:[#allocation9 + $0xe0] sm:$0xff] }
 0x5e1   : > { %3434 = vmatpush1.msra.mxu1 %v3372_v3  ;;  %3505 = vmatpush1.msra.mxu0 %v3374_v6  ;;  %v3875_v2 = vld [vmem:[#allocation9 + $0x2e0] sm:$0xff]  ;;  %v3810_v3 = vld [vmem:[#allocation9 + $0xd8] sm:$0xff] }
 0x5e2   : > { %3435 = vmatprep.subr.mxu1 %v3369_v7  ;;  %3506 = vmatprep.subr.mxu0 %v3371_v8  ;;  %v3874_v6 = vld [vmem:[#allocation9 + $0x2d8] sm:$0xff]  ;;  %v3809_v7 = vld [vmem:[#allocation9 + $0xd0] sm:$0xff] }
 0x5e3   : > { %3436 = vmatpush1.msra.mxu1 %v3368_v9  ;;  %3507 = vmatpush1.msra.mxu0 %v3370_v10  ;;  %v3873_v8 = vld [vmem:[#allocation9 + $0x2d0] sm:$0xff]  ;;  %v3808_v9 = vld [vmem:[#allocation9 + $0xc8] sm:$0xff] }
 0x5e4   : > { %3437 = vmatprep.subr.mxu1 %v3365_v11  ;;  %3508 = vmatprep.subr.mxu0 %v3367_v12  ;;  %v3872_v10 = vld [vmem:[#allocation9 + $0x2c8] sm:$0xff]  ;;  %v3807_v11 = vld [vmem:[#allocation9 + $0xc0] sm:$0xff] }
 0x5e5   : > { %3438 = vmatpush1.msra.mxu1 %v3364_v13  ;;  %3471 = vmatprep.mubr.f32.mxu1 %v5062_v4  ;;  %v3871_v12 = vld [vmem:[#allocation9 + $0x2c0] sm:$0xff]  ;;  %v3806_v13 = vld [vmem:[#allocation9 + $0xb8] sm:$0xff] }
 0x5e6   : > { %3509 = vmatpush1.msra.mxu0 %v3366_v14  ;;  %3542 = vmatprep.mubr.f32.mxu0 %v5062_v4  ;;  %v3870_v14 = vld [vmem:[#allocation9 + $0x2b8] sm:$0xff] }
 0x5e7   : > { %4706 = vmatmul.mubr.msk.f32.vlgmr.msra.gmra.mxu1 %vm2882_vm5, %v3363_v17  ;;  %4707 = vmatmul.mubr.msk.f32.vlgmr.msra.gmra.mxu0 %vm2882_vm5, %v3363_v17  ;;  %v3804_v17 = vld [vmem:[#allocation9 + $0xa8] sm:$0xff] }
 0x5e8   : > { %3609 = vmatprep.subr.mxu1 %v3591_v15  ;;  %3680 = vmatprep.subr.mxu0 %v3593_v16  ;;  %v3805_v15 = vld [vmem:[#allocation9 + $0xb0] sm:$0xff] }
 0x5e9   : > { %3610 = vmatpush1.msra.mxu1 %v3590_v18  ;;  %3681 = vmatpush1.msra.mxu0 %v3592_v19  ;;  %v3869_v16 = vld [vmem:[#allocation9 + $0x2b0] sm:$0xff]  ;;  %v3868_v18 = vld [vmem:[#allocation9 + $0x2a8] sm:$0xff]  ;;  %v3803_v19 = vld [vmem:[#allocation9 + $0xa0] sm:$0xff] }
 0x5ea   : > { %3611 = vmatprep.subr.mxu1 %v3587_v20  ;;  %3682 = vmatprep.subr.mxu0 %v3589_v21  ;;  %v3867_v20 = vld [vmem:[#allocation9 + $0x2a0] sm:$0xff]  ;;  %v3802_v21 = vld [vmem:[#allocation9 + $0x98] sm:$0xff] }
 0x5eb   : > { %3612 = vmatpush1.msra.mxu1 %v3586_v22  ;;  %3683 = vmatpush1.msra.mxu0 %v3588_v23  ;;  %v3866_v22 = vld [vmem:[#allocation9 + $0x298] sm:$0xff]  ;;  %v3801_v23 = vld [vmem:[#allocation9 + $0x90] sm:$0xff] }
 0x5ec   : > { %3613 = vmatprep.subr.mxu1 %v3583_v24  ;;  %3684 = vmatprep.subr.mxu0 %v3585_v25  ;;  %v3865_v24 = vld [vmem:[#allocation9 + $0x290] sm:$0xff]  ;;  %v3800_v25 = vld [vmem:[#allocation9 + $0x88] sm:$0xff] }
 0x5ed   : > { %3614 = vmatpush1.msra.mxu1 %v3582_v26  ;;  %3685 = vmatpush1.msra.mxu0 %v3584_v27  ;;  %v3864_v26 = vld [vmem:[#allocation9 + $0x288] sm:$0xff]  ;;  %v3799_v27 = vld [vmem:[#allocation9 + $0x80] sm:$0xff] }
 0x5ee   : > { %3615 = vmatprep.subr.mxu1 %v3579_v29  ;;  %3686 = vmatprep.subr.mxu0 %v3581_v30  ;;  %v3863_v29 = vld [vmem:[#allocation9 + $0x280] sm:$0xff]  ;;  %v3798_v30 = vld [vmem:[#allocation9 + $0x78] sm:$0xff] }
 0x5ef   : > { %3616 = vmatpush1.msra.mxu1 %v3578_v32  ;;  %3687 = vmatpush1.msra.mxu0 %v3580_v31  ;;  %v3862_v32 = vld [vmem:[#allocation9 + $0x278] sm:$0xff]  ;;  %v3797_v31 = vld [vmem:[#allocation9 + $0x70] sm:$0xff] }
 0x5f0   : > { %3617 = vmatprep.subr.mxu1 %v3575_v33  ;;  %3688 = vmatprep.subr.mxu0 %v3577_v34  ;;  %v3861_v33 = vld [vmem:[#allocation9 + $0x270] sm:$0xff]  ;;  %v3796_v34 = vld [vmem:[#allocation9 + $0x68] sm:$0xff] }
 0x5f1   : > { %3618 = vmatpush1.msra.mxu1 %v3574_v35  ;;  %3689 = vmatpush1.msra.mxu0 %v3576_v36  ;;  %v3860_v35 = vld [vmem:[#allocation9 + $0x268] sm:$0xff]  ;;  %v3795_v36 = vld [vmem:[#allocation9 + $0x60] sm:$0xff] }
 0x5f2   : > { %3619 = vmatprep.subr.mxu1 %v3571_v37  ;;  %3690 = vmatprep.subr.mxu0 %v3573_v38  ;;  %v3859_v37 = vld [vmem:[#allocation9 + $0x260] sm:$0xff]  ;;  %v3794_v38 = vld [vmem:[#allocation9 + $0x58] sm:$0xff] }
 0x5f3   : > { %3620 = vmatpush1.msra.mxu1 %v3570_v39  ;;  %3691 = vmatpush1.msra.mxu0 %v3572_v28  ;;  %v3858_v39 = vld [vmem:[#allocation9 + $0x258] sm:$0xff]  ;;  %v3793_v28 = vld [vmem:[#allocation9 + $0x50] sm:$0xff] }
 0x5f4   : > { %3621 = vmatprep.subr.mxu1 %v3567_v40  ;;  %3692 = vmatprep.subr.mxu0 %v3569_v42  ;;  %v3857_v40 = vld [vmem:[#allocation9 + $0x250] sm:$0xff]  ;;  %v3792_v42 = vld [vmem:[#allocation9 + $0x48] sm:$0xff] }
 0x5f5   : > { %3622 = vmatpush1.msra.mxu1 %v3566_v43  ;;  %3693 = vmatpush1.msra.mxu0 %v3568_v44  ;;  %v3856_v43 = vld [vmem:[#allocation9 + $0x248] sm:$0xff]  ;;  %v3791_v44 = vld [vmem:[#allocation9 + $0x40] sm:$0xff] }
 0x5f6   : > { %3623 = vmatprep.subr.mxu1 %v3563_v41  ;;  %3694 = vmatprep.subr.mxu0 %v3565_v45  ;;  %v3855_v41 = vld [vmem:[#allocation9 + $0x240] sm:$0xff]  ;;  %v3790_v45 = vld [vmem:[#allocation9 + $0x38] sm:$0xff] }
 0x5f7   : > { %3624 = vmatpush1.msra.mxu1 %v3562_v46  ;;  %3695 = vmatpush1.msra.mxu0 %v3564_v48  ;;  %v3854_v46 = vld [vmem:[#allocation9 + $0x238] sm:$0xff]  ;;  %v3789_v48 = vld [vmem:[#allocation9 + $0x30] sm:$0xff] }
 0x5f8   : > { %3625 = vmatprep.subr.mxu1 %v3559_v49  ;;  %3696 = vmatprep.subr.mxu0 %v3561_v50  ;;  %v3853_v49 = vld [vmem:[#allocation9 + $0x230] sm:$0xff]  ;;  %v3788_v50 = vld [vmem:[#allocation9 + $0x28] sm:$0xff] }
 0x5f9   : > { %3626 = vmatpush1.msra.mxu1 %v3558_v51  ;;  %3697 = vmatpush1.msra.mxu0 %v3560_v52  ;;  %v3852_v51 = vld [vmem:[#allocation9 + $0x228] sm:$0xff]  ;;  %v3787_v52 = vld [vmem:[#allocation9 + $0x20] sm:$0xff] }
 0x5fa   : > { %3627 = vmatprep.subr.mxu1 %v3555_v53  ;;  %3698 = vmatprep.subr.mxu0 %v3557_v54  ;;  %v3851_v53 = vld [vmem:[#allocation9 + $0x220] sm:$0xff]  ;;  %v3786_v54 = vld [vmem:[#allocation9 + $0x18] sm:$0xff] }
 0x5fb   : > { %3628 = vmatpush1.msra.mxu1 %v3554_v55  ;;  %3661 = vmatprep.mubr.f32.mxu1 %v5062_v4  ;;  %v3850_v55 = vld [vmem:[#allocation9 + $0x218] sm:$0xff] }
 0x5fc   : > { %3699 = vmatpush1.msra.mxu0 %v3556_v56  ;;  %3732 = vmatprep.mubr.f32.mxu0 %v5062_v4  ;;  %v3785_v56 = vld [vmem:[#allocation9 + $0x10] sm:$0xff] }
 0x5fd   : > { %4708 = vmatmul.mubr.msk.f32.vlgmr.msra.gmra.mxu1 %vm2882_vm5, %v3553_v57  ;;  %4709 = vmatmul.mubr.msk.f32.vlgmr.msra.gmra.mxu0 %vm2882_vm5, %v3553_v57  ;;  %v3849_v57 = vld [vmem:[#allocation9 + $0x210] sm:$0xff] }
 0x5fe   : > { %3923 = vmatprep.subr.mxu1 %v3814_v58  ;;  %3994 = vmatprep.subr.mxu0 %v3878_v59  ;;  %v3784_v58 = vld [vmem:[#allocation9 + $0x8] sm:$0xff] }
 0x5ff   : > { %3924 = vmatpush1.msra.mxu1 %v3813_v60  ;;  %3995 = vmatpush1.msra.mxu0 %v3877_v61  ;;  %v3848_v59 = vld [vmem:[#allocation9 + $0x208] sm:$0xff]  ;;  %v3783_v60 = vld [vmem:[#allocation9] sm:$0xff] }
 0x600   : > { %3925 = vmatprep.subr.mxu1 %v3812_v62  ;;  %3996 = vmatprep.subr.mxu0 %v3876_v0  ;;  %v3847_v61 = vld [vmem:[#allocation9 + $0x200] sm:$0xff]  ;;  %v3846_v62 = vld [vmem:[#allocation9 + $0x1f8] sm:$0xff] }
 0x601   : > { %3926 = vmatpush1.msra.mxu1 %v3811_v1  ;;  %3997 = vmatpush1.msra.mxu0 %v3875_v2  ;;  %v3910_v0 = vld [vmem:[#allocation9 + $0x3f8] sm:$0xff]  ;;  %v3845_v1 = vld [vmem:[#allocation9 + $0x1f0] sm:$0xff] }
 0x602   : > { %3927 = vmatprep.subr.mxu1 %v3810_v3  ;;  %3998 = vmatprep.subr.mxu0 %v3874_v6  ;;  %v3909_v2 = vld [vmem:[#allocation9 + $0x3f0] sm:$0xff]  ;;  %v3844_v3 = vld [vmem:[#allocation9 + $0x1e8] sm:$0xff] }
 0x603   : > { %3928 = vmatpush1.msra.mxu1 %v3809_v7  ;;  %3999 = vmatpush1.msra.mxu0 %v3873_v8  ;;  %v3908_v6 = vld [vmem:[#allocation9 + $0x3e8] sm:$0xff]  ;;  %v3843_v7 = vld [vmem:[#allocation9 + $0x1e0] sm:$0xff] }
 0x604   : > { %3929 = vmatprep.subr.mxu1 %v3808_v9  ;;  %4000 = vmatprep.subr.mxu0 %v3872_v10  ;;  %v3907_v8 = vld [vmem:[#allocation9 + $0x3e0] sm:$0xff]  ;;  %v3842_v9 = vld [vmem:[#allocation9 + $0x1d8] sm:$0xff] }
 0x605   : > { %3930 = vmatpush1.msra.mxu1 %v3807_v11  ;;  %4001 = vmatpush1.msra.mxu0 %v3871_v12  ;;  %v3906_v10 = vld [vmem:[#allocation9 + $0x3d8] sm:$0xff]  ;;  %v3841_v11 = vld [vmem:[#allocation9 + $0x1d0] sm:$0xff] }
 0x606   : > { %3931 = vmatprep.subr.mxu1 %v3806_v13  ;;  %4002 = vmatprep.subr.mxu0 %v3870_v14  ;;  %v3905_v12 = vld [vmem:[#allocation9 + $0x3d0] sm:$0xff]  ;;  %v3840_v13 = vld [vmem:[#allocation9 + $0x1c8] sm:$0xff] }
 0x607   : > { %3932 = vmatpush1.msra.mxu1 %v3805_v15  ;;  %4003 = vmatpush1.msra.mxu0 %v3869_v16  ;;  %v3904_v14 = vld [vmem:[#allocation9 + $0x3c8] sm:$0xff]  ;;  %v3839_v15 = vld [vmem:[#allocation9 + $0x1c0] sm:$0xff] }
 0x608   : > { %3933 = vmatprep.subr.mxu1 %v3804_v17  ;;  %4004 = vmatprep.subr.mxu0 %v3868_v18  ;;  %v3903_v16 = vld [vmem:[#allocation9 + $0x3c0] sm:$0xff]  ;;  %v3838_v17 = vld [vmem:[#allocation9 + $0x1b8] sm:$0xff] }
 0x609   : > { %3934 = vmatpush1.msra.mxu1 %v3803_v19  ;;  %4005 = vmatpush1.msra.mxu0 %v3867_v20  ;;  %v3902_v18 = vld [vmem:[#allocation9 + $0x3b8] sm:$0xff]  ;;  %v3837_v19 = vld [vmem:[#allocation9 + $0x1b0] sm:$0xff] }
 0x60a   : > { %3935 = vmatprep.subr.mxu1 %v3802_v21  ;;  %4006 = vmatprep.subr.mxu0 %v3866_v22  ;;  %v3901_v20 = vld [vmem:[#allocation9 + $0x3b0] sm:$0xff]  ;;  %v3836_v21 = vld [vmem:[#allocation9 + $0x1a8] sm:$0xff] }
 0x60b   : > { %3936 = vmatpush1.msra.mxu1 %v3801_v23  ;;  %4007 = vmatpush1.msra.mxu0 %v3865_v24  ;;  %v3900_v22 = vld [vmem:[#allocation9 + $0x3a8] sm:$0xff]  ;;  %v3835_v23 = vld [vmem:[#allocation9 + $0x1a0] sm:$0xff] }
 0x60c   : > { %3937 = vmatprep.subr.mxu1 %v3800_v25  ;;  %4008 = vmatprep.subr.mxu0 %v3864_v26  ;;  %v3899_v24 = vld [vmem:[#allocation9 + $0x3a0] sm:$0xff]  ;;  %v3834_v25 = vld [vmem:[#allocation9 + $0x198] sm:$0xff] }
 0x60d   : > { %3938 = vmatpush1.msra.mxu1 %v3799_v27  ;;  %4009 = vmatpush1.msra.mxu0 %v3863_v29  ;;  %v3898_v26 = vld [vmem:[#allocation9 + $0x398] sm:$0xff]  ;;  %v3833_v27 = vld [vmem:[#allocation9 + $0x190] sm:$0xff] }
 0x60e   : > { %3939 = vmatprep.subr.mxu1 %v3798_v30  ;;  %4010 = vmatprep.subr.mxu0 %v3862_v32  ;;  %v3897_v29 = vld [vmem:[#allocation9 + $0x390] sm:$0xff]  ;;  %v3832_v30 = vld [vmem:[#allocation9 + $0x188] sm:$0xff] }
 0x60f   : > { %3940 = vmatpush1.msra.mxu1 %v3797_v31  ;;  %4011 = vmatpush1.msra.mxu0 %v3861_v33  ;;  %v3896_v32 = vld [vmem:[#allocation9 + $0x388] sm:$0xff]  ;;  %v3831_v31 = vld [vmem:[#allocation9 + $0x180] sm:$0xff] }
 0x610   : > { %3941 = vmatprep.subr.mxu1 %v3796_v34  ;;  %4012 = vmatprep.subr.mxu0 %v3860_v35  ;;  %v3895_v33 = vld [vmem:[#allocation9 + $0x380] sm:$0xff]  ;;  %v3830_v34 = vld [vmem:[#allocation9 + $0x178] sm:$0xff] }
 0x611   : > { %3942 = vmatpush1.msra.mxu1 %v3795_v36  ;;  %4013 = vmatpush1.msra.mxu0 %v3859_v37  ;;  %v3894_v35 = vld [vmem:[#allocation9 + $0x378] sm:$0xff]  ;;  %v3829_v36 = vld [vmem:[#allocation9 + $0x170] sm:$0xff] }
 0x612   : > { %3943 = vmatprep.subr.mxu1 %v3794_v38  ;;  %4014 = vmatprep.subr.mxu0 %v3858_v39  ;;  %v3893_v37 = vld [vmem:[#allocation9 + $0x370] sm:$0xff]  ;;  %v3828_v38 = vld [vmem:[#allocation9 + $0x168] sm:$0xff] }
 0x613   : > { %3944 = vmatpush1.msra.mxu1 %v3793_v28  ;;  %4015 = vmatpush1.msra.mxu0 %v3857_v40  ;;  %v3892_v39 = vld [vmem:[#allocation9 + $0x368] sm:$0xff]  ;;  %v3827_v28 = vld [vmem:[#allocation9 + $0x160] sm:$0xff] }
 0x614   : > { %3945 = vmatprep.subr.mxu1 %v3792_v42  ;;  %4016 = vmatprep.subr.mxu0 %v3856_v43  ;;  %v3891_v40 = vld [vmem:[#allocation9 + $0x360] sm:$0xff]  ;;  %v3826_v42 = vld [vmem:[#allocation9 + $0x158] sm:$0xff] }
 0x615   : > { %3946 = vmatpush1.msra.mxu1 %v3791_v44  ;;  %4017 = vmatpush1.msra.mxu0 %v3855_v41  ;;  %v3890_v43 = vld [vmem:[#allocation9 + $0x358] sm:$0xff]  ;;  %v3825_v44 = vld [vmem:[#allocation9 + $0x150] sm:$0xff] }
 0x616   : > { %3947 = vmatprep.subr.mxu1 %v3790_v45  ;;  %4018 = vmatprep.subr.mxu0 %v3854_v46  ;;  %v3889_v41 = vld [vmem:[#allocation9 + $0x350] sm:$0xff]  ;;  %v3824_v45 = vld [vmem:[#allocation9 + $0x148] sm:$0xff] }
 0x617   : > { %3948 = vmatpush1.msra.mxu1 %v3789_v48  ;;  %4019 = vmatpush1.msra.mxu0 %v3853_v49  ;;  %v3888_v46 = vld [vmem:[#allocation9 + $0x348] sm:$0xff]  ;;  %v3823_v48 = vld [vmem:[#allocation9 + $0x140] sm:$0xff] }
 0x618   : > { %3949 = vmatprep.subr.mxu1 %v3788_v50  ;;  %4020 = vmatprep.subr.mxu0 %v3852_v51  ;;  %v3887_v49 = vld [vmem:[#allocation9 + $0x340] sm:$0xff]  ;;  %v3822_v50 = vld [vmem:[#allocation9 + $0x138] sm:$0xff] }
 0x619   : > { %3950 = vmatpush1.msra.mxu1 %v3787_v52  ;;  %4021 = vmatpush1.msra.mxu0 %v3851_v53  ;;  %v3886_v51 = vld [vmem:[#allocation9 + $0x338] sm:$0xff]  ;;  %v3821_v52 = vld [vmem:[#allocation9 + $0x130] sm:$0xff] }
 0x61a   : > { %3951 = vmatprep.subr.mxu1 %v3786_v54  ;;  %4022 = vmatprep.subr.mxu0 %v3850_v55  ;;  %v3885_v53 = vld [vmem:[#allocation9 + $0x330] sm:$0xff]  ;;  %v3820_v54 = vld [vmem:[#allocation9 + $0x128] sm:$0xff] }
 0x61b   : > { %3952 = vmatpush1.msra.mxu1 %v3785_v56  ;;  %4023 = vmatpush1.msra.mxu0 %v3849_v57  ;;  %v3884_v55 = vld [vmem:[#allocation9 + $0x328] sm:$0xff]  ;;  %v3819_v56 = vld [vmem:[#allocation9 + $0x120] sm:$0xff] }
 0x61c   : > { %3953 = vmatprep.subr.mxu1 %v3784_v58  ;;  %4024 = vmatprep.subr.mxu0 %v3848_v59  ;;  %v3883_v57 = vld [vmem:[#allocation9 + $0x320] sm:$0xff]  ;;  %v3818_v58 = vld [vmem:[#allocation9 + $0x118] sm:$0xff] }
 0x61d   : > { %3954 = vmatpush1.msra.mxu1 %v3783_v60  ;;  %4025 = vmatpush1.msra.mxu0 %v3847_v61  ;;  %v3882_v59 = vld [vmem:[#allocation9 + $0x318] sm:$0xff]  ;;  %v3817_v60 = vld [vmem:[#allocation9 + $0x110] sm:$0xff] }
 0x61e   : > { %3955 = vmatprep.subr.mxu1 %v3846_v62  ;;  %4026 = vmatprep.subr.mxu0 %v3910_v0  ;;  %v3881_v61 = vld [vmem:[#allocation9 + $0x310] sm:$0xff]  ;;  %v3816_v62 = vld [vmem:[#allocation9 + $0x108] sm:$0xff] }
 0x61f   : > { %3956 = vmatpush2.msra.mxu1 %v3845_v1  ;;  %4027 = vmatpush2.msra.mxu0 %v3909_v2  ;;  %v3880_v0 = vld [vmem:[#allocation9 + $0x308] sm:$0xff]  ;;  %v3815_v1 = vld [vmem:[#allocation9 + $0x100] sm:$0xff] }
 0x620   : > { %3957 = vmatprep.subr.mxu1 %v3844_v3  ;;  %4028 = vmatprep.subr.mxu0 %v3908_v6  ;;  %v3879_v2 = vld [vmem:[#allocation9 + $0x300] sm:$0xff] }
 0x621   : > { %3958 = vmatpush2.msra.mxu1 %v3843_v7  ;;  %4029 = vmatpush2.msra.mxu0 %v3907_v8  ;;  %v4104_v3 = vld [vmem:[%s7035_s18 + $0xf8] sm:$0xff] }
 0x622   : > { %3959 = vmatprep.subr.mxu1 %v3842_v9  ;;  %4030 = vmatprep.subr.mxu0 %v3906_v10 }
 0x623   : > { %3960 = vmatpush2.msra.mxu1 %v3841_v11  ;;  %4031 = vmatpush2.msra.mxu0 %v3905_v12 }
 0x624   : > { %3961 = vmatprep.subr.mxu1 %v3840_v13  ;;  %4032 = vmatprep.subr.mxu0 %v3904_v14 }
 0x625   : > { %3962 = vmatpush2.msra.mxu1 %v3839_v15  ;;  %4033 = vmatpush2.msra.mxu0 %v3903_v16 }
 0x626   : > { %3963 = vmatprep.subr.mxu1 %v3838_v17  ;;  %4034 = vmatprep.subr.mxu0 %v3902_v18 }
 0x627   : > { %3964 = vmatpush2.msra.mxu1 %v3837_v19  ;;  %4035 = vmatpush2.msra.mxu0 %v3901_v20  ;;  %v3755_v20 = vsub.s32 2, %v5549_v47 }
 0x628   : > { %3965 = vmatprep.subr.mxu1 %v3836_v21  ;;  %4036 = vmatprep.subr.mxu0 %v3900_v22 }
 0x629   : > { %3966 = vmatpush2.msra.mxu1 %v3835_v23  ;;  %4037 = vmatpush2.msra.mxu0 %v3899_v24  ;;  %v3743_v23 = vld [vmem:[%s7032_s15] sm:$0xf]  ;;  %v3759_v24 = vsub.s32 3, %v5549_v47 }
 0x62a   : > { %3967 = vmatprep.subr.mxu1 %v3834_v25  ;;  %4038 = vmatprep.subr.mxu0 %v3898_v26 }
 0x62b   : > { %3968 = vmatpush2.msra.mxu1 %v3833_v27  ;;  %4039 = vmatpush2.msra.mxu0 %v3897_v29 }
 0x62c   : > { %3969 = vmatprep.subr.mxu1 %v3832_v30  ;;  %4040 = vmatprep.subr.mxu0 %v3896_v32 }
 0x62d   : > { %3970 = vmatpush2.msra.mxu1 %v3831_v31  ;;  %4041 = vmatpush2.msra.mxu0 %v3895_v33  ;;  %v3748_v31 = vrot.slane %v3743_v23, %v5552_v63  ;;  %v3756_v33 = vrot.slane %v3743_v23, %v3755_v20  ;;  %v4094_v20 = vld [vmem:[%s7035_s18 + $0xa8] sm:$0xff] }
 0x62e   : > { %3971 = vmatprep.subr.mxu1 %v3830_v34  ;;  %4042 = vmatprep.subr.mxu0 %v3894_v35 }
 0x62f   : > { %3972 = vmatpush2.msra.mxu1 %v3829_v36  ;;  %4043 = vmatpush2.msra.mxu0 %v3893_v37 }
 0x630   : > { %3973 = vmatprep.subr.mxu1 %v3828_v38  ;;  %4044 = vmatprep.subr.mxu0 %v3892_v39 }
 0x631   : > { %3974 = vmatpush2.msra.mxu1 %v3827_v28  ;;  %4045 = vmatpush2.msra.mxu0 %v3891_v40  ;;  %v3752_v28 = vrot.slane %v3743_v23, %v5558_v5  ;;  %v3760_v40 = vrot.slane %v3743_v23, %v3759_v24  ;;  %v4077_v23 = vld [vmem:[%s7035_s18 + $0x20] sm:$0xff]  ;;  %v4092_v24 = vld [vmem:[%s7035_s18 + $0x98] sm:$0xff] }
 0x632   : > { %3975 = vmatprep.subr.mxu1 %v3826_v42  ;;  %4046 = vmatprep.subr.mxu0 %v3890_v43 }
 0x633   : > { %3976 = vmatpush2.msra.mxu1 %v3825_v44  ;;  %4047 = vmatpush2.msra.mxu0 %v3889_v41  ;;  %v3774_v41 = vstv %s4710_s3  ;;  %s4377_s3 = sshll.u32 %s804_s1, 4  ;;  %s4378_s3 = int_to_ptr.vmem [resolvable:$true] %s4377_s3 }
 0x634   : > { %3977 = vmatprep.subr.mxu1 %v3824_v45  ;;  %4048 = vmatprep.subr.mxu0 %v3888_v46 }
 0x635   : > { %3978 = vmatpush2.msra.mxu1 %v3823_v48  ;;  %4049 = vmatpush2.msra.mxu0 %v3887_v49 }
 0x636   : > { %3979 = vmatprep.subr.mxu1 %v3822_v50  ;;  %4050 = vmatprep.subr.mxu0 %v3886_v51 }
 0x637   : > { %3980 = vmatpush2.msra.mxu1 %v3821_v52  ;;  %4051 = vmatpush2.msra.mxu0 %v3885_v53 }
 0x638   : > { %3981 = vmatprep.subr.mxu1 %v3820_v54  ;;  %4052 = vmatprep.subr.mxu0 %v3884_v55 }
 0x639   : > { %3982 = vmatpush2.msra.mxu1 %v3819_v56  ;;  %4053 = vmatpush2.msra.mxu0 %v3883_v57 }
 0x63a   : > { %3983 = vmatprep.subr.mxu1 %v3818_v58  ;;  %4054 = vmatprep.subr.mxu0 %v3882_v59 }
 0x63b   : > { %3984 = vmatpush2.msra.mxu1 %v3817_v60  ;;  %4055 = vmatpush2.msra.mxu0 %v3881_v61  ;;  %v4088_v60 = vld [vmem:[%s7035_s18 + $0x78] sm:$0xff] }
 0x63c   : > { %3985 = vmatprep.subr.mxu1 %v3816_v62  ;;  %4056 = vmatprep.subr.mxu0 %v3880_v0  ;;  %v4103_v0 = vld [vmem:[%s7035_s18 + $0xf0] sm:$0xff] }
 0x63d   : > { %3986 = vmatpush2.msra.mxu1 %v3815_v1  ;;  %4057 = vmatpush2.msra.mxu0 %v3879_v2  ;;  %v4087_v1 = vld [vmem:[%s7035_s18 + $0x70] sm:$0xff]  ;;  %v4102_v2 = vld [vmem:[%s7035_s18 + $0xe8] sm:$0xff] }
 0x63e   : > { %4767 = vmatprep.subr.mxu0 %v5062_v4  ;;  %4721 = vmatprep.subr.mxu1 %v4104_v3  ;;  %v4086_v3 = vld [vmem:[%s7035_s18 + $0x68] sm:$0xff] }
 0x666   : > { %v2952_v6 = vpop.f32.mrf.mxu1  ;;  %v3023_v7 = vpop.f32.mrf.mxu0 }
 0x668   : > { %v2954_v8 = vpop.f32.mrf.mxu1  ;;  %v3025_v9 = vpop.f32.mrf.mxu0 }
 0x67b   : > { %v3097_v10 = vpop.f32.mrf.mxu1  ;;  %v3168_v11 = vpop.f32.mrf.mxu0 }
 0x67c   : > { %v3098_v21 = vadd.f32 %v3097_v10, %v2952_v6  ;;  %v3169_v22 = vadd.f32 %v3168_v11, %v3023_v7  ;;  %v4101_v6 = vld [vmem:[%s7035_s18 + $0xe0] sm:$0xff]  ;;  %v4099_v10 = vld [vmem:[%s7035_s18 + $0xd0] sm:$0xff] }
 0x67d   : > { %v3099_v12 = vpop.f32.mrf.mxu1  ;;  %v3170_v13 = vpop.f32.mrf.mxu0  ;;  %v4085_v7 = vld [vmem:[%s7035_s18 + $0x60] sm:$0xff]  ;;  %v4083_v11 = vld [vmem:[%s7035_s18 + $0x50] sm:$0xff] }
 0x67e   : > { %v3100_v25 = vadd.f32 %v3099_v12, %v2954_v8  ;;  %v3171_v26 = vadd.f32 %v3170_v13, %v3025_v9  ;;  %v4100_v8 = vld [vmem:[%s7035_s18 + $0xd8] sm:$0xff]  ;;  %v4098_v12 = vld [vmem:[%s7035_s18 + $0xc8] sm:$0xff] }
 0x67f   : > { %v4084_v9 = vld [vmem:[%s7035_s18 + $0x58] sm:$0xff]  ;;  %v4082_v13 = vld [vmem:[%s7035_s18 + $0x48] sm:$0xff] }
 0x691   : > { %v3283_v14 = vpop.f32.mrf.mxu1  ;;  %v3354_v15 = vpop.f32.mrf.mxu0 }
 0x692   : > { %v3359_v27 = vadd.f32 %v3283_v14, %v3098_v21  ;;  %v3361_v29 = vadd.f32 %v3354_v15, %v3169_v22  ;;  %v4097_v14 = vld [vmem:[%s7035_s18 + $0xc0] sm:$0xff]  ;;  %v4078_v21 = vld [vmem:[%s7035_s18 + $0x28] sm:$0xff] }
 0x693   : > { %v3285_v16 = vpop.f32.mrf.mxu1  ;;  %v3356_v17 = vpop.f32.mrf.mxu0  ;;  %v4081_v15 = vld [vmem:[%s7035_s18 + $0x40] sm:$0xff] }
 0x694   : > { %v3360_v34 = vadd.f32 %v3285_v16, %v3100_v25  ;;  %v3362_v35 = vadd.f32 %v3356_v17, %v3171_v26  ;;  %v4096_v16 = vld [vmem:[%s7035_s18 + $0xb8] sm:$0xff]  ;;  %v4093_v22 = vld [vmem:[%s7035_s18 + $0xa0] sm:$0xff]  ;;  %v4091_v26 = vld [vmem:[%s7035_s18 + $0x90] sm:$0xff] }
 0x695   : > { %v4080_v17 = vld [vmem:[%s7035_s18 + $0x38] sm:$0xff] }
 0x696   : > { %v4076_v25 = vld [vmem:[%s7035_s18 + $0x18] sm:$0xff] }
 0x6a7   : > { %v3473_v18 = vpop.f32.mrf.mxu1  ;;  %v3544_v19 = vpop.f32.mrf.mxu0 }
 0x6a8   : > { %v3549_v36 = vadd.f32 %v3473_v18, %v3359_v27  ;;  %v3551_v37 = vadd.f32 %v3544_v19, %v3361_v29  ;;  %v4095_v18 = vld [vmem:[%s7035_s18 + $0xb0] sm:$0xff]  ;;  %v4090_v29 = vld [vmem:[%s7035_s18 + $0x88] sm:$0xff] }
 0x6a9   : > { %v3475_v30 = vpop.f32.mrf.mxu1  ;;  %v3546_v32 = vpop.f32.mrf.mxu0  ;;  %v4079_v19 = vld [vmem:[%s7035_s18 + $0x30] sm:$0xff] }
 0x6aa   : > { %v3550_v42 = vadd.f32 %v3475_v30, %v3360_v34  ;;  %v3552_v47 = vadd.f32 %v3546_v32, %v3362_v35  ;;  %v4075_v27 = vld [vmem:[%s7035_s18 + $0x10] sm:$0xff]  ;;  %v4074_v30 = vld [vmem:[%s7035_s18 + $0x8] sm:$0xff]  ;;  %v4089_v32 = vld [vmem:[%s7035_s18 + $0x80] sm:$0xff] }
 0x6ab   : > { %v4187_v34 = vld [vmem:[%s7037_s20 + $0x30] sm:$0xff]  ;;  %v4186_v35 = vld [vmem:[%s7037_s20 + $0x28] sm:$0xff] }
 0x6bd   : > { %v3663_v38 = vpop.f32.mrf.mxu1  ;;  %v3734_v39 = vpop.f32.mrf.mxu0 }
 0x6be   : > { %v3739_v43 = vadd.f32 %v3663_v38, %v3549_v36  ;;  %v3741_v44 = vadd.f32 %v3734_v39, %v3551_v37  ;;  %v3911_v36 = vld [vmem:[%s7034_s17] sm:$0x3] }
 0x6bf   : > { %v3665_v45 = vpop.f32.mrf.mxu1  ;;  %v3736_v46 = vpop.f32.mrf.mxu0  ;;  %v3916_v37 = vrot.slane %v3911_v36, %v5552_v63  ;;  %v3920_v38 = vrot.slane %v3911_v36, %v5558_v5  ;;  %v4185_v63 = vld [vmem:[%s7037_s20 + $0x20] sm:$0xff]  ;;  %v4184_v5 = vld [vmem:[%s7037_s20 + $0x18] sm:$0xff] }
 0x6c0   : > { %v3765_v48 = vadd.f32 %v3748_v31, %v3739_v43  ;;  %v3767_v49 = vadd.f32 %v3756_v33, %v3741_v44  ;;  %v3740_v50 = vadd.f32 %v3665_v45, %v3550_v42  ;;  %v3742_v51 = vadd.f32 %v3736_v46, %v3552_v47  ;;  %v4073_v31 = vld [vmem:[%s7035_s18] sm:$0xff]  ;;  %v4188_v33 = vld [vmem:[%s7037_s20 + $0x38] sm:$0xff] }
 0x6c1   : > { %v4068_v43 = vstv %s4711_s6  ;;  %s4951_s6 = scalar_lea.vmem %s4378_s3, 16 }
 0x6c2   : > { %v3766_v52 = vadd.f32 %v3752_v28, %v3740_v50  ;;  %v3768_v53 = vadd.f32 %v3760_v40, %v3742_v51  ;;  %v3775_v54 = vmul.f32 %v3774_v41, %v3765_v48  ;;  %v3777_v55 = vmul.f32 %v3774_v41, %v3767_v49  ;;  %v4183_v51 = vld [vmem:[%s7037_s20 + $0x10] sm:$0xff]  ;;  %p4952_p9 = scmp.ne.s32.totalorder %s4378_s3, %s4951_s6 }
 0x6c3   : > { %vm3770_vm6 = vcmp.ge.f32.partialorder %v3765_v48, 0.0  ;;  %vm3772_vm7 = vcmp.ge.f32.partialorder %v3767_v49, 0.0 }
 0x6c4   : > { %vm3771_vm8 = vcmp.ge.f32.partialorder %v3766_v52, 0.0  ;;  %v3776_v56 = vmul.f32 %v3774_v41, %v3766_v52  ;;  %vm3773_vm9 = vcmp.ge.f32.partialorder %v3768_v53, 0.0  ;;  %v3778_v57 = vmul.f32 %v3774_v41, %v3768_v53  ;;  %p4953_p7 = pnand %p4952_p9, %p5234_p5 }
 0x6c5   : > { %v3779_v61 = vsel %vm3770_vm6, %v3765_v48, %v3775_v54  ;;  %v3781_v62 = vsel %vm3772_vm7, %v3767_v49, %v3777_v55  ;;  %v4105_v55 = vld [vmem:[%s7036_s19] sm:$0x1] }
 0x6c6   : > { %v3780_v58 = vsel %vm3771_vm8, %v3766_v52, %v3776_v56  ;;  %v3782_v59 = vsel %vm3773_vm9, %v3768_v53, %v3778_v57  ;;  %v4182_v52 = vld [vmem:[%s7037_s20 + $0x8] sm:$0xff]  ;;  %v4181_v53 = vld [vmem:[%s7037_s20] sm:$0xff]  ;;  %p4954_p6 = pneg %p4953_p7 }
 0x6c7   : > { %3987 = vmatprep.mubr.f32.mxu1 %v3780_v58  ;;  %4058 = vmatprep.mubr.f32.mxu0 %v3782_v59  ;;  %v4178_v58 = vstv %s4712_s0  ;;  %s5064_s0 = smov [#allocation11]  }
 0x6c8   : > { %3988 = vmatmul.mubr.f32.vlgmr.msra.gmra.mxu1 %v3779_v61  ;;  %4059 = vmatmul.mubr.f32.vlgmr.msra.gmra.mxu0 %v3781_v62  ;;  %v4189_v62 = vld [vmem:[%s7038_s21] sm:$0x1]  ;;  %s4955_s9 = sshll.u32 %s5064_s0, 4  ;;  %s4956_s9 = int_to_ptr.vmem [resolvable:$false] %s4955_s9 }
 0x6c9   : > { %4722 = vmatpush3.msra.mxu1 %v4088_v60  ;;  %4768 = vmatpush3.msra.mxu0 %v4188_v33  ;;  %s4957_s10 = scalar_lea.vmem %s4956_s9, 32  ;;  %p4958_p8 = scmp.lt.s32.totalorder %s4378_s3, %s4956_s9 }
 0x6ca   : > { %4723 = vmatprep.subr.mxu1 %v4103_v0  ;;  %4769 = vmatprep.subr.mxu0 %v5062_v4  ;;  %p4959_p11 = scmp.lt.s32.totalorder %s4957_s10, %s4951_s6 }
 0x6cb   : > { %4724 = vmatpush3.msra.mxu1 %v4087_v1  ;;  %4770 = vmatpush3.msra.mxu0 %v4187_v34 }
 0x6cc   : > { %4725 = vmatprep.subr.mxu1 %v4102_v2  ;;  %4771 = vmatprep.subr.mxu0 %v5062_v4  ;;  %p4960_p13 = por %p4959_p11, %p4958_p8 }
 0x6cd   : > { %4726 = vmatpush3.msra.mxu1 %v4086_v3  ;;  %4772 = vmatpush3.msra.mxu0 %v4186_v35  ;;  %v4267_v3 = vld [vmem:[%s7040_s23] sm:$0x1] }
 0x6ce   : > { %4727 = vmatprep.subr.mxu1 %v4101_v6  ;;  %4773 = vmatprep.subr.mxu0 %v5062_v4  ;;  %p4961_p1 = pnand %p4960_p13, %p4954_p6 }
 0x6cf   : > { %4728 = vmatpush3.msra.mxu1 %v4085_v7  ;;  %4774 = vmatpush3.msra.mxu0 %v4185_v63 }
 0x6d0   : > { %4729 = vmatprep.subr.mxu1 %v4100_v8  ;;  %4775 = vmatprep.subr.mxu0 %v5062_v4 }
 0x6d1   : > { %4730 = vmatpush3.msra.mxu1 %v4084_v9  ;;  %4776 = vmatpush3.msra.mxu0 %v4184_v5 }
 0x6d2   : > { %4731 = vmatprep.subr.mxu1 %v4099_v10  ;;  %4777 = vmatprep.subr.mxu0 %v5062_v4 }
 0x6d3   : > { %4732 = vmatpush3.msra.mxu1 %v4083_v11  ;;  %4778 = vmatpush3.msra.mxu0 %v4183_v51 }
 0x6d4   : > { %4733 = vmatprep.subr.mxu1 %v4098_v12  ;;  %4779 = vmatprep.subr.mxu0 %v5062_v4 }
 0x6d5   : > { %4734 = vmatpush3.msra.mxu1 %v4082_v13  ;;  %4780 = vmatpush3.msra.mxu0 %v4182_v52 }
 0x6d6   : > { %4735 = vmatprep.subr.mxu1 %v4097_v14  ;;  %4783 = vmatprep.mubr.msk.f32.mxu0 %vm5063_vm12, %v5062_v4 }
 0x6d7   : > { %4736 = vmatpush3.msra.mxu1 %v4081_v15  ;;  %4781 = vmatprep.subr.mxu0 %v5062_v4 }
 0x6d8   : > { %4737 = vmatprep.subr.mxu1 %v4096_v16  ;;  %4782 = vmatpush3.msra.mxu0 %v4181_v53 }
 0x6d9   : > { %4738 = vmatpush3.msra.mxu1 %v4080_v17 }
 0x6da   : > { %4739 = vmatprep.subr.mxu1 %v4095_v18 }
 0x6db   : > { %4740 = vmatpush3.msra.mxu1 %v4079_v19 }
 0x6dc   : > { %4741 = vmatprep.subr.mxu1 %v4094_v20 }
 0x6dd   : > { %4742 = vmatpush3.msra.mxu1 %v4078_v21 }
 0x6de   : > { %4743 = vmatprep.subr.mxu1 %v4093_v22 }
 0x6df   : > { %4744 = vmatpush3.msra.mxu1 %v4077_v23 }
 0x6e0   : > { %4745 = vmatprep.subr.mxu1 %v4092_v24 }
 0x6e1   : > { %4746 = vmatpush3.msra.mxu1 %v4076_v25 }
 0x6e2   : > { %4747 = vmatprep.subr.mxu1 %v4091_v26 }
 0x6e3   : > { %4748 = vmatpush3.msra.mxu1 %v4075_v27 }
 0x6e4   : > { %4749 = vmatprep.subr.mxu1 %v4090_v29 }
 0x6e5   : > { %4750 = vmatpush3.msra.mxu1 %v4074_v30 }
 0x6e6   : > { %4751 = vmatprep.subr.mxu1 %v4089_v32 }
 0x6e7   : > { %4752 = vmatpush3.msra.mxu1 %v4073_v31 }
 0x6e8   : > { %4786 = vmatprep.subr.mxu1 %v5062_v4 }
 0x788   : > { %v3989_v39 = vpop.f32.mrf.mxu1  ;;  %v4060_v28 = vpop.f32.mrf.mxu0 }
 0x789   : > { %v3990_v40 = vadd.f32 %v3989_v39, %v3916_v37 }
 0x78a   : > { %v3991_v42 = vpop.f32.mrf.mxu1  ;;  %v4062_v41 = vpop.f32.mrf.mxu0 }
 0x78b   : > { %v4061_v47 = vadd.f32 %v4060_v28, %v3990_v40  ;;  %v3992_v44 = vadd.f32 %v3991_v42, %v3920_v38 }
 0x78d   : > { %v4063_v45 = vadd.f32 %v4062_v41, %v3992_v44  ;;  %v4069_v46 = vmul.f32 %v4068_v43, %v4061_v47  ;;  %vm4066_vm10 = vcmp.ge.f32.partialorder %v4061_v47, 0.0 }
 0x78f   : > { %v4070_v48 = vmul.f32 %v4068_v43, %v4063_v45  ;;  %vm4067_vm11 = vcmp.ge.f32.partialorder %v4063_v45, 0.0  ;;  %v4071_v50 = vsel %vm4066_vm10, %v4061_v47, %v4069_v46 }
 0x791   : > { %v4072_v49 = vsel %vm4067_vm11, %v4063_v45, %v4070_v48 }
 0x792   : > { %4170 = vmatprep.mubr.f32.mxu1 %v4072_v49 }
 0x793   : > { %4171 = vmatmul.mubr.f32.vlgmr.msra.gmra.mxu1 %v4071_v50 }
 0x794   : > { %4788 = vmatprep.mubr.msk.f32.mxu1 %vm5063_vm12, %v5062_v4  ;;  %v4266_v4 = vld [vmem:[%s7039_s22] sm:$0x7] }
 0x795   : > { %4787 = vmatpush3.msk.msra.mxu1 %vm4272_vm15, %v4266_v4 }
 0x853   : > { %v4753_v54 = vpop.f32.mrf.mxu1 }
 0x855   : > { %v4754_v56 = vpop.f32.mrf.mxu1 }
 0x856   : > { %v4755_v57 = vadd.f32 %v4754_v56, %v4753_v54 }
 0x858   : > { %v4173_v59 = vadd.f32 %v4755_v57, %v4105_v55 }
 0x85a   : > { %vm4177_vm13 = vcmp.ge.f32.partialorder %v4173_v59, 0.0  ;;  %v4179_v60 = vmul.f32 %v4178_v58, %v4173_v59 }
 0x85c   : > { %v4180_v61 = vsel %vm4177_vm13, %v4173_v59, %v4179_v60 }
 0x85d   : > { %4784 = vmatmul.mubr.msk.f32.vlgmr.msra.gmra.mxu0 %vm4190_vm14, %v4180_v61 }
 0x91d   : > { %v4260_v0 = vpop.f32.mrf.mxu0 }
 0x91e   : > { %v4261_v1 = vadd.f32 %v4260_v0, %v4189_v62 }
 0x91f   : > { %v4785_v2 = vpop.f32.mrf.mxu0 }
 0x920   : > { %4789 = vmatmul.mubr.msk.f32.vlgmr.msra.gmra.mxu1 %vm4268_vm1, %v4261_v1  ;;  %4265 = vst.msk [vmem:[%s804_s1] sm:$0x1] %vm4264_vm2, %v4261_v1 }
 0x9e0   : > { %v4342_v6 = vpop.f32.mrf.mxu1 }
 0x9e1   : > { %v4343_v7 = vadd.f32 %v4342_v6, %v4267_v3 }
 0x9e2   : > { %v4790_v8 = vpop.f32.mrf.mxu1 }
 0x9e3   : > { %v4347_v9 = vsel %vm4346_vm3, %v4343_v7, -inf }
 0x9e4   : > { %4348 = vmax.xlane.f32.xlu0 %v4347_v9 }
 0xa6d   : > { %v4349_v10 = vpop.xlane.xlu0 %4348 }
 0xa6e   : > { %v4350_v11 = vsub.f32 %v4343_v7, %v4349_v10 }
 0xa70   : > { %v4351_v12 = vmul.f32 1.442695, %v4350_v11 }
 0xa72   : > { %4880 = vpow2.f32 %v4351_v12 }
 0xa7f   : > { %v4881_v13 = vpop.eup %4880 }
 0xa80   : > { %v4353_v14 = vsel %vm4346_vm3, %v4881_v13, 0.0 }
 0xa81   : > { %4354 = vadd.xlane.f32.xlu0 %v4353_v14 }
 0xa82   : > { %4964 = shalt.err (!%p4961_p1)
}
 0xa83   : > { %s4965_s11 = scalar_lea.hbm %s4375_s8, 16  ;;  %s4969_s28 = scalar_lea.hbm %s7041_s24, 32 }
 0xa84   : > { %p4966_p0 = scmp.ne.s32.totalorder %s4375_s8, %s4965_s11  ;;  %p4970_p4 = scmp.lt.s32.totalorder %s4375_s8, %s7041_s24 }
 0xa85   : > { %p4971_p12 = scmp.lt.s32.totalorder %s4969_s28, %s4965_s11 }
 0xa86   : > { %p4967_p3 = pnand %p4966_p0, %p5234_p5 }
 0xa87   : > { %p4972_p10 = por %p4971_p12, %p4970_p4 }
 0xa88   : > { %p4968_p2 = pneg %p4967_p3 }
 0xa8a   : > { %p4973_p9 = pnand %p4972_p10, %p4968_p2 }
 0xa8c   : > { %4976 = shalt.err (!%p4973_p9)
}
 0xa8d   : > { %4811 = dma.vmem_to_hbm [thread:$0]  (%p5234_p5), %s4378_s3, 16, %s4375_s8, %s4361_s13  }
 0xa8e   : > { %s810_s10 = scalar_lea.vmem [#allocation12], %s6950_s29  ;;  %s7110_s12 = sshll.u32 %s5217_s7, 4 }
 0xa8f   : > { %s4390_s9 = sshll.u32 %s810_s10, 4  ;;  %s7111_s6 = sld [smem:[#allocation39_spill]]  ;;  %s4391_s9 = int_to_ptr.vmem [resolvable:$true] %s4390_s9 }
 0xa90   : > { %s4365_s30 = scalar_lea.sflag [#allocation13], %s6950_s29  ;;  %s4977_s28 = scalar_lea.vmem %s4391_s9, 16 }
 0xa91   : > { %p4978_p7 = scmp.ne.s32.totalorder %s4391_s9, %s4977_s28  ;;  %s5065_s8 = smov [#allocation12]  }
 0xa92   : > { %s4981_s3 = sshll.u32 %s5065_s8, 4  ;;  %s4982_s3 = int_to_ptr.vmem [resolvable:$false] %s4981_s3 }
 0xa93   : > { %p4979_p6 = pnand %p4978_p7, %p5234_p5  ;;  %s4983_s13 = scalar_lea.vmem %s4982_s3, 32 }
 0xa94   : > { %p4984_p11 = scmp.lt.s32.totalorder %s4391_s9, %s4982_s3  ;;  %p4985_p13 = scmp.lt.s32.totalorder %s4983_s13, %s4977_s28 }
 0xa95   : > { %s7112_s0 = smov %s7111_s6  ;;  %s4388_s1 = scalar_lea.hbm %s7111_s6, %s7110_s12 }
 0xa96   : > { %p4980_p8 = pneg %p4979_p6  ;;  %p4986_p1 = por %p4985_p13, %p4984_p11 }
 0xa98   : > { %p4987_p0 = pnand %p4986_p1, %p4980_p8 }
 0xb0a   : > { %v4355_v15 = vpop.xlane.xlu0 %4354 }
 0xb0b   : > { %4882 = vlog2.f32 %v4355_v15 }
 0xb18   : > { %v4883_v16 = vpop.eup %4882 }
 0xb19   : > { %v4357_v17 = vmul.f32 0.6931472, %v4883_v16 }
 0xb1b   : > { %v4358_v18 = vsub.f32 %v4350_v11, %v4357_v17 }
 0xb1d   : > { %4359 = vst.msk [vmem:[%s810_s10] sm:$0x1] %vm4346_vm3, %v4358_v18 }
 0xb1e   : > { %4990 = shalt.err (!%p4987_p0)
}
 0xb1f   : > { %s4991_s7 = scalar_lea.hbm %s4388_s1, 16  ;;  %s4995_s12 = scalar_lea.hbm %s7112_s0, 32 }
 0xb20   : > { %p4992_p3 = scmp.ne.s32.totalorder %s4388_s1, %s4991_s7  ;;  %p4996_p12 = scmp.lt.s32.totalorder %s4388_s1, %s7112_s0 }
 0xb21   : > { %p4997_p10 = scmp.lt.s32.totalorder %s4995_s12, %s4991_s7 }
 0xb22   : > { %p4993_p2 = pnand %p4992_p3, %p5234_p5 }
 0xb23   : > { %p4998_p9 = por %p4997_p10, %p4996_p12 }
 0xb24   : > { %p4994_p4 = pneg %p4993_p2 }
 0xb26   : > { %p4999_p7 = pnand %p4998_p9, %p4994_p4 }
 0xb28   : > { %5002 = shalt.err (!%p4999_p7)
}
 0xb29   : > { %4812 = dma.vmem_to_hbm [thread:$0]  (%p5234_p5), %s4391_s9, 16, %s4388_s1, %s4365_s30  }
 0xb2a PF: > { %s7113_s6 = sld [smem:[#allocation21_spill]] }
 0xb2b   : > { %s7114_s28 = sld [smem:[#allocation19_spill]] }
 0xb2c   : > { %s7115_s8 = sld [smem:[#allocation24_spill]] }
 0xb30   : > { %p4838_p6 = scmp.ge.s32.totalorder %s7113_s6, 2 }
 0xb31   : > { %s4402_s3 = sand.u32 1, %s7114_s28  }
 0xb32   : > { %p7116_p8 = scmp.ne.s32.totalorder %s7115_s8, 0  ;;  %s4403_s13 = scalar_lea.sflag [#allocation6], %s4402_s3 }
 0xb34   : > { %p4826_p11 = pnand %p4838_p6, %p7116_p8 }
 0xb36   : > { %p4827_p13 = pneg %p4826_p11 }
 0xb38   : > { %5032 = dma.done.wait (%p4827_p13), %s4403_s13, 16  }
 0xb39   : > { %5034 = vsyncadd (%p4827_p13), %s4403_s13, 4294967280  ;;  %s4411_s29 = scalar_lea.sflag [#allocation13], %s4402_s3 }
 0xb3a   : > { %5036 = dma.done.wait (%p4827_p13), %s4411_s29, 16  }
 0xb3b   : > { %5038 = vsyncadd (%p4827_p13), %s4411_s29, 4294967280  ;;  %s7117_s30 = sld [smem:[#allocation22_spill]]  ;;  %s7120_s29 = smov %s5045_s2 }
 0xb3c   : > { %s7118_s7 = sld [smem:[#allocation20_spill]] }
 0xb3d   : > { %s7119_s6 = sld [smem:[#allocation23_spill]] }
 0xb41   : > { %p42_p5 = scmp.ge.s32.totalorder %s7117_s30, 4  }
 0xb42   : > { %s7121_s2 = smov %s7118_s7 }
 0xb43   :  { %44 = sbr.rel (!%p42_p5) target bundleno = 24 (0x18), region = 190 }
 0xb48   :  { %4415 = vsyncpa [#allocation5], 1 }
 0xb49   :  { %4417 = vsyncpa [#allocation5 + $0x1], 1 }
 0xb4a   :  { %4418 = vsyncpa [#allocation10], 1 }
 0xb4b   :  { %4419 = vsyncpa [#allocation6], 1 }
 0xb4c   :  { %4421 = vsyncpa [#allocation6 + $0x1], 1 }
 0xb4d   :  { %4422 = vsyncpa [#allocation13], 1 }
 0xb4e   :  { %4424 = vsyncpa [#allocation13 + $0x1], 1 }
 0xb4f   :  { %4425 = vsyncpa [#allocation7], 1 }
 0xb50   :  { %4427 = vsyncpa [#allocation7 + $0x1], 1 }

</bundles_post_ra>
